<compile_context>
chip_gen: v6e
topology: v6e:2x2x1
jax: 0.10.0
libtpu: 0.0.40
codegen_flags: <defaults>
</compile_context>

<pallas_src>
import numpy as np
import jax
import jax.numpy as jnp
from jax import lax
from jax.experimental import pallas as pl
from jax.experimental.pallas import tpu as pltpu

FLAT = 64                 # 8*8 input pixels == 16ch*2*2 flatten dim
C1_ROWS = 8 * 36          # 288  pooled conv1 rows: ci*36 + ph*6 + pw
C1_TAPS = 4 * C1_ROWS     # 1152 conv1-as-matmul rows (4 pooling taps)
C2_ROWS = 16 * 2 * 2      # 64   pooled conv2 rows == NCHW flatten order
C2_TAPS = 4 * C2_ROWS     # 256  conv2-as-matmul rows (4 pooling taps)
FC1_PAD = 384             # 300 -> 384
FC2_PAD = 128             # 100 -> 128
ACT_PAD = 8               # act_dim -> 8 (sublane-aligned, lane-dense output)
NEG_BIG = -1e30           # bias on padded logit rows -> exp underflows to 0


# ----------------------------- kernel ---------------------------------------
def policy_kernel(x_ref,                     # (64, BT)  rows = h*8+w, batch in lanes
                  w1b_ref, b1s_ref,          # (1152, 64) f32, (288, 1) f32
                  w2b_ref, b2s_ref,          # (256, 288) f32, (64, 1) f32
                  wfc1_ref, bfc1_ref,        # (384, 64) bf16, (384, 1) f32
                  wfc2_ref, bfc2_ref,        # (128, 384) bf16, (128, 1) f32
                  wfc3_ref, bfc3_ref,        # (8, 128) bf16, (8, 1) f32
                  out_ref):                  # (8, BT)
    x = x_ref[...]                                                     # (64, BT)

    # conv1 as one MXU matmul; rows grouped by pooling tap (4 x 288).
    v1 = jnp.dot(w1b_ref[...], x, preferred_element_type=jnp.float32)  # (1152, BT)
    # maxpool k=2 s=1 == max over the 4 tap slabs; add conv1 bias after the max.
    p = jnp.maximum(jnp.maximum(v1[0:C1_ROWS, :], v1[C1_ROWS:2 * C1_ROWS, :]),
                    jnp.maximum(v1[2 * C1_ROWS:3 * C1_ROWS, :],
                                v1[3 * C1_ROWS:4 * C1_ROWS, :])) + b1s_ref[...]

    # conv2 as one MXU matmul; rows grouped by pooling tap (4 x 64).
    v2 = jnp.dot(w2b_ref[...], p, preferred_element_type=jnp.float32)  # (256, BT)
    # maxpool k=2 s=2 (floor) + NCHW flatten: row g = c*4 + h*2 + w, in vregs.
    flat = jnp.maximum(jnp.maximum(v2[0:C2_ROWS, :], v2[C2_ROWS:2 * C2_ROWS, :]),
                       jnp.maximum(v2[2 * C2_ROWS:3 * C2_ROWS, :],
                                   v2[3 * C2_ROWS:4 * C2_ROWS, :])) + b2s_ref[...]

    # fc1 -> fc2 -> fc3 (no activations in the PyTorch module).
    # bf16 operands, f32 accumulation on the MXU.
    h1 = jnp.dot(wfc1_ref[...], flat.astype(jnp.bfloat16),
                 preferred_element_type=jnp.float32) + bfc1_ref[...]
    h2 = jnp.dot(wfc2_ref[...], h1.astype(jnp.bfloat16),
                 preferred_element_type=jnp.float32) + bfc2_ref[...]
    z = jnp.dot(wfc3_ref[...], h2.astype(jnp.bfloat16),
                preferred_element_type=jnp.float32) + bfc3_ref[...]    # (8, BT)

    # softmax over the 8 padded action rows (padded rows carry -1e30 bias).
    z = z - jnp.max(z, axis=0, keepdims=True)
    e = jnp.exp(z)
    out_ref[...] = e * pl.reciprocal(jnp.sum(e, axis=0, keepdims=True), approx=True)


# ------------------------ host-side weight prep ------------------------------
def _conv1_matrix(w1):
    """(1152, 64) banded matrix: row = tap*288 + co*36 + ph*6 + pw, col = h*8 + w."""
    rows, cols, sel = [], [], []
    for tap in range(4):
        dh, dw = divmod(tap, 2)
        for co in range(8):
            for ph in range(6):
                for pw in range(6):
                    r = tap * C1_ROWS + co * 36 + ph * 6 + pw
                    for kh in range(2):
                        for kw in range(2):
                            rows.append(r)
                            cols.append((ph + dh + kh) * 8 + (pw + dw + kw))
                            sel.append((co, 0, kh, kw))
    sel = np.asarray(sel)
    vals = w1.astype(jnp.float32)[sel[:, 0], sel[:, 1], sel[:, 2], sel[:, 3]]
    return jnp.zeros((C1_TAPS, FLAT), jnp.float32).at[
        np.asarray(rows), np.asarray(cols)].add(vals)


def _conv2_matrix(w2):
    """(256, 288) banded matrix: row = tap*64 + co*4 + oh*2 + ow, col = ci*36 + h*6 + w."""
    rows, cols, sel = [], [], []
    for tap in range(4):
        dh, dw = divmod(tap, 2)
        for co in range(16):
            for oh in range(2):
                for ow in range(2):
                    r = tap * C2_ROWS + co * 4 + oh * 2 + ow
                    for ci in range(8):
                        for kh in range(2):
                            for kw in range(2):
                                rows.append(r)
                                cols.append(ci * 36 + (2 * oh + dh + kh) * 6
                                            + (2 * ow + dw + kw))
                                sel.append((co, ci, kh, kw))
    sel = np.asarray(sel)
    vals = w2.astype(jnp.float32)[sel[:, 0], sel[:, 1], sel[:, 2], sel[:, 3]]
    return jnp.zeros((C2_TAPS, C1_ROWS), jnp.float32).at[
        np.asarray(rows), np.asarray(cols)].add(vals)


def _pick_b_tile(batch):
    """128 on v5e; 256 on v6e/v7x when the batch can fill it (keep >=2 tiles when possible)."""
    kind = ""
    try:
        kind = jax.devices()[0].device_kind.lower()
    except Exception:
        pass
    if "v5" in kind:
        return 128
    if batch <= 256:          # small batch: 128 avoids waste and feeds both v7x TCs sooner
        return 128
    return 256


# ------------------------------ wrapper --------------------------------------
def policy_forward(x_nchw, params, *, b_tile=None):
    (w1, b1, w2, b2, wfc1, bfc1, wfc2, bfc2, wfc3, bfc3) = params
    B = x_nchw.shape[0]
    act_dim = wfc3.shape[0]
    assert act_dim <= ACT_PAD, "act_dim must be <= 8"

    if b_tile is None:
        b_tile = _pick_b_tile(B)
    b_pad = ((B + b_tile - 1) // b_tile) * b_tile

    # input: NCHW (B,1,8,8) -> (64, B_pad), row = h*8 + w, batch in lanes.
    xk = jnp.transpose(x_nchw.astype(jnp.float32).reshape(B, FLAT), (1, 0))
    xk = jnp.pad(xk, ((0, 0), (0, b_pad - B)))

    # conv stages as banded matmul weights (built once per weight set).
    w1big = _conv1_matrix(w1)                                           # (1152, 64) f32
    b1slab = jnp.repeat(b1.astype(jnp.float32), 36).reshape(C1_ROWS, 1)
    w2big = _conv2_matrix(w2)                                           # (256, 288) f32
    b2slab = jnp.repeat(b2.astype(jnp.float32), 4).reshape(C2_ROWS, 1)

    # fc params in (out, in) orientation, zero-padded, weights in bf16.
    wfc1k = jnp.zeros((FC1_PAD, FLAT), jnp.float32).at[:300, :].set(
        wfc1.astype(jnp.float32)).astype(jnp.bfloat16)
    bfc1k = jnp.zeros((FC1_PAD, 1), jnp.float32).at[:300, 0].set(bfc1.astype(jnp.float32))
    wfc2k = jnp.zeros((FC2_PAD, FC1_PAD), jnp.float32).at[:100, :300].set(
        wfc2.astype(jnp.float32)).astype(jnp.bfloat16)
    bfc2k = jnp.zeros((FC2_PAD, 1), jnp.float32).at[:100, 0].set(bfc2.astype(jnp.float32))
    wfc3k = jnp.zeros((ACT_PAD, FC2_PAD), jnp.float32).at[:act_dim, :100].set(
        wfc3.astype(jnp.float32)).astype(jnp.bfloat16)
    bfc3k = jnp.full((ACT_PAD, 1), NEG_BIG, jnp.float32).at[:act_dim, 0].set(
        bfc3.astype(jnp.float32))

    def resident(shape):
        return pl.BlockSpec(shape, lambda i: (0, 0))      # constant block -> stays in VMEM

    out = pl.pallas_call(
        policy_kernel,
        out_shape=jax.ShapeDtypeStruct((ACT_PAD, b_pad), jnp.float32),
        grid_spec=pltpu.PrefetchScalarGridSpec(
            num_scalar_prefetch=0,
            grid=(b_pad // b_tile,),
            in_specs=[
                pl.BlockSpec((FLAT, b_tile), lambda i: (0, i)),   # x, pipelined over batch
                resident((C1_TAPS, FLAT)), resident((C1_ROWS, 1)),
                resident((C2_TAPS, C1_ROWS)), resident((C2_ROWS, 1)),
                resident((FC1_PAD, FLAT)), resident((FC1_PAD, 1)),
                resident((FC2_PAD, FC1_PAD)), resident((FC2_PAD, 1)),
                resident((ACT_PAD, FC2_PAD)), resident((ACT_PAD, 1)),
            ],
            out_specs=pl.BlockSpec((ACT_PAD, b_tile), lambda i: (0, i)),
        ),
        compiler_params=pltpu.CompilerParams(
            dimension_semantics=("parallel",),            # shard batch tiles across TCs
            vmem_limit_bytes=32 * 1024 * 1024,
        ),
    )(xk, w1big, b1slab, w2big, b2slab, wfc1k, bfc1k, wfc2k, bfc2k, wfc3k, bfc3k)

    return jnp.transpose(out[:act_dim, :B], (1, 0))       # (B, act_dim)


# --------------------------- init + reference --------------------------------
def init_params(key, act_dim):
    """Deterministic init mimicking PyTorch's default U(-1/sqrt(fan_in), 1/sqrt(fan_in))."""
    def uniform(k, shape, fan_in):
        bound = 1.0 / np.sqrt(fan_in)
        return jax.random.uniform(k, shape, jnp.float32, -bound, bound)
    ks = jax.random.split(key, 10)
    w1 = uniform(ks[0], (8, 1, 2, 2), 1 * 2 * 2)
    b1 = uniform(ks[1], (8,), 1 * 2 * 2)
    w2 = uniform(ks[2], (16, 8, 2, 2), 8 * 2 * 2)
    b2 = uniform(ks[3], (16,), 8 * 2 * 2)
    wfc1 = uniform(ks[4], (300, 64), 64)
    bfc1 = uniform(ks[5], (300,), 64)
    wfc2 = uniform(ks[6], (100, 300), 300)
    bfc2 = uniform(ks[7], (100,), 300)
    wfc3 = uniform(ks[8], (act_dim, 100), 100)
    bfc3 = uniform(ks[9], (act_dim,), 100)
    return (w1, b1, w2, b2, wfc1, bfc1, wfc2, bfc2, wfc3, bfc3)


def policy_ref(x_nchw, params):
    """Pure-JAX reference matching the PyTorch forward (NCHW)."""
    (w1, b1, w2, b2, wfc1, bfc1, wfc2, bfc2, wfc3, bfc3) = params
    dn = ('NCHW', 'OIHW', 'NCHW')
    hp = lax.Precision.HIGHEST
    v1 = lax.conv_general_dilated(x_nchw, w1, (1, 1), 'VALID',
                                  dimension_numbers=dn, precision=hp)
    v1 = v1 + b1[None, :, None, None]
    v1 = lax.reduce_window(v1, -jnp.inf, lax.max, (1, 1, 2, 2), (1, 1, 1, 1), 'VALID')
    v2 = lax.conv_general_dilated(v1, w2, (1, 1), 'VALID',
                                  dimension_numbers=dn, precision=hp)
    v2 = v2 + b2[None, :, None, None]
    v2 = lax.reduce_window(v2, -jnp.inf, lax.max, (1, 1, 2, 2), (1, 1, 2, 2), 'VALID')
    a3 = v2.reshape(x_nchw.shape[0], -1)
    f1 = jnp.dot(a3, wfc1.T, precision=hp) + bfc1
    f2 = jnp.dot(f1, wfc2.T, precision=hp) + bfc2
    z = jnp.dot(f2, wfc3.T, precision=hp) + bfc3
    return jax.nn.softmax(z, axis=1)


# --------------------------------- main ---------------------------------------
if __name__ == "__main__":
    key = jax.random.PRNGKey(0)
    k_x, k_p = jax.random.split(key)

    B, act_dim = 2, 4
    x = jax.random.normal(k_x, (B, 1, 8, 8), jnp.float32)   # NCHW, like PyTorch
    params = init_params(k_p, act_dim)

    out = policy_forward(x, params)
    out = jax.block_until_ready(out)

    ref = policy_ref(x, params)
    assert out.shape == (B, act_dim)
    np.testing.assert_allclose(np.asarray(out), np.asarray(ref), rtol=5e-3, atol=5e-3)

    print("KERNEL_OK")
</pallas_src>

<mosaic_0001>
module attributes {stable_mosaic.version = 11 : i64} {
  func.func @policy_kernel(%arg0: i32, %arg1: memref<64x128xf32, #tpu.memory_space<vmem>>, %arg2: memref<1152x64xf32, #tpu.memory_space<vmem>>, %arg3: memref<288x1xf32, #tpu.memory_space<vmem>>, %arg4: memref<256x288xf32, #tpu.memory_space<vmem>>, %arg5: memref<64x1xf32, #tpu.memory_space<vmem>>, %arg6: memref<384x64xbf16, #tpu.memory_space<vmem>>, %arg7: memref<384x1xf32, #tpu.memory_space<vmem>>, %arg8: memref<128x384xbf16, #tpu.memory_space<vmem>>, %arg9: memref<128x1xf32, #tpu.memory_space<vmem>>, %arg10: memref<8x128xbf16, #tpu.memory_space<vmem>>, %arg11: memref<8x1xf32, #tpu.memory_space<vmem>>, %arg12: memref<8x128xf32, #tpu.memory_space<vmem>>) attributes {dimension_semantics = [#tpu.dimension_semantics<parallel>], iteration_bounds = array<i64: 1>, scalar_prefetch = 0 : i64, scratch_operands = 0 : i64, tpu.core_type = #tpu.core_type<tc>, window_params = [{transform_indices = @transform_0, window_bounds = array<i64: 64, 128>}, {pipeline_mode = #tpu.pipeline_mode<synchronous>, transform_indices = @transform_1, window_bounds = array<i64: 1152, 64>}, {pipeline_mode = #tpu.pipeline_mode<synchronous>, transform_indices = @transform_2, window_bounds = array<i64: 288, 1>}, {pipeline_mode = #tpu.pipeline_mode<synchronous>, transform_indices = @transform_3, window_bounds = array<i64: 256, 288>}, {pipeline_mode = #tpu.pipeline_mode<synchronous>, transform_indices = @transform_4, window_bounds = array<i64: 64, 1>}, {pipeline_mode = #tpu.pipeline_mode<synchronous>, transform_indices = @transform_5, window_bounds = array<i64: 384, 64>}, {pipeline_mode = #tpu.pipeline_mode<synchronous>, transform_indices = @transform_6, window_bounds = array<i64: 384, 1>}, {pipeline_mode = #tpu.pipeline_mode<synchronous>, transform_indices = @transform_7, window_bounds = array<i64: 128, 384>}, {pipeline_mode = #tpu.pipeline_mode<synchronous>, transform_indices = @transform_8, window_bounds = array<i64: 128, 1>}, {pipeline_mode = #tpu.pipeline_mode<synchronous>, transform_indices = @transform_9, window_bounds = array<i64: 8, 128>}, {pipeline_mode = #tpu.pipeline_mode<synchronous>, transform_indices = @transform_10, window_bounds = array<i64: 8, 1>}, {transform_indices = @transform_11, window_bounds = array<i64: 8, 128>}]} {
    %c0 = arith.constant 0 : index
    %c0_0 = arith.constant 0 : index
    %0 = vector.load %arg1[%c0, %c0_0] : memref<64x128xf32, #tpu.memory_space<vmem>>, vector<64x128xf32>
    %c0_1 = arith.constant 0 : index
    %c0_2 = arith.constant 0 : index
    %1 = vector.load %arg2[%c0_1, %c0_2] : memref<1152x64xf32, #tpu.memory_space<vmem>>, vector<1152x64xf32>
    %cst = arith.constant dense<0.000000e+00> : vector<1152x128xf32>
    %2 = tpu.matmul %1, %0, %cst {dimension_numbers = #tpu.dot_dimension_numbers<[1], [0], [0], [1], [0, 0, 1, 1], [], []>} : vector<1152x64xf32>, vector<64x128xf32>, vector<1152x128xf32> -> vector<1152x128xf32>
    %3 = vector.extract_strided_slice %2 {offsets = [0, 0], sizes = [288, 128], strides = [1, 1]} : vector<1152x128xf32> to vector<288x128xf32>
    %4 = vector.extract_strided_slice %2 {offsets = [288, 0], sizes = [288, 128], strides = [1, 1]} : vector<1152x128xf32> to vector<288x128xf32>
    %5 = arith.maximumf %3, %4 : vector<288x128xf32>
    %6 = vector.extract_strided_slice %2 {offsets = [576, 0], sizes = [288, 128], strides = [1, 1]} : vector<1152x128xf32> to vector<288x128xf32>
    %7 = vector.extract_strided_slice %2 {offsets = [864, 0], sizes = [288, 128], strides = [1, 1]} : vector<1152x128xf32> to vector<288x128xf32>
    %8 = arith.maximumf %6, %7 : vector<288x128xf32>
    %9 = arith.maximumf %5, %8 : vector<288x128xf32>
    %c0_3 = arith.constant 0 : index
    %c0_4 = arith.constant 0 : index
    %10 = vector.load %arg3[%c0_3, %c0_4] : memref<288x1xf32, #tpu.memory_space<vmem>>, vector<288x1xf32>
    %11 = vector.broadcast %10 : vector<288x1xf32> to vector<288x128xf32>
    %12 = arith.addf %9, %11 : vector<288x128xf32>
    %c0_5 = arith.constant 0 : index
    %c0_6 = arith.constant 0 : index
    %13 = vector.load %arg4[%c0_5, %c0_6] : memref<256x288xf32, #tpu.memory_space<vmem>>, vector<256x288xf32>
    %cst_7 = arith.constant dense<0.000000e+00> : vector<256x128xf32>
    %14 = tpu.matmul %13, %12, %cst_7 {dimension_numbers = #tpu.dot_dimension_numbers<[1], [0], [0], [1], [0, 0, 1, 1], [], []>} : vector<256x288xf32>, vector<288x128xf32>, vector<256x128xf32> -> vector<256x128xf32>
    %15 = vector.extract_strided_slice %14 {offsets = [0, 0], sizes = [64, 128], strides = [1, 1]} : vector<256x128xf32> to vector<64x128xf32>
    %16 = vector.extract_strided_slice %14 {offsets = [64, 0], sizes = [64, 128], strides = [1, 1]} : vector<256x128xf32> to vector<64x128xf32>
    %17 = arith.maximumf %15, %16 : vector<64x128xf32>
    %18 = vector.extract_strided_slice %14 {offsets = [128, 0], sizes = [64, 128], strides = [1, 1]} : vector<256x128xf32> to vector<64x128xf32>
    %19 = vector.extract_strided_slice %14 {offsets = [192, 0], sizes = [64, 128], strides = [1, 1]} : vector<256x128xf32> to vector<64x128xf32>
    %20 = arith.maximumf %18, %19 : vector<64x128xf32>
    %21 = arith.maximumf %17, %20 : vector<64x128xf32>
    %c0_8 = arith.constant 0 : index
    %c0_9 = arith.constant 0 : index
    %22 = vector.load %arg5[%c0_8, %c0_9] : memref<64x1xf32, #tpu.memory_space<vmem>>, vector<64x1xf32>
    %23 = vector.broadcast %22 : vector<64x1xf32> to vector<64x128xf32>
    %24 = arith.addf %21, %23 : vector<64x128xf32>
    %c0_10 = arith.constant 0 : index
    %c0_11 = arith.constant 0 : index
    %25 = vector.load %arg6[%c0_10, %c0_11] : memref<384x64xbf16, #tpu.memory_space<vmem>>, vector<384x64xbf16>
    %26 = arith.truncf %24 : vector<64x128xf32> to vector<64x128xbf16>
    %cst_12 = arith.constant dense<0.000000e+00> : vector<384x128xf32>
    %27 = tpu.matmul %25, %26, %cst_12 {dimension_numbers = #tpu.dot_dimension_numbers<[1], [0], [0], [1], [0, 0, 1, 1], [], []>} : vector<384x64xbf16>, vector<64x128xbf16>, vector<384x128xf32> -> vector<384x128xf32>
    %c0_13 = arith.constant 0 : index
    %c0_14 = arith.constant 0 : index
    %28 = vector.load %arg7[%c0_13, %c0_14] : memref<384x1xf32, #tpu.memory_space<vmem>>, vector<384x1xf32>
    %29 = vector.broadcast %28 : vector<384x1xf32> to vector<384x128xf32>
    %30 = arith.addf %27, %29 : vector<384x128xf32>
    %c0_15 = arith.constant 0 : index
    %c0_16 = arith.constant 0 : index
    %31 = vector.load %arg8[%c0_15, %c0_16] : memref<128x384xbf16, #tpu.memory_space<vmem>>, vector<128x384xbf16>
    %32 = arith.truncf %30 : vector<384x128xf32> to vector<384x128xbf16>
    %cst_17 = arith.constant dense<0.000000e+00> : vector<128x128xf32>
    %33 = tpu.matmul %31, %32, %cst_17 {dimension_numbers = #tpu.dot_dimension_numbers<[1], [0], [0], [1], [0, 0, 1, 1], [], []>} : vector<128x384xbf16>, vector<384x128xbf16>, vector<128x128xf32> -> vector<128x128xf32>
    %c0_18 = arith.constant 0 : index
    %c0_19 = arith.constant 0 : index
    %34 = vector.load %arg9[%c0_18, %c0_19] : memref<128x1xf32, #tpu.memory_space<vmem>>, vector<128x1xf32>
    %35 = vector.broadcast %34 : vector<128x1xf32> to vector<128x128xf32>
    %36 = arith.addf %33, %35 : vector<128x128xf32>
    %c0_20 = arith.constant 0 : index
    %c0_21 = arith.constant 0 : index
    %37 = vector.load %arg10[%c0_20, %c0_21] : memref<8x128xbf16, #tpu.memory_space<vmem>>, vector<8x128xbf16>
    %38 = arith.truncf %36 : vector<128x128xf32> to vector<128x128xbf16>
    %cst_22 = arith.constant dense<0.000000e+00> : vector<8x128xf32>
    %39 = tpu.matmul %37, %38, %cst_22 {dimension_numbers = #tpu.dot_dimension_numbers<[1], [0], [0], [1], [0, 0, 1, 1], [], []>} : vector<8x128xbf16>, vector<128x128xbf16>, vector<8x128xf32> -> vector<8x128xf32>
    %c0_23 = arith.constant 0 : index
    %c0_24 = arith.constant 0 : index
    %40 = vector.load %arg11[%c0_23, %c0_24] : memref<8x1xf32, #tpu.memory_space<vmem>>, vector<8x1xf32>
    %41 = vector.broadcast %40 : vector<8x1xf32> to vector<8x128xf32>
    %42 = arith.addf %39, %41 : vector<8x128xf32>
    %cst_25 = arith.constant dense<0xFF800000> : vector<128xf32>
    %43 = vector.multi_reduction <maximumf>, %42, %cst_25 [0] : vector<8x128xf32> to vector<128xf32>
    %44 = vector.shape_cast %43 : vector<128xf32> to vector<1x128xf32>
    %45 = vector.broadcast %44 : vector<1x128xf32> to vector<8x128xf32>
    %46 = arith.subf %42, %45 : vector<8x128xf32>
    %47 = math.exp %46 : vector<8x128xf32>
    %cst_26 = arith.constant dense<0.000000e+00> : vector<128xf32>
    %48 = vector.multi_reduction <add>, %47, %cst_26 [0] : vector<8x128xf32> to vector<128xf32>
    %49 = vector.shape_cast %48 : vector<128xf32> to vector<1x128xf32>
    %50 = tpu.reciprocal %49 {approx = true} : vector<1x128xf32> -> vector<1x128xf32>
    %51 = vector.broadcast %50 : vector<1x128xf32> to vector<8x128xf32>
    %52 = arith.mulf %47, %51 : vector<8x128xf32>
    %c0_27 = arith.constant 0 : index
    %c0_28 = arith.constant 0 : index
    %53 = vector.load %arg12[%c0_27, %c0_28] : memref<8x128xf32, #tpu.memory_space<vmem>>, vector<8x128xf32>
    tpu.vector_store %arg12[%c0_27, %c0_28], %52 {strides = array<i32>} : memref<8x128xf32, #tpu.memory_space<vmem>>, vector<8x128xf32>,
    return
  }
  func.func @transform_0(%arg0: i32) -> (i32, i32) {
    %c0_i32 = arith.constant 0 : i32
    %c0_i32_0 = arith.constant 0 : i32
    return %c0_i32, %arg0 : i32, i32
  }
  func.func @transform_1(%arg0: i32) -> (i32, i32) {
    %c0_i32 = arith.constant 0 : i32
    %c0_i32_0 = arith.constant 0 : i32
    %c0_i32_1 = arith.constant 0 : i32
    return %c0_i32, %c0_i32_0 : i32, i32
  }
  func.func @transform_2(%arg0: i32) -> (i32, i32) {
    %c0_i32 = arith.constant 0 : i32
    %c0_i32_0 = arith.constant 0 : i32
    %c0_i32_1 = arith.constant 0 : i32
    return %c0_i32, %c0_i32_0 : i32, i32
  }
  func.func @transform_3(%arg0: i32) -> (i32, i32) {
    %c0_i32 = arith.constant 0 : i32
    %c0_i32_0 = arith.constant 0 : i32
    %c0_i32_1 = arith.constant 0 : i32
    return %c0_i32, %c0_i32_0 : i32, i32
  }
  func.func @transform_4(%arg0: i32) -> (i32, i32) {
    %c0_i32 = arith.constant 0 : i32
    %c0_i32_0 = arith.constant 0 : i32
    %c0_i32_1 = arith.constant 0 : i32
    return %c0_i32, %c0_i32_0 : i32, i32
  }
  func.func @transform_5(%arg0: i32) -> (i32, i32) {
    %c0_i32 = arith.constant 0 : i32
    %c0_i32_0 = arith.constant 0 : i32
    %c0_i32_1 = arith.constant 0 : i32
    return %c0_i32, %c0_i32_0 : i32, i32
  }
  func.func @transform_6(%arg0: i32) -> (i32, i32) {
    %c0_i32 = arith.constant 0 : i32
    %c0_i32_0 = arith.constant 0 : i32
    %c0_i32_1 = arith.constant 0 : i32
    return %c0_i32, %c0_i32_0 : i32, i32
  }
  func.func @transform_7(%arg0: i32) -> (i32, i32) {
    %c0_i32 = arith.constant 0 : i32
    %c0_i32_0 = arith.constant 0 : i32
    %c0_i32_1 = arith.constant 0 : i32
    return %c0_i32, %c0_i32_0 : i32, i32
  }
  func.func @transform_8(%arg0: i32) -> (i32, i32) {
    %c0_i32 = arith.constant 0 : i32
    %c0_i32_0 = arith.constant 0 : i32
    %c0_i32_1 = arith.constant 0 : i32
    return %c0_i32, %c0_i32_0 : i32, i32
  }
  func.func @transform_9(%arg0: i32) -> (i32, i32) {
    %c0_i32 = arith.constant 0 : i32
    %c0_i32_0 = arith.constant 0 : i32
    %c0_i32_1 = arith.constant 0 : i32
    return %c0_i32, %c0_i32_0 : i32, i32
  }
  func.func @transform_10(%arg0: i32) -> (i32, i32) {
    %c0_i32 = arith.constant 0 : i32
    %c0_i32_0 = arith.constant 0 : i32
    %c0_i32_1 = arith.constant 0 : i32
    return %c0_i32, %c0_i32_0 : i32, i32
  }
  func.func @transform_11(%arg0: i32) -> (i32, i32) {
    %c0_i32 = arith.constant 0 : i32
    %c0_i32_0 = arith.constant 0 : i32
    return %c0_i32, %arg0 : i32, i32
  }
}

</mosaic_0001>

<bundles_post_ra>
// kernel: tpu_custom_call.1
= control target key start
LH: loop header
LB: loop body
LE: loop exit
PB: predicated region body
PF: predicated region fallthrough
CT: control target
= control target key end

     0   :  { %vm192_vm0 = vcmask 523264   ;;  %v4848_v2 = vmov 0   ;;  %s7157_s0 = inlined_call_operand.vmem [shape: f32[64,128], index: 0, kind: input, shape index: {}]   ;;  %s7158_s1 = inlined_call_operand.vmem [shape: f32[1152,64], index: 1, kind: input, shape index: {}]   ;;  %s7159_s2 = inlined_call_operand.vmem [shape: f32[288,1], index: 2, kind: input, shape index: {}]   ;;  %s7160_s3 = inlined_call_operand.vmem [shape: f32[256,288], index: 3, kind: input, shape index: {}]   ;;  %s7161_s4 = inlined_call_operand.vmem [shape: f32[64,1], index: 4, kind: input, shape index: {}]   ;;  %s7162_s5 = inlined_call_operand.vmem [shape: bf16[384,64], index: 5, kind: input, shape index: {}]   ;;  %s7163_s6 = inlined_call_operand.vmem [shape: f32[384,1], index: 6, kind: input, shape index: {}]   ;;  %s7164_s7 = inlined_call_operand.vmem [shape: bf16[128,384], index: 7, kind: input, shape index: {}]   ;;  %s7165_s8 = inlined_call_operand.vmem [shape: f32[128,1], index: 8, kind: input, shape index: {}]   ;;  %s7166_s9 = inlined_call_operand.vmem [shape: bf16[8,128], index: 9, kind: input, shape index: {}]   ;;  %s7167_s10 = inlined_call_operand.vmem [shape: f32[8,1], index: 10, kind: input, shape index: {}]   ;;  %s7168_s11 = inlined_call_operand.hbm [shape: f32[8,128], index: 11, kind: output, shape index: {}]  }
   0x1   :  { %v47_v0 = vld [vmem:[%s7157_s0 + $0x38] sm:$0xff]  ;;  %v46_v1 = vld [vmem:[%s7157_s0 + $0x30] sm:$0xff]  ;;  %4764 = vset.pattern.permute.xlu0 %v4848_v2  ;;  %v45_v3 = vld [vmem:[%s7157_s0 + $0x28] sm:$0xff]  ;;  %4765 = vset.pattern.permute.xlu1 %v4848_v2 }
   0x2   :  { %4364 = vmatprep.subr.mxu0 %v47_v0  ;;  %v48_v4 = vld [vmem:[%s7158_s1] sm:$0xff]  ;;  %v43_v6 = vld [vmem:[%s7157_s0 + $0x18] sm:$0xff]  ;;  %v42_v7 = vld [vmem:[%s7157_s0 + $0x10] sm:$0xff] }
   0x3   :  { %4365 = vmatpush3.msra.mxu0 %v47_v0  ;;  %4380 = vmatprep.mubr.msk.f32.mxu0 %vm192_vm0, %v48_v4  ;;  %v44_v5 = vld [vmem:[%s7157_s0 + $0x20] sm:$0xff]  ;;  %v41_v8 = vld [vmem:[%s7157_s0 + $0x8] sm:$0xff]  ;;  %v50_v11 = vld [vmem:[%s7158_s1 + $0x10] sm:$0xff] }
   0x4   :  { %4366 = vmatprep.subr.mxu0 %v46_v1  ;;  %v40_v9 = vld [vmem:[%s7157_s0] sm:$0xff]  ;;  %v49_v10 = vld [vmem:[%s7158_s1 + $0x8] sm:$0xff]  ;;  %v51_v12 = vld [vmem:[%s7158_s1 + $0x18] sm:$0xff] }
   0x5   :  { %4367 = vmatpush3.msra.mxu0 %v46_v1  ;;  %v52_v13 = vld [vmem:[%s7158_s1 + $0x20] sm:$0xff]  ;;  %v1533_v14 = vld [vmem:[%s7159_s2 + $0x78] sm:$0xff]  ;;  %v1532_v15 = vld [vmem:[%s7159_s2 + $0x70] sm:$0xff] }
   0x6   :  { %4368 = vmatprep.subr.mxu0 %v45_v3  ;;  %1631 = vperm.xlu0 %4764, %v1533_v14   ;;  %v1531_v16 = vld [vmem:[%s7159_s2 + $0x68] sm:$0xff]  ;;  %v54_v18 = vld [vmem:[%s7158_s1 + $0x30] sm:$0xff]  ;;  %v1530_v19 = vld [vmem:[%s7159_s2 + $0x60] sm:$0xff] }
   0x7   :  { %4369 = vmatpush3.msra.mxu0 %v45_v3  ;;  %v53_v17 = vld [vmem:[%s7158_s1 + $0x28] sm:$0xff]  ;;  %1621 = vperm.xlu1 %4765, %v1531_v16   ;;  %v1529_v20 = vld [vmem:[%s7159_s2 + $0x58] sm:$0xff]  ;;  %v56_v22 = vld [vmem:[%s7158_s1 + $0x40] sm:$0xff] }
   0x8   :  { %4370 = vmatprep.subr.mxu0 %v44_v5  ;;  %v55_v21 = vld [vmem:[%s7158_s1 + $0x38] sm:$0xff]  ;;  %v1528_v23 = vld [vmem:[%s7159_s2 + $0x50] sm:$0xff]  ;;  %v1527_v24 = vld [vmem:[%s7159_s2 + $0x48] sm:$0xff] }
   0x9   :  { %4371 = vmatpush3.msra.mxu0 %v44_v5  ;;  %v57_v25 = vld [vmem:[%s7158_s1 + $0x48] sm:$0xff]  ;;  %v58_v26 = vld [vmem:[%s7158_s1 + $0x50] sm:$0xff]  ;;  %v1526_v27 = vld [vmem:[%s7159_s2 + $0x40] sm:$0xff] }
   0xa   :  { %4372 = vmatprep.subr.mxu0 %v43_v6  ;;  %1626 = vperm.xlu0 %4764, %v1532_v15   ;;  %v1525_v28 = vld [vmem:[%s7159_s2 + $0x38] sm:$0xff]  ;;  %v60_v30 = vld [vmem:[%s7158_s1 + $0x60] sm:$0xff]  ;;  %v1524_v31 = vld [vmem:[%s7159_s2 + $0x30] sm:$0xff] }
   0xb   :  { %4373 = vmatpush3.msra.mxu0 %v43_v6  ;;  %1616 = vperm.xlu1 %4765, %v1530_v19   ;;  %v59_v29 = vld [vmem:[%s7158_s1 + $0x58] sm:$0xff]  ;;  %v61_v32 = vld [vmem:[%s7158_s1 + $0x68] sm:$0xff]  ;;  %v62_v33 = vld [vmem:[%s7158_s1 + $0x70] sm:$0xff] }
   0xc   :  { %4374 = vmatprep.subr.mxu0 %v42_v7  ;;  %v1523_v34 = vld [vmem:[%s7159_s2 + $0x28] sm:$0xff]  ;;  %v1522_v35 = vld [vmem:[%s7159_s2 + $0x20] sm:$0xff]  ;;  %v63_v36 = vld [vmem:[%s7158_s1 + $0x78] sm:$0xff] }
   0xd   :  { %4375 = vmatpush3.msra.mxu0 %v42_v7  ;;  %v64_v37 = vld [vmem:[%s7158_s1 + $0x80] sm:$0xff]  ;;  %v1521_v38 = vld [vmem:[%s7159_s2 + $0x18] sm:$0xff]  ;;  %v1520_v39 = vld [vmem:[%s7159_s2 + $0x10] sm:$0xff] }
   0xe   :  { %4376 = vmatprep.subr.mxu0 %v41_v8  ;;  %1611 = vperm.xlu0 %4764, %v1529_v20   ;;  %v65_v40 = vld [vmem:[%s7158_s1 + $0x88] sm:$0xff]  ;;  %v66_v41 = vld [vmem:[%s7158_s1 + $0x90] sm:$0xff]  ;;  %v1518_v43 = vld [vmem:[%s7159_s2] sm:$0xff] }
   0xf   :  { %4377 = vmatpush3.msra.mxu0 %v41_v8  ;;  %1606 = vperm.xlu1 %4765, %v1528_v23   ;;  %v1519_v42 = vld [vmem:[%s7159_s2 + $0x8] sm:$0xff]  ;;  %v67_v44 = vld [vmem:[%s7158_s1 + $0x98] sm:$0xff]  ;;  %v68_v45 = vld [vmem:[%s7158_s1 + $0xa0] sm:$0xff] }
  0x10   :  { %4378 = vmatprep.subr.mxu0 %v40_v9  ;;  %v1549_v46 = vld [vmem:[%s7159_s2 + $0xf8] sm:$0xff]  ;;  %v1548_v47 = vld [vmem:[%s7159_s2 + $0xf0] sm:$0xff]  ;;  %v69_v48 = vld [vmem:[%s7158_s1 + $0xa8] sm:$0xff] }
  0x11   :  { %4379 = vmatpush3.msra.mxu0 %v40_v9  ;;  %v70_v49 = vld [vmem:[%s7158_s1 + $0xb0] sm:$0xff]  ;;  %v1547_v50 = vld [vmem:[%s7159_s2 + $0xe8] sm:$0xff]  ;;  %v1546_v51 = vld [vmem:[%s7159_s2 + $0xe0] sm:$0xff] }
  0x12   :  { %4381 = vmatmul.mubr.msk.f32.vlgmr.msra.gmra.mxu0 %vm192_vm0, %v49_v10  ;;  %1601 = vperm.xlu0 %4764, %v1527_v24   ;;  %v71_v52 = vld [vmem:[%s7158_s1 + $0xb8] sm:$0xff]  ;;  %v72_v53 = vld [vmem:[%s7158_s1 + $0xc0] sm:$0xff]  ;;  %v1544_v55 = vld [vmem:[%s7159_s2 + $0xd0] sm:$0xff] }
  0x13   :  { %4383 = vmatprep.mubr.msk.f32.mxu0 %vm192_vm0, %v50_v11  ;;  %1596 = vperm.xlu1 %4765, %v1526_v27   ;;  %v1545_v54 = vld [vmem:[%s7159_s2 + $0xd8] sm:$0xff]  ;;  %v73_v56 = vld [vmem:[%s7158_s1 + $0xc8] sm:$0xff]  ;;  %v74_v57 = vld [vmem:[%s7158_s1 + $0xd0] sm:$0xff] }
  0x14   :  { %v1543_v58 = vld [vmem:[%s7159_s2 + $0xc8] sm:$0xff]  ;;  %v1542_v59 = vld [vmem:[%s7159_s2 + $0xc0] sm:$0xff]  ;;  %v75_v60 = vld [vmem:[%s7158_s1 + $0xd8] sm:$0xff] }
  0x15   :  { %v76_v61 = vld [vmem:[%s7158_s1 + $0xe0] sm:$0xff]  ;;  %v1541_v62 = vld [vmem:[%s7159_s2 + $0xb8] sm:$0xff]  ;;  %v1540_v63 = vld [vmem:[%s7159_s2 + $0xb0] sm:$0xff] }
  0x16   :  { %4384 = vmatmul.mubr.msk.f32.gmra.mxu0 %vm192_vm0, %v51_v12  ;;  %1591 = vperm.xlu0 %4764, %v1525_v28   ;;  %v77_v0 = vld [vmem:[%s7158_s1 + $0xe8] sm:$0xff]  ;;  %v78_v1 = vld [vmem:[%s7158_s1 + $0xf0] sm:$0xff]  ;;  %v1538_v3 = vld [vmem:[%s7159_s2 + $0xa0] sm:$0xff] }
  0x17   :  { %4386 = vmatprep.mubr.msk.f32.mxu0 %vm192_vm0, %v52_v13  ;;  %1586 = vperm.xlu1 %4765, %v1524_v31   ;;  %v1539_v2 = vld [vmem:[%s7159_s2 + $0xa8] sm:$0xff]  ;;  %v79_v4 = vld [vmem:[%s7158_s1 + $0xf8] sm:$0xff]  ;;  %v80_v5 = vld [vmem:[%s7158_s1 + $0x100] sm:$0xff] }
  0x18   :  { %v1537_v6 = vld [vmem:[%s7159_s2 + $0x98] sm:$0xff]  ;;  %v1536_v7 = vld [vmem:[%s7159_s2 + $0x90] sm:$0xff] }
  0x1a   :  { %4387 = vmatmul.mubr.msk.f32.gmra.mxu0 %vm192_vm0, %v53_v17  ;;  %1581 = vperm.xlu0 %4764, %v1523_v34  }
  0x1b   :  { %4389 = vmatprep.mubr.msk.f32.mxu0 %vm192_vm0, %v54_v18  ;;  %1576 = vperm.xlu1 %4765, %v1522_v35  }
  0x1e   :  { %4390 = vmatmul.mubr.msk.f32.gmra.mxu0 %vm192_vm0, %v55_v21  ;;  %1571 = vperm.xlu0 %4764, %v1521_v38  }
  0x1f   :  { %4392 = vmatprep.mubr.msk.f32.mxu0 %vm192_vm0, %v56_v22  ;;  %1566 = vperm.xlu1 %4765, %v1520_v39  }
  0x22   :  { %4393 = vmatmul.mubr.msk.f32.gmra.mxu0 %vm192_vm0, %v57_v25  ;;  %1561 = vperm.xlu0 %4764, %v1519_v42  }
  0x23   :  { %4395 = vmatprep.mubr.msk.f32.mxu0 %vm192_vm0, %v58_v26  ;;  %1556 = vperm.xlu1 %4765, %v1518_v43  }
  0x26   :  { %4396 = vmatmul.mubr.msk.f32.gmra.mxu0 %vm192_vm0, %v59_v29  ;;  %1711 = vperm.xlu0 %4764, %v1549_v46  }
  0x27   :  { %4398 = vmatprep.mubr.msk.f32.mxu0 %vm192_vm0, %v60_v30  ;;  %1706 = vperm.xlu1 %4765, %v1548_v47  }
  0x2a   :  { %4399 = vmatmul.mubr.msk.f32.gmra.mxu0 %vm192_vm0, %v61_v32  ;;  %1701 = vperm.xlu0 %4764, %v1547_v50  }
  0x2b   :  { %4401 = vmatprep.mubr.msk.f32.mxu0 %vm192_vm0, %v62_v33  ;;  %1696 = vperm.xlu1 %4765, %v1546_v51  }
  0x2e   :  { %4402 = vmatmul.mubr.msk.f32.gmra.mxu0 %vm192_vm0, %v63_v36  ;;  %1691 = vperm.xlu0 %4764, %v1545_v54  }
  0x2f   :  { %4404 = vmatprep.mubr.msk.f32.mxu0 %vm192_vm0, %v64_v37  ;;  %1686 = vperm.xlu1 %4765, %v1544_v55  }
  0x32   :  { %4405 = vmatmul.mubr.msk.f32.gmra.mxu0 %vm192_vm0, %v65_v40  ;;  %1681 = vperm.xlu0 %4764, %v1543_v58  }
  0x33   :  { %4407 = vmatprep.mubr.msk.f32.mxu0 %vm192_vm0, %v66_v41  ;;  %1676 = vperm.xlu1 %4765, %v1542_v59  }
  0x36   :  { %4408 = vmatmul.mubr.msk.f32.gmra.mxu0 %vm192_vm0, %v67_v44  ;;  %1671 = vperm.xlu0 %4764, %v1541_v62  }
  0x37   :  { %4410 = vmatprep.mubr.msk.f32.mxu0 %vm192_vm0, %v68_v45  ;;  %1666 = vperm.xlu1 %4765, %v1540_v63  }
  0x3a   :  { %4411 = vmatmul.mubr.msk.f32.gmra.mxu0 %vm192_vm0, %v69_v48  ;;  %1661 = vperm.xlu0 %4764, %v1539_v2  }
  0x3b   :  { %4413 = vmatprep.mubr.msk.f32.mxu0 %vm192_vm0, %v70_v49  ;;  %1656 = vperm.xlu1 %4765, %v1538_v3  }
  0x3e   :  { %4414 = vmatmul.mubr.msk.f32.gmra.mxu0 %vm192_vm0, %v71_v52  ;;  %1651 = vperm.xlu0 %4764, %v1537_v6  }
  0x3f   :  { %4416 = vmatprep.mubr.msk.f32.mxu0 %vm192_vm0, %v72_v53 }
  0x42   :  { %4417 = vmatmul.mubr.msk.f32.gmra.mxu0 %vm192_vm0, %v73_v56 }
  0x43   :  { %4419 = vmatprep.mubr.msk.f32.mxu0 %vm192_vm0, %v74_v57 }
  0x46   :  { %4420 = vmatmul.mubr.msk.f32.gmra.mxu0 %vm192_vm0, %v75_v60 }
  0x47   :  { %4422 = vmatprep.mubr.msk.f32.mxu0 %vm192_vm0, %v76_v61 }
  0x4a   :  { %4423 = vmatmul.mubr.msk.f32.gmra.mxu0 %vm192_vm0, %v77_v0 }
  0x4b   :  { %4425 = vmatprep.mubr.msk.f32.mxu0 %vm192_vm0, %v78_v1 }
  0x4c   :  { %16 = vsyncpa [#allocation3], 0  ;;  %v1535_v8 = vld [vmem:[%s7159_s2 + $0x88] sm:$0xff]  ;;  %1646 = vperm.xlu1 %4765, %v1536_v7   ;;  %v82_v10 = vld [vmem:[%s7158_s1 + $0x110] sm:$0xff]  ;;  %vm1866_vm1 = vcmask 261120   ;;  %vm4850_vm2 = vmmov 0  }
  0x4d   :  { %v81_v9 = vld [vmem:[%s7158_s1 + $0x108] sm:$0xff]  ;;  %v1534_v11 = vld [vmem:[%s7159_s2 + $0x80] sm:$0xff]  ;;  %1641 = vperm.xlu0 %4764, %v1535_v8   ;;  %v1553_v12 = vld [vmem:[%s7159_s2 + $0x118] sm:$0xff] }
  0x4e   :  { %4426 = vmatmul.mubr.msk.f32.gmra.mxu0 %vm192_vm0, %v79_v4  ;;  %v83_v13 = vld [vmem:[%s7158_s1 + $0x118] sm:$0xff]  ;;  %v84_v14 = vld [vmem:[%s7158_s1 + $0x120] sm:$0xff]  ;;  %v1552_v15 = vld [vmem:[%s7159_s2 + $0x110] sm:$0xff] }
  0x4f   :  { %4428 = vmatprep.mubr.msk.f32.mxu0 %vm192_vm0, %v80_v5  ;;  %v1551_v16 = vld [vmem:[%s7159_s2 + $0x108] sm:$0xff]  ;;  %v86_v18 = vld [vmem:[%s7158_s1 + $0x130] sm:$0xff]  ;;  %v1550_v19 = vld [vmem:[%s7159_s2 + $0x100] sm:$0xff] }
  0x50   :  { %1636 = vperm.xlu1 %4765, %v1534_v11   ;;  %v85_v17 = vld [vmem:[%s7158_s1 + $0x128] sm:$0xff]  ;;  %v2443_v20 = vld [vmem:[%s7161_s4 + $0x30] sm:$0xff]  ;;  %v87_v21 = vld [vmem:[%s7158_s1 + $0x138] sm:$0xff] }
  0x51   :  { %1731 = vperm.xlu0 %4764, %v1553_v12   ;;  %v88_v22 = vld [vmem:[%s7158_s1 + $0x140] sm:$0xff]  ;;  %v2444_v23 = vld [vmem:[%s7161_s4 + $0x38] sm:$0xff]  ;;  %v89_v25 = vld [vmem:[%s7158_s1 + $0x148] sm:$0xff] }
  0x52   :  { %4429 = vmatmul.mubr.msk.f32.gmra.mxu0 %vm192_vm0, %v81_v9  ;;  %v2441_v24 = vld [vmem:[%s7161_s4 + $0x20] sm:$0xff]  ;;  %v90_v26 = vld [vmem:[%s7158_s1 + $0x150] sm:$0xff]  ;;  %v2442_v27 = vld [vmem:[%s7161_s4 + $0x28] sm:$0xff] }
  0x53   :  { %4431 = vmatprep.mubr.msk.f32.mxu0 %vm192_vm0, %v82_v10  ;;  %v2439_v28 = vld [vmem:[%s7161_s4 + $0x10] sm:$0xff]  ;;  %v91_v29 = vld [vmem:[%s7158_s1 + $0x158] sm:$0xff]  ;;  %v92_v30 = vld [vmem:[%s7158_s1 + $0x160] sm:$0xff] }
  0x54   :  { %1726 = vperm.xlu1 %4765, %v1552_v15   ;;  %v2440_v31 = vld [vmem:[%s7161_s4 + $0x18] sm:$0xff]  ;;  %v2437_v32 = vld [vmem:[%s7161_s4] sm:$0xff]  ;;  %v93_v33 = vld [vmem:[%s7158_s1 + $0x168] sm:$0xff] }
  0x55   :  { %1721 = vperm.xlu0 %4764, %v1551_v16   ;;  %v94_v34 = vld [vmem:[%s7158_s1 + $0x170] sm:$0xff]  ;;  %v2438_v35 = vld [vmem:[%s7161_s4 + $0x8] sm:$0xff]  ;;  %v95_v37 = vld [vmem:[%s7158_s1 + $0x178] sm:$0xff] }
  0x56   :  { %4432 = vmatmul.mubr.msk.f32.gmra.mxu0 %vm192_vm0, %v83_v13  ;;  %v2575_v36 = vld [vmem:[%s7163_s6 + $0xf0] sm:$0xff]  ;;  %v96_v38 = vld [vmem:[%s7158_s1 + $0x180] sm:$0xff]  ;;  %v2576_v39 = vld [vmem:[%s7163_s6 + $0xf8] sm:$0xff] }
  0x57   :  { %4434 = vmatprep.mubr.msk.f32.mxu0 %vm192_vm0, %v84_v14  ;;  %v2559_v40 = vld [vmem:[%s7163_s6 + $0x70] sm:$0xff]  ;;  %v97_v41 = vld [vmem:[%s7158_s1 + $0x188] sm:$0xff]  ;;  %v2560_v43 = vld [vmem:[%s7163_s6 + $0x78] sm:$0xff] }
  0x58   :  { %1716 = vperm.xlu1 %4765, %v1550_v19   ;;  %v98_v42 = vld [vmem:[%s7158_s1 + $0x190] sm:$0xff]  ;;  %v2573_v44 = vld [vmem:[%s7163_s6 + $0xe0] sm:$0xff]  ;;  %v99_v45 = vld [vmem:[%s7158_s1 + $0x198] sm:$0xff] }
  0x59   :  { %2477 = vperm.xlu0 %4764, %v2443_v20   ;;  %v100_v46 = vld [vmem:[%s7158_s1 + $0x1a0] sm:$0xff]  ;;  %v2574_v47 = vld [vmem:[%s7163_s6 + $0xe8] sm:$0xff]  ;;  %v102_v50 = vld [vmem:[%s7158_s1 + $0x1b0] sm:$0xff] }
  0x5a   :  { %4435 = vmatmul.mubr.msk.f32.gmra.mxu0 %vm192_vm0, %v85_v17  ;;  %v2557_v48 = vld [vmem:[%s7163_s6 + $0x60] sm:$0xff]  ;;  %v101_v49 = vld [vmem:[%s7158_s1 + $0x1a8] sm:$0xff]  ;;  %v2571_v52 = vld [vmem:[%s7163_s6 + $0xd0] sm:$0xff] }
  0x5b   :  { %4437 = vmatprep.mubr.msk.f32.mxu0 %vm192_vm0, %v86_v18  ;;  %v2558_v51 = vld [vmem:[%s7163_s6 + $0x68] sm:$0xff]  ;;  %v103_v53 = vld [vmem:[%s7158_s1 + $0x1b8] sm:$0xff]  ;;  %v104_v54 = vld [vmem:[%s7158_s1 + $0x1c0] sm:$0xff] }
  0x5c   :  { %2482 = vperm.xlu1 %4765, %v2444_v23   ;;  %v2572_v55 = vld [vmem:[%s7163_s6 + $0xd8] sm:$0xff]  ;;  %v2555_v56 = vld [vmem:[%s7163_s6 + $0x50] sm:$0xff]  ;;  %v105_v57 = vld [vmem:[%s7158_s1 + $0x1c8] sm:$0xff] }
  0x5d   :  { %2467 = vperm.xlu0 %4764, %v2441_v24   ;;  %v106_v58 = vld [vmem:[%s7158_s1 + $0x1d0] sm:$0xff]  ;;  %v2556_v59 = vld [vmem:[%s7163_s6 + $0x58] sm:$0xff]  ;;  %v2569_v60 = vld [vmem:[%s7163_s6 + $0xc0] sm:$0xff] }
  0x5e   :  { %4438 = vmatmul.mubr.msk.f32.gmra.mxu0 %vm192_vm0, %v87_v21  ;;  %v107_v61 = vld [vmem:[%s7158_s1 + $0x1d8] sm:$0xff]  ;;  %v108_v62 = vld [vmem:[%s7158_s1 + $0x1e0] sm:$0xff]  ;;  %v2570_v63 = vld [vmem:[%s7163_s6 + $0xc8] sm:$0xff] }
  0x5f   :  { %4440 = vmatprep.mubr.msk.f32.mxu0 %vm192_vm0, %v88_v22  ;;  %v2553_v0 = vld [vmem:[%s7163_s6 + $0x40] sm:$0xff]  ;;  %v109_v1 = vld [vmem:[%s7158_s1 + $0x1e8] sm:$0xff]  ;;  %v110_v2 = vld [vmem:[%s7158_s1 + $0x1f0] sm:$0xff] }
  0x60   :  { %2472 = vperm.xlu1 %4765, %v2442_v27   ;;  %v2554_v3 = vld [vmem:[%s7163_s6 + $0x48] sm:$0xff]  ;;  %v2567_v4 = vld [vmem:[%s7163_s6 + $0xb0] sm:$0xff]  ;;  %v111_v5 = vld [vmem:[%s7158_s1 + $0x1f8] sm:$0xff] }
  0x61   :  { %2457 = vperm.xlu0 %4764, %v2439_v28   ;;  %v112_v6 = vld [vmem:[%s7158_s1 + $0x200] sm:$0xff]  ;;  %v2568_v7 = vld [vmem:[%s7163_s6 + $0xb8] sm:$0xff]  ;;  %v2551_v8 = vld [vmem:[%s7163_s6 + $0x30] sm:$0xff] }
  0x62   :  { %4441 = vmatmul.mubr.msk.f32.gmra.mxu0 %vm192_vm0, %v89_v25  ;;  %v113_v9 = vld [vmem:[%s7158_s1 + $0x208] sm:$0xff]  ;;  %v114_v10 = vld [vmem:[%s7158_s1 + $0x210] sm:$0xff]  ;;  %v2552_v11 = vld [vmem:[%s7163_s6 + $0x38] sm:$0xff] }
  0x63   :  { %4443 = vmatprep.mubr.msk.f32.mxu0 %vm192_vm0, %v90_v26  ;;  %v2565_v12 = vld [vmem:[%s7163_s6 + $0xa0] sm:$0xff]  ;;  %v115_v13 = vld [vmem:[%s7158_s1 + $0x218] sm:$0xff]  ;;  %v2566_v15 = vld [vmem:[%s7163_s6 + $0xa8] sm:$0xff] }
  0x64   :  { %2462 = vperm.xlu1 %4765, %v2440_v31   ;;  %v116_v14 = vld [vmem:[%s7158_s1 + $0x220] sm:$0xff]  ;;  %v117_v17 = vld [vmem:[%s7158_s1 + $0x228] sm:$0xff]  ;;  %v118_v18 = vld [vmem:[%s7158_s1 + $0x230] sm:$0xff] }
  0x65   :  { %2447 = vperm.xlu0 %4764, %v2437_v32   ;;  %v2549_v16 = vld [vmem:[%s7163_s6 + $0x20] sm:$0xff]  ;;  %v2550_v19 = vld [vmem:[%s7163_s6 + $0x28] sm:$0xff]  ;;  %v2563_v20 = vld [vmem:[%s7163_s6 + $0x90] sm:$0xff] }
  0x66   :  { %4444 = vmatmul.mubr.msk.f32.gmra.mxu0 %vm192_vm0, %v91_v29  ;;  %v119_v21 = vld [vmem:[%s7158_s1 + $0x238] sm:$0xff]  ;;  %v120_v22 = vld [vmem:[%s7158_s1 + $0x240] sm:$0xff]  ;;  %v2547_v24 = vld [vmem:[%s7163_s6 + $0x10] sm:$0xff] }
  0x67   :  { %4446 = vmatprep.mubr.msk.f32.mxu0 %vm192_vm0, %v92_v30  ;;  %v2564_v23 = vld [vmem:[%s7163_s6 + $0x98] sm:$0xff]  ;;  %v121_v25 = vld [vmem:[%s7158_s1 + $0x248] sm:$0xff]  ;;  %v122_v26 = vld [vmem:[%s7158_s1 + $0x250] sm:$0xff] }
  0x68   :  { %2452 = vperm.xlu1 %4765, %v2438_v35   ;;  %v2548_v27 = vld [vmem:[%s7163_s6 + $0x18] sm:$0xff]  ;;  %v2561_v28 = vld [vmem:[%s7163_s6 + $0x80] sm:$0xff]  ;;  %v2562_v31 = vld [vmem:[%s7163_s6 + $0x88] sm:$0xff] }
  0x69   :  { %2745 = vperm.xlu0 %4764, %v2575_v36   ;;  %v123_v29 = vld [vmem:[%s7158_s1 + $0x258] sm:$0xff]  ;;  %v124_v30 = vld [vmem:[%s7158_s1 + $0x260] sm:$0xff]  ;;  %v2546_v35 = vld [vmem:[%s7163_s6 + $0x8] sm:$0xff] }
  0x6a   :  { %4447 = vmatmul.mubr.msk.f32.gmra.mxu0 %vm192_vm0, %v93_v33  ;;  %v2545_v32 = vld [vmem:[%s7163_s6] sm:$0xff]  ;;  %v125_v33 = vld [vmem:[%s7158_s1 + $0x268] sm:$0xff]  ;;  %v2591_v36 = vld [vmem:[%s7163_s6 + $0x170] sm:$0xff] }
  0x6b   :  { %4449 = vmatprep.mubr.msk.f32.mxu0 %vm192_vm0, %v94_v34  ;;  %v126_v34 = vld [vmem:[%s7158_s1 + $0x270] sm:$0xff] }
  0x6c   :  { %2750 = vperm.xlu1 %4765, %v2576_v39   ;;  %v2592_v39 = vld [vmem:[%s7163_s6 + $0x178] sm:$0xff] }
  0x6d   :  { %2665 = vperm.xlu0 %4764, %v2559_v40   ;;  %v2589_v40 = vld [vmem:[%s7163_s6 + $0x160] sm:$0xff] }
  0x6e   :  { %4450 = vmatmul.mubr.msk.f32.gmra.mxu0 %vm192_vm0, %v95_v37  ;;  %v127_v37 = vld [vmem:[%s7158_s1 + $0x278] sm:$0xff] }
  0x6f   :  { %4452 = vmatprep.mubr.msk.f32.mxu0 %vm192_vm0, %v96_v38  ;;  %v128_v38 = vld [vmem:[%s7158_s1 + $0x280] sm:$0xff] }
  0x70   :  { %2670 = vperm.xlu1 %4765, %v2560_v43   ;;  %v2590_v43 = vld [vmem:[%s7163_s6 + $0x168] sm:$0xff] }
  0x71   :  { %2735 = vperm.xlu0 %4764, %v2573_v44   ;;  %v2587_v44 = vld [vmem:[%s7163_s6 + $0x150] sm:$0xff] }
  0x72   :  { %4453 = vmatmul.mubr.msk.f32.gmra.mxu0 %vm192_vm0, %v97_v41  ;;  %v129_v41 = vld [vmem:[%s7158_s1 + $0x288] sm:$0xff] }
  0x73   :  { %4455 = vmatprep.mubr.msk.f32.mxu0 %vm192_vm0, %v98_v42  ;;  %v130_v42 = vld [vmem:[%s7158_s1 + $0x290] sm:$0xff] }
  0x74   :  { %2740 = vperm.xlu1 %4765, %v2574_v47   ;;  %v2588_v47 = vld [vmem:[%s7163_s6 + $0x158] sm:$0xff] }
  0x75   :  { %2655 = vperm.xlu0 %4764, %v2557_v48   ;;  %v2585_v48 = vld [vmem:[%s7163_s6 + $0x140] sm:$0xff] }
  0x76   :  { %4456 = vmatmul.mubr.msk.f32.gmra.mxu0 %vm192_vm0, %v99_v45  ;;  %v131_v45 = vld [vmem:[%s7158_s1 + $0x298] sm:$0xff] }
  0x77   :  { %4458 = vmatprep.mubr.msk.f32.mxu0 %vm192_vm0, %v100_v46  ;;  %v132_v46 = vld [vmem:[%s7158_s1 + $0x2a0] sm:$0xff] }
  0x78   :  { %2660 = vperm.xlu1 %4765, %v2558_v51   ;;  %v2586_v51 = vld [vmem:[%s7163_s6 + $0x148] sm:$0xff] }
  0x79   :  { %2725 = vperm.xlu0 %4764, %v2571_v52   ;;  %v2583_v52 = vld [vmem:[%s7163_s6 + $0x130] sm:$0xff] }
  0x7a   :  { %4459 = vmatmul.mubr.msk.f32.gmra.mxu0 %vm192_vm0, %v101_v49  ;;  %v133_v49 = vld [vmem:[%s7158_s1 + $0x2a8] sm:$0xff] }
  0x7b   :  { %4461 = vmatprep.mubr.msk.f32.mxu0 %vm192_vm0, %v102_v50  ;;  %v134_v50 = vld [vmem:[%s7158_s1 + $0x2b0] sm:$0xff] }
  0x7c   :  { %2730 = vperm.xlu1 %4765, %v2572_v55   ;;  %v2584_v55 = vld [vmem:[%s7163_s6 + $0x138] sm:$0xff] }
  0x7d   :  { %2645 = vperm.xlu0 %4764, %v2555_v56   ;;  %v2581_v56 = vld [vmem:[%s7163_s6 + $0x120] sm:$0xff] }
  0x7e   :  { %4462 = vmatmul.mubr.msk.f32.gmra.mxu0 %vm192_vm0, %v103_v53  ;;  %v135_v53 = vld [vmem:[%s7158_s1 + $0x2b8] sm:$0xff] }
  0x7f   :  { %4464 = vmatprep.mubr.msk.f32.mxu0 %vm192_vm0, %v104_v54  ;;  %v136_v54 = vld [vmem:[%s7158_s1 + $0x2c0] sm:$0xff] }
  0x80   :  { %2650 = vperm.xlu1 %4765, %v2556_v59   ;;  %v2582_v59 = vld [vmem:[%s7163_s6 + $0x128] sm:$0xff] }
  0x81   :  { %2715 = vperm.xlu0 %4764, %v2569_v60   ;;  %v2579_v60 = vld [vmem:[%s7163_s6 + $0x110] sm:$0xff] }
  0x82   :  { %4465 = vmatmul.mubr.msk.f32.gmra.mxu0 %vm192_vm0, %v105_v57  ;;  %v137_v57 = vld [vmem:[%s7158_s1 + $0x2c8] sm:$0xff] }
  0x83   :  { %4467 = vmatprep.mubr.msk.f32.mxu0 %vm192_vm0, %v106_v58  ;;  %v138_v58 = vld [vmem:[%s7158_s1 + $0x2d0] sm:$0xff] }
  0x84   :  { %2720 = vperm.xlu1 %4765, %v2570_v63   ;;  %v2580_v63 = vld [vmem:[%s7163_s6 + $0x118] sm:$0xff] }
  0x85   :  { %2635 = vperm.xlu0 %4764, %v2553_v0   ;;  %v2577_v0 = vld [vmem:[%s7163_s6 + $0x100] sm:$0xff] }
  0x86   :  { %4468 = vmatmul.mubr.msk.f32.gmra.mxu0 %vm192_vm0, %v107_v61  ;;  %v139_v61 = vld [vmem:[%s7158_s1 + $0x2d8] sm:$0xff] }
  0x87   :  { %4470 = vmatprep.mubr.msk.f32.mxu0 %vm192_vm0, %v108_v62  ;;  %v140_v62 = vld [vmem:[%s7158_s1 + $0x2e0] sm:$0xff] }
  0x88   :  { %2640 = vperm.xlu1 %4765, %v2554_v3   ;;  %v2578_v3 = vld [vmem:[%s7163_s6 + $0x108] sm:$0xff] }
  0x89   :  { %2705 = vperm.xlu0 %4764, %v2567_v4   ;;  %v3320_v4 = vld [vmem:[%s7165_s8 + $0x70] sm:$0xff] }
  0x8a   :  { %4471 = vmatmul.mubr.msk.f32.gmra.mxu0 %vm192_vm0, %v109_v1  ;;  %v141_v1 = vld [vmem:[%s7158_s1 + $0x2e8] sm:$0xff] }
  0x8b   :  { %4473 = vmatprep.mubr.msk.f32.mxu0 %vm192_vm0, %v110_v2  ;;  %v142_v2 = vld [vmem:[%s7158_s1 + $0x2f0] sm:$0xff] }
  0x8c   :  { %2710 = vperm.xlu1 %4765, %v2568_v7   ;;  %v3321_v7 = vld [vmem:[%s7165_s8 + $0x78] sm:$0xff] }
  0x8d   :  { %2625 = vperm.xlu0 %4764, %v2551_v8   ;;  %v3318_v8 = vld [vmem:[%s7165_s8 + $0x60] sm:$0xff] }
  0x8e   :  { %4474 = vmatmul.mubr.msk.f32.gmra.mxu0 %vm192_vm0, %v111_v5  ;;  %v143_v5 = vld [vmem:[%s7158_s1 + $0x2f8] sm:$0xff] }
  0x8f   :  { %4476 = vmatprep.mubr.msk.f32.mxu0 %vm192_vm0, %v112_v6  ;;  %v144_v6 = vld [vmem:[%s7158_s1 + $0x300] sm:$0xff] }
  0x90   :  { %2630 = vperm.xlu1 %4765, %v2552_v11   ;;  %v146_v11 = vld [vmem:[%s7158_s1 + $0x310] sm:$0xff] }
  0x91   :  { %2695 = vperm.xlu0 %4764, %v2565_v12   ;;  %v3319_v12 = vld [vmem:[%s7165_s8 + $0x68] sm:$0xff] }
  0x92   :  { %4477 = vmatmul.mubr.msk.f32.gmra.mxu0 %vm192_vm0, %v113_v9  ;;  %v145_v9 = vld [vmem:[%s7158_s1 + $0x308] sm:$0xff] }
  0x93   :  { %4479 = vmatprep.mubr.msk.f32.mxu0 %vm192_vm0, %v114_v10  ;;  %v5612_v10 = vpop.permute.xlu0 %1631 }
  0x94   :  { %2700 = vperm.xlu1 %4765, %v2566_v15   ;;  %v147_v15 = vld [vmem:[%s7158_s1 + $0x318] sm:$0xff] }
  0x95   :  { %2615 = vperm.xlu0 %4764, %v2549_v16   ;;  %v5630_v16 = vpop.permute.xlu1 %1621 }
  0x96   :  { %4480 = vmatmul.mubr.msk.f32.gmra.mxu0 %vm192_vm0, %v115_v13 }
  0x97   :  { %4482 = vmatprep.mubr.msk.f32.mxu0 %vm192_vm0, %v116_v14  ;;  %v3316_v14 = vld [vmem:[%s7165_s8 + $0x50] sm:$0xff] }
  0x98   :  { %2620 = vperm.xlu1 %4765, %v2550_v19   ;;  %v3317_v19 = vld [vmem:[%s7165_s8 + $0x58] sm:$0xff] }
  0x99   :  { %2685 = vperm.xlu0 %4764, %v2563_v20   ;;  %v5640_v20 = vpop.permute.xlu0 %1626 }
  0x9a   :  { %4483 = vmatmul.mubr.msk.f32.gmra.mxu0 %vm192_vm0, %v117_v17 }
  0x9b   :  { %4485 = vmatprep.mubr.msk.f32.mxu0 %vm192_vm0, %v118_v18  ;;  %v148_v18 = vld [vmem:[%s7158_s1 + $0x320] sm:$0xff] }
  0x9c   :  { %2690 = vperm.xlu1 %4765, %v2564_v23   ;;  %v149_v23 = vld [vmem:[%s7158_s1 + $0x328] sm:$0xff] }
  0x9d   :  { %2605 = vperm.xlu0 %4764, %v2547_v24  }
  0x9e   :  { %4486 = vmatmul.mubr.msk.f32.gmra.mxu0 %vm192_vm0, %v119_v21 }
  0x9f   :  { %4488 = vmatprep.mubr.msk.f32.mxu0 %vm192_vm0, %v120_v22  ;;  %v3314_v22 = vld [vmem:[%s7165_s8 + $0x40] sm:$0xff] }
  0xa0   :  { %2610 = vperm.xlu1 %4765, %v2548_v27   ;;  %v5660_v27 = vpop.permute.xlu1 %1616 }
  0xa1   :  { %2675 = vperm.xlu0 %4764, %v2561_v28  }
  0xa2   :  { %4489 = vmatmul.mubr.msk.f32.gmra.mxu0 %vm192_vm0, %v121_v25  ;;  %v150_v25 = vld [vmem:[%s7158_s1 + $0x330] sm:$0xff] }
  0xa3   :  { %4491 = vmatprep.mubr.msk.f32.mxu0 %vm192_vm0, %v122_v26  ;;  %v3315_v26 = vld [vmem:[%s7165_s8 + $0x48] sm:$0xff] }
  0xa4   :  { %2680 = vperm.xlu1 %4765, %v2562_v31   ;;  %v5672_v31 = vpop.permute.xlu0 %1611 }
  0xa5   :  { %2595 = vperm.xlu0 %4764, %v2545_v32  }
  0xa6   :  { %4492 = vmatmul.mubr.msk.f32.gmra.mxu0 %vm192_vm0, %v123_v29  ;;  %v3312_v29 = vld [vmem:[%s7165_s8 + $0x30] sm:$0xff] }
  0xa7   :  { %4494 = vmatprep.mubr.msk.f32.mxu0 %vm192_vm0, %v124_v30  ;;  %v151_v30 = vld [vmem:[%s7158_s1 + $0x338] sm:$0xff] }
  0xa8   :  { %2600 = vperm.xlu1 %4765, %v2546_v35  }
  0xa9   :  { %2825 = vperm.xlu0 %4764, %v2591_v36   ;;  %v3310_v36 = vld [vmem:[%s7165_s8 + $0x20] sm:$0xff] }
  0xaa   :  { %4495 = vmatmul.mubr.msk.f32.gmra.mxu0 %vm192_vm0, %v125_v33  ;;  %v152_v33 = vld [vmem:[%s7158_s1 + $0x340] sm:$0xff] }
  0xab   :  { %4497 = vmatprep.mubr.msk.f32.mxu0 %vm192_vm0, %v126_v34  ;;  %v3313_v34 = vld [vmem:[%s7165_s8 + $0x38] sm:$0xff] }
  0xac   :  { %2830 = vperm.xlu1 %4765, %v2592_v39  }
  0xad   :  { %2815 = vperm.xlu0 %4764, %v2589_v40   ;;  %v154_v40 = vld [vmem:[%s7158_s1 + $0x350] sm:$0xff] }
  0xae   :  { %4498 = vmatmul.mubr.msk.f32.gmra.mxu0 %vm192_vm0, %v127_v37  ;;  %v153_v37 = vld [vmem:[%s7158_s1 + $0x348] sm:$0xff] }
  0xaf   :  { %4500 = vmatprep.mubr.msk.f32.mxu0 %vm192_vm0, %v128_v38  ;;  %v5692_v38 = vpop.permute.xlu1 %1606 }
  0xb0   :  { %2820 = vperm.xlu1 %4765, %v2590_v43  }
  0xb1   :  { %2805 = vperm.xlu0 %4764, %v2587_v44   ;;  %v3308_v44 = vld [vmem:[%s7165_s8 + $0x10] sm:$0xff] }
  0xb2   :  { %4501 = vmatmul.mubr.msk.f32.gmra.mxu0 %vm192_vm0, %v129_v41  ;;  %v3311_v41 = vld [vmem:[%s7165_s8 + $0x28] sm:$0xff] }
  0xb3   :  { %4503 = vmatprep.mubr.msk.f32.mxu0 %vm192_vm0, %v130_v42  ;;  %v5702_v42 = vpop.permute.xlu0 %1601 }
  0xb4   :  { %2810 = vperm.xlu1 %4765, %v2588_v47   ;;  %v156_v47 = vld [vmem:[%s7158_s1 + $0x360] sm:$0xff] }
  0xb5   :  { %2795 = vperm.xlu0 %4764, %v2585_v48   ;;  %v3309_v48 = vld [vmem:[%s7165_s8 + $0x18] sm:$0xff] }
  0xb6   :  { %4504 = vmatmul.mubr.msk.f32.gmra.mxu0 %vm192_vm0, %v131_v45  ;;  %v155_v45 = vld [vmem:[%s7158_s1 + $0x358] sm:$0xff] }
  0xb7   :  { %4506 = vmatprep.mubr.msk.f32.mxu0 %vm192_vm0, %v132_v46 }
  0xb8   :  { %2800 = vperm.xlu1 %4765, %v2586_v51   ;;  %v3306_v51 = vld [vmem:[%s7165_s8] sm:$0xff] }
  0xb9   :  { %2785 = vperm.xlu0 %4764, %v2583_v52   ;;  %v157_v52 = vld [vmem:[%s7158_s1 + $0x368] sm:$0xff] }
  0xba   :  { %4507 = vmatmul.mubr.msk.f32.gmra.mxu0 %vm192_vm0, %v133_v49  ;;  %v5722_v49 = vpop.permute.xlu1 %1596 }
  0xbb   :  { %4509 = vmatprep.mubr.msk.f32.mxu0 %vm192_vm0, %v134_v50  ;;  %7180 = vst [vmem:[#allocation10_spill] sm:$0xff] %v5722_v49 }
  0xbc   :  { %2790 = vperm.xlu1 %4765, %v2584_v55   ;;  %v158_v55 = vld [vmem:[%s7158_s1 + $0x370] sm:$0xff] }
  0xbd   :  { %2775 = vperm.xlu0 %4764, %v2581_v56   ;;  %v3307_v56 = vld [vmem:[%s7165_s8 + $0x8] sm:$0xff] }
  0xbe   :  { %4510 = vmatmul.mubr.msk.f32.gmra.mxu0 %vm192_vm0, %v135_v53  ;;  %v5734_v53 = vpop.permute.xlu0 %1591 }
  0xbf   :  { %4512 = vmatprep.mubr.msk.f32.mxu0 %vm192_vm0, %v136_v54  ;;  %7181 = vst [vmem:[#allocation11_spill] sm:$0xff] %v5734_v53 }
  0xc0   :  { %2780 = vperm.xlu1 %4765, %v2582_v59   ;;  %v159_v59 = vld [vmem:[%s7158_s1 + $0x378] sm:$0xff] }
  0xc1   :  { %2765 = vperm.xlu0 %4764, %v2579_v60   ;;  %v5754_v60 = vpop.permute.xlu1 %1586 }
  0xc2   :  { %4513 = vmatmul.mubr.msk.f32.gmra.mxu0 %vm192_vm0, %v137_v57  ;;  %7182 = vst [vmem:[#allocation12_spill] sm:$0xff] %v5754_v60 }
  0xc3   :  { %4515 = vmatprep.mubr.msk.f32.mxu0 %vm192_vm0, %v138_v58  ;;  %v3733_v58 = vld [vmem:[%s7167_s10] sm:$0xff] }
  0xc4   :  { %2770 = vperm.xlu1 %4765, %v2580_v63   ;;  %v5761_v63 = vpop.permute.xlu0 %1581 }
  0xc5   :  { %2755 = vperm.xlu0 %4764, %v2577_v0   ;;  %7183 = vst [vmem:[#allocation13_spill] sm:$0xff] %v5761_v63 }
  0xc6   :  { %4516 = vmatmul.mubr.msk.f32.gmra.mxu0 %vm192_vm0, %v139_v61 }
  0xc7   :  { %4518 = vmatprep.mubr.msk.f32.mxu0 %vm192_vm0, %v140_v62  ;;  %v160_v62 = vld [vmem:[%s7158_s1 + $0x380] sm:$0xff] }
  0xc8   :  { %2760 = vperm.xlu1 %4765, %v2578_v3   ;;  %v162_v3 = vld [vmem:[%s7158_s1 + $0x390] sm:$0xff] }
  0xc9   :  { %3394 = vperm.xlu0 %4764, %v3320_v4  }
  0xca   :  { %4519 = vmatmul.mubr.msk.f32.gmra.mxu0 %vm192_vm0, %v141_v1  ;;  %v161_v1 = vld [vmem:[%s7158_s1 + $0x388] sm:$0xff] }
  0xcb   :  { %4521 = vmatprep.mubr.msk.f32.mxu0 %vm192_vm0, %v142_v2 }
  0xcc   :  { %3399 = vperm.xlu1 %4765, %v3321_v7   ;;  %v164_v7 = vld [vmem:[%s7158_s1 + $0x3a0] sm:$0xff] }
  0xcd   :  { %3384 = vperm.xlu0 %4764, %v3318_v8  }
  0xce   :  { %4522 = vmatmul.mubr.msk.f32.gmra.mxu0 %vm192_vm0, %v143_v5  ;;  %v163_v5 = vld [vmem:[%s7158_s1 + $0x398] sm:$0xff] }
  0xcf   :  { %4524 = vmatprep.mubr.msk.f32.mxu0 %vm192_vm0, %v144_v6 }
  0xd0   :  { %3389 = vperm.xlu1 %4765, %v3319_v12   ;;  %v166_v12 = vld [vmem:[%s7158_s1 + $0x3b0] sm:$0xff] }
  0xd1   :  { %3374 = vperm.xlu0 %4764, %v3316_v14  }
  0xd2   :  { %v5620_v13 = vpop.f32.mrf.mxu0  ;;  %4525 = vmatmul.mubr.msk.f32.gmra.mxu0 %vm192_vm0, %v145_v9  ;;  %v165_v9 = vld [vmem:[%s7158_s1 + $0x3a8] sm:$0xff] }
  0xd3   :  { %7175 = vst [vmem:[#allocation5_spill] sm:$0xff] %v5620_v13  ;;  %4527 = vmatprep.mubr.msk.f32.mxu0 %vm192_vm0, %v146_v11 }
  0xd4   :  { %v5632_v17 = vpop.f32.mrf.mxu0  ;;  %3379 = vperm.xlu1 %4765, %v3317_v19   ;;  %v168_v19 = vld [vmem:[%s7158_s1 + $0x3c0] sm:$0xff] }
  0xd5   :  { %7176 = vst [vmem:[#allocation6_spill] sm:$0xff] %v5632_v17  ;;  %3364 = vperm.xlu0 %4764, %v3314_v22   ;;  %v1771_v17 = vld [vmem:[%s7160_s3 + $0x8] sm:$0xff] }
  0xd6   :  { %v5642_v21 = vpop.f32.mrf.mxu0  ;;  %4528 = vmatmul.mubr.msk.f32.gmra.mxu0 %vm192_vm0, %v147_v15  ;;  %v167_v15 = vld [vmem:[%s7158_s1 + $0x3b8] sm:$0xff]  ;;  %2027 = vmatprep.mubr.f32.mxu1 %v1771_v17 }
  0xd7   :  { %7177 = vst [vmem:[#allocation7_spill] sm:$0xff] %v5642_v21  ;;  %4530 = vmatprep.mubr.msk.f32.mxu0 %vm192_vm0, %v148_v18 }
  0xd8   :  { %v5652_v24 = vpop.f32.mrf.mxu0  ;;  %3369 = vperm.xlu1 %4765, %v3315_v26   ;;  %v170_v26 = vld [vmem:[%s7158_s1 + $0x3d0] sm:$0xff] }
  0xd9   :  { %7178 = vst [vmem:[#allocation8_spill] sm:$0xff] %v5652_v24  ;;  %3354 = vperm.xlu0 %4764, %v3312_v29  }
  0xda   :  { %v5662_v28 = vpop.f32.mrf.mxu0  ;;  %4531 = vmatmul.mubr.msk.f32.gmra.mxu0 %vm192_vm0, %v149_v23  ;;  %v169_v23 = vld [vmem:[%s7158_s1 + $0x3c8] sm:$0xff] }
  0xdb   :  { %4533 = vmatprep.mubr.msk.f32.mxu0 %vm192_vm0, %v150_v25 }
  0xdc   :  { %v5674_v32 = vpop.f32.mrf.mxu0  ;;  %3359 = vperm.xlu1 %4765, %v3313_v34   ;;  %v172_v34 = vld [vmem:[%s7158_s1 + $0x3e0] sm:$0xff] }
  0xdd   :  { %7179 = vst [vmem:[#allocation9_spill] sm:$0xff] %v5674_v32  ;;  %3344 = vperm.xlu0 %4764, %v3310_v36  }
  0xde   :  { %v5682_v35 = vpop.f32.mrf.mxu0  ;;  %4534 = vmatmul.mubr.msk.f32.gmra.mxu0 %vm192_vm0, %v151_v30  ;;  %v171_v30 = vld [vmem:[%s7158_s1 + $0x3d8] sm:$0xff] }
  0xdf   :  { %4536 = vmatprep.mubr.msk.f32.mxu0 %vm192_vm0, %v152_v33 }
  0xe0   :  { %v5694_v39 = vpop.f32.mrf.mxu0  ;;  %3349 = vperm.xlu1 %4765, %v3311_v41   ;;  %v174_v41 = vld [vmem:[%s7158_s1 + $0x3f0] sm:$0xff] }
  0xe1   :  { %3334 = vperm.xlu0 %4764, %v3308_v44  }
  0xe2   :  { %v5704_v43 = vpop.f32.mrf.mxu0  ;;  %4537 = vmatmul.mubr.msk.f32.gmra.mxu0 %vm192_vm0, %v153_v37  ;;  %v173_v37 = vld [vmem:[%s7158_s1 + $0x3e8] sm:$0xff] }
  0xe3   :  { %4539 = vmatprep.mubr.msk.f32.mxu0 %vm192_vm0, %v154_v40 }
  0xe4   :  { %v5714_v46 = vpop.f32.mrf.mxu0  ;;  %3339 = vperm.xlu1 %4765, %v3309_v48   ;;  %v176_v48 = vld [vmem:[%s7158_s1 + $0x400] sm:$0xff] }
  0xe5   :  { %3324 = vperm.xlu0 %4764, %v3306_v51  }
  0xe6   :  { %v5724_v50 = vpop.f32.mrf.mxu0  ;;  %4540 = vmatmul.mubr.msk.f32.gmra.mxu0 %vm192_vm0, %v155_v45  ;;  %v175_v45 = vld [vmem:[%s7158_s1 + $0x3f8] sm:$0xff] }
  0xe7   :  { %4542 = vmatprep.mubr.msk.f32.mxu0 %vm192_vm0, %v156_v47 }
  0xe8   :  { %v5736_v54 = vpop.f32.mrf.mxu0  ;;  %3329 = vperm.xlu1 %4765, %v3307_v56   ;;  %v178_v56 = vld [vmem:[%s7158_s1 + $0x410] sm:$0xff] }
  0xe9   :  { %3736 = vperm.xlu0 %4764, %v3733_v58  }
  0xea   :  { %v5744_v57 = vpop.f32.mrf.mxu0  ;;  %4543 = vmatmul.mubr.msk.f32.gmra.mxu0 %vm192_vm0, %v157_v52  ;;  %v177_v52 = vld [vmem:[%s7158_s1 + $0x408] sm:$0xff] }
  0xeb   :  { %4545 = vmatprep.mubr.msk.f32.mxu0 %vm192_vm0, %v158_v55 }
  0xec   :  { %v5756_v61 = vpop.f32.mrf.mxu0 }
  0xee   :  { %v5763_v0 = vpop.f32.mrf.mxu0  ;;  %4546 = vmatmul.mubr.msk.f32.gmra.mxu0 %vm192_vm0, %v159_v59  ;;  %v179_v59 = vld [vmem:[%s7158_s1 + $0x418] sm:$0xff] }
  0xef   :  { %4548 = vmatprep.mubr.msk.f32.mxu0 %vm192_vm0, %v160_v62 }
  0xf0   :  { %v5770_v2 = vpop.f32.mrf.mxu0 }
  0xf2   :  { %v5775_v4 = vpop.f32.mrf.mxu0  ;;  %4549 = vmatmul.mubr.msk.f32.gmra.mxu0 %vm192_vm0, %v161_v1  ;;  %v180_v1 = vld [vmem:[%s7158_s1 + $0x420] sm:$0xff] }
  0xf3   :  { %7184 = vst [vmem:[#allocation14_spill] sm:$0xff] %v5775_v4  ;;  %4551 = vmatprep.mubr.msk.f32.mxu0 %vm192_vm0, %v162_v3 }
  0xf4   :  { %v5782_v6 = vpop.f32.mrf.mxu0 }
  0xf5   :  { %7185 = vst [vmem:[#allocation15_spill] sm:$0xff] %v5782_v6 }
  0xf6   :  { %v5787_v8 = vpop.f32.mrf.mxu0  ;;  %4552 = vmatmul.mubr.msk.f32.gmra.mxu0 %vm192_vm0, %v163_v5  ;;  %v181_v5 = vld [vmem:[%s7158_s1 + $0x428] sm:$0xff] }
  0xf7   :  { %7186 = vst [vmem:[#allocation16_spill] sm:$0xff] %v5787_v8  ;;  %4554 = vmatprep.mubr.msk.f32.mxu0 %vm192_vm0, %v164_v7 }
  0xf8   :  { %v5794_v11 = vpop.f32.mrf.mxu0 }
  0xf9   :  { %7187 = vst [vmem:[#allocation17_spill] sm:$0xff] %v5794_v11 }
  0xfa   :  { %v5799_v14 = vpop.f32.mrf.mxu0  ;;  %4555 = vmatmul.mubr.msk.f32.gmra.mxu0 %vm192_vm0, %v165_v9  ;;  %v182_v9 = vld [vmem:[%s7158_s1 + $0x430] sm:$0xff] }
  0xfb   :  { %7188 = vst [vmem:[#allocation18_spill] sm:$0xff] %v5799_v14  ;;  %4557 = vmatprep.mubr.msk.f32.mxu0 %vm192_vm0, %v166_v12  ;;  %v7169_v14 = vmov 0.0  }
  0xfc   :  { %v5806_v18 = vpop.f32.mrf.mxu0  ;;  %1963 = vmatprep.subr.mxu1 %v7169_v14 }
  0xfd   :  { %7189 = vst [vmem:[#allocation19_spill] sm:$0xff] %v5806_v18 }
  0xfe   :  { %v5811_v22 = vpop.f32.mrf.mxu0  ;;  %4558 = vmatmul.mubr.msk.f32.gmra.mxu0 %vm192_vm0, %v167_v15  ;;  %v183_v15 = vld [vmem:[%s7158_s1 + $0x438] sm:$0xff] }
  0xff   :  { %7190 = vst [vmem:[#allocation20_spill] sm:$0xff] %v5811_v22  ;;  %4560 = vmatprep.mubr.msk.f32.mxu0 %vm192_vm0, %v168_v19 }
 0x100   :  { %v5818_v25 = vpop.f32.mrf.mxu0 }
 0x101   :  { %7191 = vst [vmem:[#allocation21_spill] sm:$0xff] %v5818_v25 }
 0x102   :  { %v5823_v29 = vpop.f32.mrf.mxu0  ;;  %4561 = vmatmul.mubr.msk.f32.gmra.mxu0 %vm192_vm0, %v169_v23  ;;  %v184_v23 = vld [vmem:[%s7158_s1 + $0x440] sm:$0xff] }
 0x103   :  { %7192 = vst [vmem:[#allocation22_spill] sm:$0xff] %v5823_v29  ;;  %4563 = vmatprep.mubr.msk.f32.mxu0 %vm192_vm0, %v170_v26 }
 0x104   :  { %v5830_v33 = vpop.f32.mrf.mxu0 }
 0x105   :  { %7193 = vst [vmem:[#allocation23_spill] sm:$0xff] %v5830_v33 }
 0x106   :  { %v5835_v36 = vpop.f32.mrf.mxu0  ;;  %4564 = vmatmul.mubr.msk.f32.gmra.mxu0 %vm192_vm0, %v171_v30  ;;  %v185_v30 = vld [vmem:[%s7158_s1 + $0x448] sm:$0xff] }
 0x107   :  { %7194 = vst [vmem:[#allocation24_spill] sm:$0xff] %v5835_v36  ;;  %4566 = vmatprep.mubr.msk.f32.mxu0 %vm192_vm0, %v172_v34 }
 0x108   :  { %v5842_v40 = vpop.f32.mrf.mxu0 }
 0x109   :  { %7195 = vst [vmem:[#allocation25_spill] sm:$0xff] %v5842_v40 }
 0x10a   :  { %v5847_v44 = vpop.f32.mrf.mxu0  ;;  %4567 = vmatmul.mubr.msk.f32.gmra.mxu0 %vm192_vm0, %v173_v37  ;;  %v186_v37 = vld [vmem:[%s7158_s1 + $0x450] sm:$0xff] }
 0x10b   :  { %7196 = vst [vmem:[#allocation26_spill] sm:$0xff] %v5847_v44  ;;  %4569 = vmatprep.mubr.msk.f32.mxu0 %vm192_vm0, %v174_v41 }
 0x10c   :  { %v5854_v47 = vpop.f32.mrf.mxu0 }
 0x10d   :  { %7197 = vst [vmem:[#allocation27_spill] sm:$0xff] %v5854_v47 }
 0x10e   :  { %v5859_v51 = vpop.f32.mrf.mxu0  ;;  %4570 = vmatmul.mubr.msk.f32.gmra.mxu0 %vm192_vm0, %v175_v45  ;;  %v187_v45 = vld [vmem:[%s7158_s1 + $0x458] sm:$0xff] }
 0x10f   :  { %7198 = vst [vmem:[#allocation28_spill] sm:$0xff] %v5859_v51  ;;  %4572 = vmatprep.mubr.msk.f32.mxu0 %vm192_vm0, %v176_v48 }
 0x110   :  { %v5866_v55 = vpop.f32.mrf.mxu0 }
 0x111   :  { %7199 = vst [vmem:[#allocation29_spill] sm:$0xff] %v5866_v55 }
 0x112   :  { %v5871_v58 = vpop.f32.mrf.mxu0  ;;  %4573 = vmatmul.mubr.msk.f32.gmra.mxu0 %vm192_vm0, %v177_v52  ;;  %v188_v52 = vld [vmem:[%s7158_s1 + $0x460] sm:$0xff] }
 0x113   :  { %7200 = vst [vmem:[#allocation30_spill] sm:$0xff] %v5871_v58  ;;  %4575 = vmatprep.mubr.msk.f32.mxu0 %vm192_vm0, %v178_v56 }
 0x114   :  { %v5878_v62 = vpop.f32.mrf.mxu0 }
 0x115   :  { %7201 = vst [vmem:[#allocation31_spill] sm:$0xff] %v5878_v62 }
 0x116   :  { %v5883_v3 = vpop.f32.mrf.mxu0  ;;  %4576 = vmatmul.mubr.msk.f32.gmra.mxu0 %vm192_vm0, %v179_v59  ;;  %v189_v59 = vld [vmem:[%s7158_s1 + $0x468] sm:$0xff] }
 0x117   :  { %7202 = vst [vmem:[#allocation32_spill] sm:$0xff] %v5883_v3  ;;  %4578 = vmatprep.mubr.msk.f32.mxu0 %vm192_vm0, %v180_v1 }
 0x118   :  { %v5890_v7 = vpop.f32.mrf.mxu0 }
 0x119   :  { %7203 = vst [vmem:[#allocation33_spill] sm:$0xff] %v5890_v7 }
 0x11a   :  { %v5895_v12 = vpop.f32.mrf.mxu0  ;;  %4579 = vmatmul.mubr.msk.f32.gmra.mxu0 %vm192_vm0, %v181_v5  ;;  %v190_v5 = vld [vmem:[%s7158_s1 + $0x470] sm:$0xff] }
 0x11b   :  { %7204 = vst [vmem:[#allocation34_spill] sm:$0xff] %v5895_v12  ;;  %4581 = vmatprep.mubr.msk.f32.mxu0 %vm192_vm0, %v182_v9 }
 0x11c   :  { %v5902_v19 = vpop.f32.mrf.mxu0 }
 0x11d   :  { %7205 = vst [vmem:[#allocation35_spill] sm:$0xff] %v5902_v19 }
 0x11e   :  { %v5907_v26 = vpop.f32.mrf.mxu0  ;;  %4582 = vmatmul.mubr.msk.f32.gmra.mxu0 %vm192_vm0, %v183_v15  ;;  %v191_v15 = vld [vmem:[%s7158_s1 + $0x478] sm:$0xff] }
 0x11f   :  { %7206 = vst [vmem:[#allocation36_spill] sm:$0xff] %v5907_v26  ;;  %4584 = vmatprep.mubr.msk.f32.mxu0 %vm192_vm0, %v184_v23 }
 0x120   :  { %v5914_v34 = vpop.f32.mrf.mxu0 }
 0x121   :  { %7207 = vst [vmem:[#allocation37_spill] sm:$0xff] %v5914_v34 }
 0x122   :  { %v5919_v41 = vpop.f32.mrf.mxu0  ;;  %4585 = vmatmul.mubr.msk.f32.gmra.mxu0 %vm192_vm0, %v185_v30 }
 0x123   :  { %4587 = vmatprep.mubr.msk.f32.mxu0 %vm192_vm0, %v186_v37 }
 0x124   :  { %v5926_v48 = vpop.f32.mrf.mxu0 }
 0x125   :  { %7208 = vst [vmem:[#allocation38_spill] sm:$0xff] %v5926_v48 }
 0x126   :  { %v5931_v56 = vpop.f32.mrf.mxu0  ;;  %4588 = vmatmul.mubr.msk.f32.gmra.mxu0 %vm192_vm0, %v187_v45 }
 0x127   :  { %4590 = vmatprep.mubr.msk.f32.mxu0 %vm192_vm0, %v188_v52 }
 0x128   :  { %v5938_v1 = vpop.f32.mrf.mxu0 }
 0x12a   :  { %v5943_v9 = vpop.f32.mrf.mxu0  ;;  %4591 = vmatmul.mubr.msk.f32.gmra.mxu0 %vm192_vm0, %v189_v59 }
 0x12b   :  { %4593 = vmatprep.mubr.msk.f32.mxu0 %vm192_vm0, %v190_v5 }
 0x12c   :  { %v5950_v23 = vpop.f32.mrf.mxu0 }
 0x12e   :  { %v5952_v30 = vpop.f32.mrf.mxu0  ;;  %4594 = vmatmul.mubr.msk.f32.gmra.mxu0 %vm192_vm0, %v191_v15 }
 0x130   :  { %v5955_v37 = vpop.f32.mrf.mxu0 }
 0x132   :  { %v5957_v45 = vpop.f32.mrf.mxu0 }
 0x133   :  { %v1423_v21 = vmax.f32 %v5744_v57, %v5957_v45 }
 0x134   :  { %v5959_v52 = vpop.f32.mrf.mxu0 }
 0x135   :  { %v1422_v48 = vmax.f32 %v5756_v61, %v5959_v52 }
 0x136   :  { %v5961_v62 = vpop.f32.mrf.mxu0 }
 0x137   :  { %v1425_v60 = vmax.f32 %v5763_v0, %v5961_v62 }
 0x138   :  { %v5963_v59 = vpop.f32.mrf.mxu0 }
 0x139   :  { %v1424_v53 = vmax.f32 %v5770_v2, %v5963_v59 }
 0x13a   :  { %v5965_v5 = vpop.f32.mrf.mxu0 }
 0x13b   :  { %7209 = vst [vmem:[#allocation39_spill] sm:$0xff] %v5965_v5 }
 0x13c   :  { %v5967_v58 = vpop.f32.mrf.mxu0 }
 0x13d   :  { %7210 = vst [vmem:[#allocation40_spill] sm:$0xff] %v5967_v58 }
 0x13e   :  { %v5969_v7 = vpop.f32.mrf.mxu0 }
 0x13f   :  { %7211 = vst [vmem:[#allocation41_spill] sm:$0xff] %v5969_v7 }
 0x140   :  { %v5971_v3 = vpop.f32.mrf.mxu0 }
 0x141   :  { %7212 = vst [vmem:[#allocation42_spill] sm:$0xff] %v5971_v3 }
 0x142   :  { %v5973_v6 = vpop.f32.mrf.mxu0 }
 0x143   :  { %7213 = vst [vmem:[#allocation43_spill] sm:$0xff] %v5973_v6 }
 0x144   :  { %v5975_v15 = vpop.f32.mrf.mxu0 }
 0x145   :  { %7214 = vst [vmem:[#allocation44_spill] sm:$0xff] %v5975_v15 }
 0x146   :  { %v5977_v4 = vpop.f32.mrf.mxu0 }
 0x147   :  { %7215 = vst [vmem:[#allocation45_spill] sm:$0xff] %v5977_v4 }
 0x148   :  { %v5979_v11 = vpop.f32.mrf.mxu0 }
 0x149   :  { %7216 = vst [vmem:[#allocation46_spill] sm:$0xff] %v5979_v11 }
 0x14a   :  { %v5981_v8 = vpop.f32.mrf.mxu0 }
 0x14b   :  { %7217 = vst [vmem:[#allocation47_spill] sm:$0xff] %v5981_v8 }
 0x14c   :  { %v5983_v18 = vpop.f32.mrf.mxu0 }
 0x14d   :  { %7218 = vst [vmem:[#allocation48_spill] sm:$0xff] %v5983_v18 }
 0x14e   :  { %v5986_v58 = vpop.f32.mrf.mxu0 }
 0x14f   :  { %7219 = vst [vmem:[#allocation49_spill] sm:$0xff] %v5986_v58 }
 0x150   :  { %v5988_v5 = vpop.f32.mrf.mxu0 }
 0x151   :  { %7220 = vst [vmem:[#allocation50_spill] sm:$0xff] %v5988_v5 }
 0x152   :  { %v5990_v3 = vpop.f32.mrf.mxu0 }
 0x153   :  { %7221 = vst [vmem:[#allocation51_spill] sm:$0xff] %v5990_v3 }
 0x154   :  { %v5992_v7 = vpop.f32.mrf.mxu0 }
 0x155   :  { %7222 = vst [vmem:[#allocation52_spill] sm:$0xff] %v5992_v7 }
 0x156   :  { %v5994_v15 = vpop.f32.mrf.mxu0 }
 0x157   :  { %7223 = vst [vmem:[#allocation53_spill] sm:$0xff] %v5994_v15 }
 0x158   :  { %v5996_v6 = vpop.f32.mrf.mxu0 }
 0x159   :  { %7224 = vst [vmem:[#allocation54_spill] sm:$0xff] %v5996_v6 }
 0x15a   :  { %v5998_v25 = vpop.f32.mrf.mxu0 }
 0x15b   :  { %7225 = vst [vmem:[#allocation55_spill] sm:$0xff] %v5998_v25 }
 0x15c   :  { %v6000_v11 = vpop.f32.mrf.mxu0 }
 0x15d   :  { %7226 = vst [vmem:[#allocation56_spill] sm:$0xff] %v6000_v11 }
 0x15e   :  { %v6002_v22 = vpop.f32.mrf.mxu0 }
 0x15f   :  { %7227 = vst [vmem:[#allocation57_spill] sm:$0xff] %v6002_v22 }
 0x160   :  { %v6004_v4 = vpop.f32.mrf.mxu0 }
 0x161   :  { %7228 = vst [vmem:[#allocation58_spill] sm:$0xff] %v6004_v4 }
 0x162   :  { %v6006_v14 = vpop.f32.mrf.mxu0 }
 0x163   :  { %7229 = vst [vmem:[#allocation59_spill] sm:$0xff] %v6006_v14 }
 0x164   :  { %v6008_v33 = vpop.f32.mrf.mxu0 }
 0x165   :  { %7230 = vst [vmem:[#allocation60_spill] sm:$0xff] %v6008_v33 }
 0x166   :  { %v6010_v18 = vpop.f32.mrf.mxu0 }
 0x167   :  { %7231 = vst [vmem:[#allocation61_spill] sm:$0xff] %v6010_v18 }
 0x168   :  { %v6012_v29 = vpop.f32.mrf.mxu0 }
 0x169   :  { %7232 = vst [vmem:[#allocation62_spill] sm:$0xff] %v6012_v29 }
 0x16a   :  { %v6014_v8 = vpop.f32.mrf.mxu0 }
 0x16c   :  { %v6016_v40 = vpop.f32.mrf.mxu0 }
 0x16e   :  { %v6018_v5 = vpop.f32.mrf.mxu0 }
 0x170   :  { %v6020_v25 = vpop.f32.mrf.mxu0 }
 0x172   :  { %v6022_v11 = vpop.f32.mrf.mxu0 }
 0x174   :  { %v6024_v22 = vpop.f32.mrf.mxu0 }
 0x176   :  { %v6026_v4 = vpop.f32.mrf.mxu0 }
 0x178   :  { %v6028_v36 = vpop.f32.mrf.mxu0 }
 0x17a   :  { %v4508_v58 = vpop.f32.mrf.mxu0 }
 0x17c   :  { %v1111_v47 = vpop.f32.mrf.mxu0 }
 0x17e   :  { %v4511_v7 = vpop.f32.mrf.mxu0 }
 0x180   :  { %v1121_v55 = vpop.f32.mrf.mxu0 }
 0x182   :  { %v6030_v6 = vpop.f32.mrf.mxu0 }
 0x183   :  { %7233 = vst [vmem:[#allocation63_spill] sm:$0xff] %v6030_v6 }
 0x184   :  { %v6032_v44 = vpop.f32.mrf.mxu0 }
 0x185   :  { %7234 = vst [vmem:[#allocation64_spill] sm:$0xff] %v6032_v44 }
 0x186   :  { %v6034_v3 = vpop.f32.mrf.mxu0 }
 0x187   :  { %7235 = vst [vmem:[#allocation65_spill] sm:$0xff] %v6034_v3 }
 0x188   :  { %v6036_v51 = vpop.f32.mrf.mxu0 }
 0x189   :  { %7236 = vst [vmem:[#allocation66_spill] sm:$0xff] %v6036_v51 }
 0x18a   :  { %v6038_v15 = vpop.f32.mrf.mxu0 }
 0x18b   :  { %7237 = vst [vmem:[#allocation67_spill] sm:$0xff] %v6038_v15 }
 0x18c   :  { %v6043_v19 = vpop.f32.mrf.mxu0 }
 0x18d   :  { %7238 = vst [vmem:[#allocation68_spill] sm:$0xff] %v6043_v19 }
 0x18e   :  { %v6045_v33 = vpop.f32.mrf.mxu0 }
 0x18f   :  { %7239 = vst [vmem:[#allocation69_spill] sm:$0xff] %v6045_v33 }
 0x190   :  { %v6047_v13 = vpop.f32.mrf.mxu0 }
 0x191   :  { %7240 = vst [vmem:[#allocation70_spill] sm:$0xff] %v6047_v13 }
 0x192   :  { %v6049_v6 = vpop.f32.mrf.mxu0 }
 0x193   :  { %7241 = vst [vmem:[#allocation71_spill] sm:$0xff] %v6049_v6 }
 0x194   :  { %v6051_v44 = vpop.f32.mrf.mxu0 }
 0x195   :  { %7242 = vst [vmem:[#allocation72_spill] sm:$0xff] %v6051_v44 }
 0x196   :  { %v6053_v3 = vpop.f32.mrf.mxu0 }
 0x197   :  { %7243 = vst [vmem:[#allocation73_spill] sm:$0xff] %v6053_v3 }
 0x198   :  { %v6055_v51 = vpop.f32.mrf.mxu0 }
 0x199   :  { %7244 = vst [vmem:[#allocation74_spill] sm:$0xff] %v6055_v51 }
 0x19a   :  { %v6057_v15 = vpop.f32.mrf.mxu0 }
 0x19b   :  { %7245 = vst [vmem:[#allocation75_spill] sm:$0xff] %v6057_v15 }
 0x19c   :  { %v6059_v12 = vpop.f32.mrf.mxu0 }
 0x19d   :  { %7246 = vst [vmem:[#allocation76_spill] sm:$0xff] %v6059_v12 }
 0x19e   :  { %v6061_v63 = vpop.f32.mrf.mxu0 }
 0x19f   :  { %7247 = vst [vmem:[#allocation77_spill] sm:$0xff] %v6061_v63 }
 0x1a0   :  { %v6063_v17 = vpop.f32.mrf.mxu0 }
 0x1a1   :  { %7248 = vst [vmem:[#allocation78_spill] sm:$0xff] %v6063_v17 }
 0x1a2   :  { %v6065_v19 = vpop.f32.mrf.mxu0 }
 0x1a3   :  { %7249 = vst [vmem:[#allocation79_spill] sm:$0xff] %v6065_v19 }
 0x1a4   :  { %v6067_v33 = vpop.f32.mrf.mxu0 }
 0x1a5   :  { %7250 = vst [vmem:[#allocation80_spill] sm:$0xff] %v6067_v33 }
 0x1a6   :  { %v6069_v13 = vpop.f32.mrf.mxu0 }
 0x1a7   :  { %7251 = vst [vmem:[#allocation81_spill] sm:$0xff] %v6069_v13 }
 0x1a8   :  { %v6071_v6 = vpop.f32.mrf.mxu0 }
 0x1a9   :  { %7252 = vst [vmem:[#allocation82_spill] sm:$0xff] %v6071_v6 }
 0x1aa   :  { %v6073_v44 = vpop.f32.mrf.mxu0 }
 0x1ab   :  { %7253 = vst [vmem:[#allocation83_spill] sm:$0xff] %v6073_v44 }
 0x1ac   :  { %v6075_v3 = vpop.f32.mrf.mxu0 }
 0x1ad   :  { %7254 = vst [vmem:[#allocation84_spill] sm:$0xff] %v6075_v3  ;;  %v6089_v3 = vpop.permute.xlu1 %1576 }
 0x1ae   :  { %v6077_v51 = vpop.f32.mrf.mxu0  ;;  %7257 = vst [vmem:[#allocation87_spill] sm:$0xff] %v6089_v3  ;;  %v6101_v3 = vpop.permute.xlu0 %1571 }
 0x1af   :  { %7255 = vst [vmem:[#allocation85_spill] sm:$0xff] %v6077_v51 }
 0x1b0   :  { %v6079_v15 = vpop.f32.mrf.mxu0 }
 0x1b1   :  { %7256 = vst [vmem:[#allocation86_spill] sm:$0xff] %v6079_v15 }
 0x1b2   :  { %v6081_v12 = vpop.f32.mrf.mxu0 }
 0x1b4   :  { %v6083_v63 = vpop.f32.mrf.mxu0 }
 0x1b6   :  { %v6085_v17 = vpop.f32.mrf.mxu0 }
 0x1b8   :  { %v6087_v19 = vpop.f32.mrf.mxu0 }
 0x1ba   :  { %v4556_v33 = vpop.f32.mrf.mxu0 }
 0x1bc   :  { %v1271_v13 = vpop.f32.mrf.mxu0 }
 0x1be   :  { %v4559_v14 = vpop.f32.mrf.mxu0 }
 0x1c0   :  { %v1281_v6 = vpop.f32.mrf.mxu0 }
 0x1c1   :  { %v1456_v2 = vmax.f32 %v6028_v36, %v1281_v6  ;;  %v6123_v6 = vpop.permute.xlu0 %1561 }
 0x1c2   :  { %v4562_v24 = vpop.f32.mrf.mxu0 }
 0x1c3   :  { %v1459_v29 = vmax.f32 %v4508_v58, %v4562_v24  ;;  %v1457_v24 = vmax.f32 %v6026_v4, %v4559_v14  ;;  %v7258_v4 = vmov 0.0   ;;  %v1454_v14 = vmax.f32 %v6024_v22, %v1271_v13 }
 0x1c4   :  { %v1291_v44 = vpop.f32.mrf.mxu0  ;;  %v1452_v22 = vmax.f32 %v6020_v25, %v6087_v19 }
 0x1c5   :  { %v1458_v18 = vmax.f32 %v1111_v47, %v1291_v44  ;;  %v1495_v0 = vmax.f32 %v1423_v21, %v1459_v29  ;;  %v1455_v21 = vmax.f32 %v6022_v11, %v4556_v33  ;;  %v1418_v29 = vmax.f32 %v5714_v46, %v5950_v23 }
 0x1c6   :  { %v4565_v34 = vpop.f32.mrf.mxu0  ;;  %v1453_v33 = vmax.f32 %v6018_v5, %v6085_v17  ;;  %v7266_v5 = vld [vmem:[#allocation7_spill] sm:$0xff]  ;;  %v7267_v17 = vld [vmem:[#allocation86_spill] sm:$0xff] }
 0x1c7   :  { %v1461_v15 = vmax.f32 %v4511_v7, %v4565_v34  ;;  %v6107_v7 = vpop.permute.xlu1 %1566  ;;  %v1494_v61 = vmax.f32 %v1422_v48, %v1458_v18  ;;  %v1451_v34 = vmax.f32 %v6014_v8, %v6081_v12  ;;  %v1415_v48 = vmax.f32 %v5662_v28, %v5919_v41  ;;  %v7264_v28 = vld [vmem:[#allocation11_spill] sm:$0xff] }
 0x1c8   :  { %v1301_v26 = vpop.f32.mrf.mxu0 }
 0x1c9   :  { %v1497_v51 = vmax.f32 %v1425_v60, %v1461_v15  ;;  %v1460_v32 = vmax.f32 %v1121_v55, %v1301_v26  ;;  %v1421_v60 = vmax.f32 %v5724_v50, %v5952_v30  ;;  %v6150_v26 = vpop.permute.xlu0 %1711  ;;  %v7262_v30 = vld [vmem:[#allocation85_spill] sm:$0xff]  ;;  %v1487_v52 = vmax.f32 %v1415_v48, %v1451_v34  ;;  %v7280_v48 = vld [vmem:[#allocation35_spill] sm:$0xff] }
 0x1ca   :  { %v6099_v49 = vpop.f32.mrf.mxu0 }
 0x1cb   :  { %v1496_v58 = vmax.f32 %v1424_v53, %v1460_v32  ;;  %v1749_v57 = vadd.f32 %v5612_v10, %v1497_v51  ;;  %v1420_v10 = vmax.f32 %v5736_v54, %v5955_v37  ;;  %v1493_v32 = vmax.f32 %v1421_v60, %v1457_v24  ;;  %v7263_v37 = vld [vmem:[#allocation61_spill] sm:$0xff]  ;;  %v7268_v24 = vld [vmem:[#allocation62_spill] sm:$0xff] }
 0x1cc   :  { %v6105_v62 = vpop.f32.mrf.mxu0  ;;  %v1747_v53 = vadd.f32 %v5630_v16, %v1495_v0  ;;  %v1746_v54 = vadd.f32 %v5660_v27, %v1494_v61  ;;  %v6132_v16 = vpop.permute.xlu1 %1556  ;;  %v1417_v27 = vmax.f32 %v5682_v35, %v5931_v56  ;;  %v1490_v51 = vmax.f32 %v1418_v29, %v1454_v14 }
 0x1cd   :  { %1964 = vmatpush1.msra.mxu1 %v1749_v57  ;;  %v1748_v44 = vadd.f32 %v5640_v20, %v1496_v58  ;;  %v1419_v20 = vmax.f32 %v5704_v43, %v5943_v9  ;;  %v1492_v18 = vmax.f32 %v1420_v10, %v1456_v2  ;;  %v1745_v13 = vadd.f32 %v5672_v31, %v1493_v32  ;;  %v7261_v9 = vld [vmem:[#allocation9_spill] sm:$0xff]  ;;  %v7269_v57 = vld [vmem:[#allocation12_spill] sm:$0xff]  ;;  %v7272_v32 = vld [vmem:[#allocation83_spill] sm:$0xff] }
 0x1ce   :  { %v6113_v47 = vpop.f32.mrf.mxu0  ;;  %1965 = vmatprep.subr.mxu1 %v7258_v4  ;;  %v1416_v31 = vmax.f32 %v5694_v39, %v5938_v1  ;;  %v1489_v35 = vmax.f32 %v1417_v27, %v1453_v33  ;;  %v1450_v56 = vmax.f32 %v6016_v40, %v6083_v63  ;;  %v7259_v1 = vld [vmem:[#allocation10_spill] sm:$0xff]  ;;  %v1449_v45 = vmax.f32 %v7263_v37, %v7262_v30  ;;  %v6178_v63 = vpop.permute.xlu0 %1701  ;;  %v7265_v40 = vld [vmem:[#allocation36_spill] sm:$0xff] }
 0x1cf   :  { %1966 = vmatpush1.msra.mxu1 %v1748_v44  ;;  %v1491_v36 = vmax.f32 %v1419_v20, %v1455_v21  ;;  %v1744_v46 = vadd.f32 %v5692_v38, %v1492_v18  ;;  %v1742_v8 = vadd.f32 %v7259_v1, %v1490_v51  ;;  %v1413_v15 = vmax.f32 %v7266_v5, %v7265_v40  ;;  %v7270_v44 = vld [vmem:[#allocation37_spill] sm:$0xff]  ;;  %v7271_v10 = vld [vmem:[#allocation8_spill] sm:$0xff]  ;;  %v7275_v33 = vld [vmem:[#allocation34_spill] sm:$0xff] }
 0x1d0   :  { %v6120_v50 = vpop.f32.mrf.mxu0  ;;  %1967 = vmatprep.subr.mxu1 %v7258_v4  ;;  %v6160_v38 = vpop.permute.xlu1 %1706  ;;  %v1488_v39 = vmax.f32 %v1416_v31, %v1452_v22  ;;  %v1741_v41 = vadd.f32 %v7264_v28, %v1489_v35  ;;  %v1448_v0 = vmax.f32 %v7268_v24, %v7267_v17  ;;  %v1412_v21 = vmax.f32 %v7271_v10, %v7270_v44  ;;  %v7274_v18 = vld [vmem:[#allocation13_spill] sm:$0xff]  ;;  %v7277_v27 = vld [vmem:[#allocation84_spill] sm:$0xff]  ;;  %v7279_v31 = vld [vmem:[#allocation87_spill] sm:$0xff] }
 0x1d1   :  { %1968 = vmatpush1.msra.mxu1 %v1747_v53  ;;  %v1743_v25 = vadd.f32 %v5702_v42, %v1491_v36  ;;  %v7260_v42 = vld [vmem:[#allocation38_spill] sm:$0xff]  ;;  %v7273_v53 = vld [vmem:[#allocation59_spill] sm:$0xff]  ;;  %v1485_v14 = vmax.f32 %v1413_v15, %v1449_v45  ;;  %v7276_v36 = vld [vmem:[#allocation5_spill] sm:$0xff] }
 0x1d2   :  { %v6129_v11 = vpop.f32.mrf.mxu0  ;;  %1969 = vmatprep.subr.mxu1 %v7258_v4  ;;  %v1414_v23 = vmax.f32 %v7261_v9, %v7260_v42  ;;  %v1740_v60 = vadd.f32 %v7269_v57, %v1488_v39  ;;  %v1447_v20 = vmax.f32 %v7273_v53, %v7272_v32  ;;  %v7278_v22 = vld [vmem:[#allocation60_spill] sm:$0xff]  ;;  %v7282_v45 = vld [vmem:[#allocation53_spill] sm:$0xff]  ;;  %v7286_v17 = vld [vmem:[#allocation51_spill] sm:$0xff] }
 0x1d3   :  { %1970 = vmatpush1.msra.mxu1 %v1746_v54  ;;  %v1739_v54 = vadd.f32 %v7274_v18, %v1487_v52  ;;  %v1446_v51 = vmax.f32 %v7278_v22, %v7277_v27  ;;  %v7283_v52 = vld [vmem:[#allocation28_spill] sm:$0xff]  ;;  %v7285_v5 = vld [vmem:[#allocation77_spill] sm:$0xff]  ;;  %v7287_v24 = vld [vmem:[#allocation26_spill] sm:$0xff] }
 0x1d4   :  { %v6139_v43 = vpop.f32.mrf.mxu0  ;;  %1971 = vmatprep.subr.mxu1 %v7258_v4  ;;  %v1486_v58 = vmax.f32 %v1414_v23, %v1450_v56  ;;  %v6188_v61 = vpop.permute.xlu1 %1696  ;;  %v7281_v56 = vld [vmem:[#allocation6_spill] sm:$0xff]  ;;  %v1441_v28 = vmax.f32 %v7283_v52, %v7282_v45  ;;  %v7289_v57 = vld [vmem:[#allocation29_spill] sm:$0xff]  ;;  %v7290_v10 = vld [vmem:[#allocation76_spill] sm:$0xff] }
 0x1d5   :  { %1972 = vmatpush1.msra.mxu1 %v1745_v13  ;;  %v1411_v13 = vmax.f32 %v7276_v36, %v7275_v33  ;;  %v1410_v39 = vmax.f32 %v7281_v56, %v7280_v48  ;;  %v7291_v53 = vld [vmem:[#allocation78_spill] sm:$0xff]  ;;  %v7292_v18 = vld [vmem:[#allocation52_spill] sm:$0xff]  ;;  %v7294_v36 = vld [vmem:[#allocation73_spill] sm:$0xff] }
 0x1d6   :  { %v6147_v55 = vpop.f32.mrf.mxu0  ;;  %1973 = vmatprep.subr.mxu1 %v7258_v4  ;;  %v1738_v34 = vadd.f32 %v7279_v31, %v1486_v58  ;;  %v7288_v58 = vld [vmem:[#allocation54_spill] sm:$0xff]  ;;  %v7296_v31 = vld [vmem:[#allocation24_spill] sm:$0xff] }
 0x1d7   :  { %1974 = vmatpush1.msra.mxu1 %v1744_v46  ;;  %v1484_v46 = vmax.f32 %v1412_v21, %v1448_v0  ;;  %v1483_v1 = vmax.f32 %v1411_v13, %v1447_v20  ;;  %v1482_v23 = vmax.f32 %v1410_v39, %v1446_v51  ;;  %v1439_v0 = vmax.f32 %v7287_v24, %v7286_v17  ;;  %v7298_v39 = vld [vmem:[#allocation50_spill] sm:$0xff] }
 0x1d8   :  { %v6157_v19 = vpop.f32.mrf.mxu0  ;;  %1975 = vmatprep.subr.mxu1 %v7258_v4  ;;  %v1687_v9 = vpop.permute.xlu1 %1686  ;;  %v7302_v45 = vld [vmem:[#allocation22_spill] sm:$0xff] }
 0x1d9   :  { %1976 = vmatpush1.msra.mxu1 %v1743_v25  ;;  %v1692_v25 = vpop.permute.xlu0 %1691  ;;  %v1736_v30 = vadd.f32 %v6107_v7, %v1484_v46  ;;  %v7295_v46 = vld [vmem:[#allocation49_spill] sm:$0xff] }
 0x1da   :  { %v6167_v12 = vpop.f32.mrf.mxu0  ;;  %1977 = vmatprep.subr.mxu1 %v7258_v4 }
 0x1db   :  { %1978 = vmatpush1.msra.mxu1 %v1742_v8  ;;  %v1737_v8 = vadd.f32 %v6101_v3, %v1485_v14  ;;  %v1735_v3 = vadd.f32 %v6123_v6, %v1483_v1  ;;  %v1734_v14 = vadd.f32 %v6132_v16, %v1482_v23  ;;  %v7293_v6 = vld [vmem:[#allocation27_spill] sm:$0xff]  ;;  %v7297_v16 = vld [vmem:[#allocation74_spill] sm:$0xff]  ;;  %v7299_v1 = vld [vmem:[#allocation25_spill] sm:$0xff] }
 0x1dc   :  { %v6175_v59 = vpop.f32.mrf.mxu0  ;;  %1979 = vmatprep.subr.mxu1 %v7258_v4  ;;  %v1677_v33 = vpop.permute.xlu1 %1676 }
 0x1dd   :  { %1980 = vmatpush1.msra.mxu1 %v1741_v41  ;;  %v7284_v41 = vld [vmem:[#allocation75_spill] sm:$0xff]  ;;  %v1682_v44 = vpop.permute.xlu0 %1681 }
 0x1de   :  { %v6185_v2 = vpop.f32.mrf.mxu0  ;;  %1981 = vmatprep.subr.mxu1 %v7258_v4 }
 0x1df   :  { %1982 = vmatpush1.msra.mxu1 %v1740_v60  ;;  %v1440_v60 = vmax.f32 %v7289_v57, %v7288_v58  ;;  %v1473_v13 = vmax.f32 %v7294_v36, %v6185_v2  ;;  %v7307_v58 = vld [vmem:[#allocation45_spill] sm:$0xff] }
 0x1e0   :  { %v6195_v29 = vpop.f32.mrf.mxu0  ;;  %1983 = vmatprep.subr.mxu1 %v7258_v4 }
 0x1e1   :  { %1984 = vmatpush1.msra.mxu1 %v1739_v54  ;;  %v1438_v54 = vmax.f32 %v7293_v6, %v7292_v18  ;;  %v1672_v2 = vpop.permute.xlu0 %1671 }
 0x1e2   :  { %v4586_v35 = vpop.f32.mrf.mxu0  ;;  %1985 = vmatprep.subr.mxu1 %v7258_v4 }
 0x1e3   :  { %1986 = vmatpush1.msra.mxu1 %v1738_v34  ;;  %v1475_v40 = vmax.f32 %v7284_v41, %v4586_v35  ;;  %v1437_v34 = vmax.f32 %v7296_v31, %v7295_v46  ;;  %v1472_v35 = vmax.f32 %v7297_v16, %v6195_v29  ;;  %v1667_v29 = vpop.permute.xlu1 %1666  ;;  %v7317_v31 = vld [vmem:[#allocation19_spill] sm:$0xff] }
 0x1e4   :  { %v1371_v42 = vpop.f32.mrf.mxu0  ;;  %1987 = vmatprep.subr.mxu1 %v7258_v4 }
 0x1e5   :  { %1988 = vmatpush1.msra.mxu1 %v1737_v8  ;;  %v1474_v21 = vmax.f32 %v7290_v10, %v1371_v42  ;;  %v1511_v27 = vmax.f32 %v1439_v0, %v1475_v40  ;;  %v1436_v8 = vmax.f32 %v7299_v1, %v7298_v39  ;;  %v1509_v23 = vmax.f32 %v1437_v34, %v1473_v13  ;;  %v1662_v0 = vpop.permute.xlu0 %1661  ;;  %v7315_v13 = vld [vmem:[#allocation68_spill] sm:$0xff] }
 0x1e6   :  { %v4589_v37 = vpop.f32.mrf.mxu0  ;;  %1989 = vmatprep.subr.mxu1 %v7258_v4  ;;  %v7320_v39 = vld [vmem:[#allocation16_spill] sm:$0xff] }
 0x1e7   :  { %v1477_v15 = vmax.f32 %v7285_v5, %v4589_v37  ;;  %1990 = vmatpush1.msra.mxu1 %v1736_v30  ;;  %v1510_v48 = vmax.f32 %v1438_v54, %v1474_v21  ;;  %v1763_v30 = vadd.f32 %v6178_v63, %v1511_v27  ;;  %v7301_v37 = vld [vmem:[#allocation47_spill] sm:$0xff]  ;;  %v1508_v41 = vmax.f32 %v1436_v8, %v1472_v35  ;;  %v7306_v63 = vld [vmem:[#allocation69_spill] sm:$0xff]  ;;  %v7314_v54 = vld [vmem:[#allocation18_spill] sm:$0xff] }
 0x1e8   :  { %v1381_v7 = vpop.f32.mrf.mxu0  ;;  %1991 = vmatprep.subr.mxu1 %v7258_v4  ;;  %v1435_v52 = vmax.f32 %v7302_v45, %v7301_v37  ;;  %v7305_v5 = vld [vmem:[#allocation23_spill] sm:$0xff]  ;;  %v1761_v24 = vadd.f32 %v1692_v25, %v1509_v23 }
 0x1e9   :  { %v1513_v32 = vmax.f32 %v1441_v28, %v1477_v15  ;;  %v1476_v20 = vmax.f32 %v7291_v53, %v1381_v7  ;;  %1992 = vmatpush1.msra.mxu1 %v1735_v3  ;;  %v1762_v40 = vadd.f32 %v6188_v61, %v1510_v48  ;;  %v1469_v3 = vmax.f32 %v7306_v63, %v6147_v55  ;;  %v1657_v55 = vpop.permute.xlu1 %1656  ;;  %v7311_v53 = vld [vmem:[#allocation21_spill] sm:$0xff]  ;;  %v1652_v46 = vpop.permute.xlu0 %1651 }
 0x1ea   :  { %1993 = vmatprep.subr.mxu1 %v7258_v4  ;;  %v6257_v10 = vpop.f32.mrf.mxu0  ;;  %v1760_v21 = vadd.f32 %v1687_v9, %v1508_v41  ;;  %v1466_v9 = vmax.f32 %v7315_v13, %v6139_v43  ;;  %v7325_v41 = vld [vmem:[#allocation39_spill] sm:$0xff]  ;;  %v7338_v13 = vld [vmem:[#allocation30_spill] sm:$0xff] }
 0x1eb   :  { %v1512_v22 = vmax.f32 %v1440_v60, %v1476_v20  ;;  %1994 = vmatpush1.msra.mxu1 %v1734_v14  ;;  %v1765_v51 = vadd.f32 %v6150_v26, %v1513_v32  ;;  %v7300_v26 = vld [vmem:[#allocation71_spill] sm:$0xff]  ;;  %v7309_v60 = vld [vmem:[#allocation70_spill] sm:$0xff] }
 0x1ec   :  { %1995 = vmatprep.subr.mxu1 %v7258_v4  ;;  %v1471_v42 = vmax.f32 %v7300_v26, %v6167_v12  ;;  %v7304_v12 = vld [vmem:[#allocation48_spill] sm:$0xff]  ;;  %v1468_v61 = vmax.f32 %v7309_v60, %v6157_v19  ;;  %v7310_v32 = vld [vmem:[#allocation46_spill] sm:$0xff]  ;;  %v7312_v20 = vld [vmem:[#allocation67_spill] sm:$0xff] }
 0x1ed   :  { %1996 = vmatpush2.msra.mxu1 %v1765_v51  ;;  %v1764_v56 = vadd.f32 %v6160_v38, %v1512_v22  ;;  %v7303_v38 = vld [vmem:[#allocation72_spill] sm:$0xff]  ;;  %v1434_v15 = vmax.f32 %v7305_v5, %v7304_v12  ;;  %v1432_v25 = vmax.f32 %v7311_v53, %v7310_v32  ;;  %v1467_v14 = vmax.f32 %v7312_v20, %v6129_v11  ;;  %v7313_v19 = vld [vmem:[#allocation43_spill] sm:$0xff]  ;;  %v6269_v22 = vpop.f32.mrf.mxu0  ;;  %v1647_v43 = vpop.permute.xlu1 %1646  ;;  %v7331_v60 = vld [vmem:[#allocation57_spill] sm:$0xff] }
 0x1ee   :  { %1997 = vmatprep.subr.mxu1 %v7258_v4  ;;  %v1470_v28 = vmax.f32 %v7303_v38, %v6175_v59  ;;  %v1507_v17 = vmax.f32 %v1435_v52, %v1471_v42  ;;  %v7308_v59 = vld [vmem:[#allocation20_spill] sm:$0xff]  ;;  %v1431_v36 = vmax.f32 %v7314_v54, %v7313_v19  ;;  %v7334_v53 = vld [vmem:[#allocation58_spill] sm:$0xff] }
 0x1ef   :  { %1998 = vmatpush2.msra.mxu1 %v1764_v56  ;;  %v1433_v57 = vmax.f32 %v7308_v59, %v7307_v58  ;;  %v1504_v27 = vmax.f32 %v1432_v25, %v1468_v61  ;;  %v7316_v11 = vld [vmem:[#allocation44_spill] sm:$0xff]  ;;  %v7319_v56 = vld [vmem:[#allocation41_spill] sm:$0xff]  ;;  %v4595_v42 = vpop.f32.mrf.mxu0 }
 0x1f0   :  { %1999 = vmatprep.subr.mxu1 %v7258_v4  ;;  %v1506_v7 = vmax.f32 %v1434_v15, %v1470_v28  ;;  %v1759_v6 = vadd.f32 %v1682_v44, %v1507_v17  ;;  %v1430_v34 = vmax.f32 %v7317_v31, %v7316_v11  ;;  %v7318_v44 = vld [vmem:[#allocation65_spill] sm:$0xff]  ;;  %v1503_v35 = vmax.f32 %v1431_v36, %v1467_v14  ;;  %v1642_v28 = vpop.permute.xlu0 %1641  ;;  %v7327_v12 = vld [vmem:[#allocation64_spill] sm:$0xff]  ;;  %v7336_v14 = vld [vmem:[#allocation79_spill] sm:$0xff] }
 0x1f1   :  { %2000 = vmatpush2.msra.mxu1 %v1763_v30  ;;  %v1505_v18 = vmax.f32 %v1433_v57, %v1469_v3  ;;  %v1465_v16 = vmax.f32 %v7318_v44, %v6113_v47  ;;  %v1429_v1 = vmax.f32 %v7320_v39, %v7319_v56  ;;  %v1756_v23 = vadd.f32 %v1667_v29, %v1504_v27  ;;  %v7322_v30 = vld [vmem:[#allocation42_spill] sm:$0xff]  ;;  %v7323_v47 = vld [vmem:[#allocation17_spill] sm:$0xff]  ;;  %v1401_v15 = vpop.f32.mrf.mxu0  ;;  %v7332_v61 = vld [vmem:[#allocation32_spill] sm:$0xff] }
 0x1f2   :  { %2001 = vmatprep.subr.mxu1 %v7258_v4  ;;  %v1758_v51 = vadd.f32 %v1677_v33, %v1506_v7  ;;  %v7321_v33 = vld [vmem:[#allocation66_spill] sm:$0xff]  ;;  %v1502_v26 = vmax.f32 %v1430_v34, %v1466_v9  ;;  %v1428_v37 = vmax.f32 %v7323_v47, %v7322_v30  ;;  %v1755_v38 = vadd.f32 %v1662_v0, %v1503_v35  ;;  %v7328_v3 = vld [vmem:[#allocation81_spill] sm:$0xff]  ;;  %v7330_v0 = vld [vmem:[#allocation15_spill] sm:$0xff] }
 0x1f3   :  { %2002 = vmatpush2.msra.mxu1 %v1762_v40  ;;  %v1757_v48 = vadd.f32 %v1672_v2, %v1505_v18  ;;  %v1464_v8 = vmax.f32 %v7321_v33, %v6120_v50  ;;  %v7324_v2 = vld [vmem:[#allocation63_spill] sm:$0xff]  ;;  %v1501_v52 = vmax.f32 %v1429_v1, %v1465_v16  ;;  %v7326_v50 = vld [vmem:[#allocation14_spill] sm:$0xff]  ;;  %v1462_v29 = vmax.f32 %v7327_v12, %v6105_v62  ;;  %v7335_v25 = vld [vmem:[#allocation33_spill] sm:$0xff] }
 0x1f4   :  { %2003 = vmatprep.subr.mxu1 %v7258_v4  ;;  %v1463_v45 = vmax.f32 %v7324_v2, %v6099_v49  ;;  %v1427_v40 = vmax.f32 %v7326_v50, %v7325_v41  ;;  %v1754_v63 = vadd.f32 %v1657_v55, %v1502_v26  ;;  %v1481_v17 = vmax.f32 %v7328_v3, %v4595_v42  ;;  %v1637_v49 = vpop.permute.xlu1 %1636  ;;  %v1732_v19 = vpop.permute.xlu0 %1731  ;;  %v7337_v36 = vld [vmem:[#allocation55_spill] sm:$0xff]  ;;  %v7339_v27 = vld [vmem:[#allocation80_spill] sm:$0xff]  ;;  %v1780_v30 = vld [vmem:[%s7160_s3 + $0x50] sm:$0xff] }
 0x1f5   :  { %2004 = vmatpush2.msra.mxu1 %v1761_v24  ;;  %v1500_v5 = vmax.f32 %v1428_v37, %v1464_v8  ;;  %v7329_v24 = vld [vmem:[#allocation40_spill] sm:$0xff]  ;;  %v1753_v57 = vadd.f32 %v1652_v46, %v1501_v52  ;;  %v1445_v7 = vmax.f32 %v7332_v61, %v7331_v60  ;;  %v1444_v20 = vmax.f32 %v7335_v25, %v7334_v53  ;;  %v7341_v44 = vld [vmem:[#allocation31_spill] sm:$0xff]  ;;  %v1779_v47 = vld [vmem:[%s7160_s3 + $0x48] sm:$0xff] }
 0x1f6   :  { %2005 = vmatprep.subr.mxu1 %v7258_v4  ;;  %v1426_v58 = vmax.f32 %v7330_v0, %v7329_v24  ;;  %v1499_v59 = vmax.f32 %v1427_v40, %v1463_v45  ;;  %v1479_v18 = vmax.f32 %v7336_v14, %v6257_v10  ;;  %v1443_v9 = vmax.f32 %v7338_v13, %v7337_v36  ;;  %v1770_v10 = vld [vmem:[%s7160_s3] sm:$0xff]  ;;  %v1773_v1 = vld [vmem:[%s7160_s3 + $0x18] sm:$0xff]  ;;  %v1783_v37 = vld [vmem:[%s7160_s3 + $0x68] sm:$0xff] }
 0x1f7   :  { %2006 = vmatpush2.msra.mxu1 %v1760_v21  ;;  %v7333_v21 = vld [vmem:[#allocation82_spill] sm:$0xff]  ;;  %v1752_v55 = vadd.f32 %v1647_v43, %v1500_v5  ;;  %v7340_v34 = vld [vmem:[#allocation56_spill] sm:$0xff]  ;;  %v1777_v8 = vld [vmem:[%s7160_s3 + $0x38] sm:$0xff] }
 0x1f8   :  { %2007 = vmatprep.subr.mxu1 %v7258_v4  ;;  %v1480_v62 = vmax.f32 %v7333_v21, %v1401_v15  ;;  %v1498_v32 = vmax.f32 %v1426_v58, %v1462_v29  ;;  %v1751_v54 = vadd.f32 %v1642_v28, %v1499_v59  ;;  %v1727_v11 = vpop.permute.xlu1 %1726  ;;  %v1442_v16 = vmax.f32 %v7341_v44, %v7340_v34  ;;  %v1722_v39 = vpop.permute.xlu0 %1721  ;;  %v1782_v2 = vld [vmem:[%s7160_s3 + $0x60] sm:$0xff]  ;;  %v1785_v52 = vld [vmem:[%s7160_s3 + $0x78] sm:$0xff]  ;;  %v1788_v28 = vld [vmem:[%s7160_s3 + $0x90] sm:$0xff] }
 0x1f9   :  { %2008 = vmatpush2.msra.mxu1 %v1759_v6  ;;  %v1517_v6 = vmax.f32 %v1445_v7, %v1481_v17  ;;  %v1515_v35 = vmax.f32 %v1443_v9, %v1479_v18  ;;  %v1786_v45 = vld [vmem:[%s7160_s3 + $0x80] sm:$0xff]  ;;  %v1792_v41 = vld [vmem:[%s7160_s3 + $0xb0] sm:$0xff]  ;;  %v1791_v50 = vld [vmem:[%s7160_s3 + $0xa8] sm:$0xff] }
 0x1fa   :  { %2009 = vmatprep.subr.mxu1 %v7258_v4  ;;  %v1516_v46 = vmax.f32 %v1444_v20, %v1480_v62  ;;  %v1750_v31 = vadd.f32 %v1637_v49, %v1498_v32  ;;  %v1795_v40 = vld [vmem:[%s7160_s3 + $0xc8] sm:$0xff]  ;;  %v1794_v12 = vld [vmem:[%s7160_s3 + $0xc0] sm:$0xff]  ;;  %v1797_v5 = vld [vmem:[%s7160_s3 + $0xd8] sm:$0xff] }
 0x1fb   :  { %2010 = vmatpush2.msra.mxu1 %v1758_v51  ;;  %v1478_v51 = vmax.f32 %v7339_v27, %v6269_v22  ;;  %v1774_v22 = vld [vmem:[%s7160_s3 + $0x20] sm:$0xff]  ;;  %v1767_v33 = vadd.f32 %v1722_v39, %v1515_v35  ;;  %v1801_v15 = vld [vmem:[%s7160_s3 + $0xf8] sm:$0xff]  ;;  %v1804_v3 = vld [vmem:[%s7160_s3 + $0x110] sm:$0xff] }
 0x1fc   :  { %2011 = vmatprep.subr.mxu1 %v7258_v4  ;;  %v1768_v56 = vadd.f32 %v1727_v11, %v1516_v46  ;;  %v1717_v26 = vpop.permute.xlu1 %1716  ;;  %v1798_v29 = vld [vmem:[%s7160_s3 + $0xe0] sm:$0xff]  ;;  %v1803_v17 = vld [vmem:[%s7160_s3 + $0x108] sm:$0xff]  ;;  %v1809_v58 = vld [vmem:[%s7160_s3 + $0x138] sm:$0xff] }
 0x1fd   :  { %2012 = vmatpush2.msra.mxu1 %v1757_v48  ;;  %v1769_v48 = vadd.f32 %v1732_v19, %v1517_v6  ;;  %v1514_v43 = vmax.f32 %v1442_v16, %v1478_v51  ;;  %v1807_v49 = vld [vmem:[%s7160_s3 + $0x128] sm:$0xff]  ;;  %v1806_v24 = vld [vmem:[%s7160_s3 + $0x120] sm:$0xff]  ;;  %v1813_v59 = vld [vmem:[%s7160_s3 + $0x158] sm:$0xff] }
 0x1fe   :  { %2013 = vmatprep.subr.mxu1 %v7258_v4  ;;  %v1810_v0 = vld [vmem:[%s7160_s3 + $0x140] sm:$0xff]  ;;  %v1816_v60 = vld [vmem:[%s7160_s3 + $0x170] sm:$0xff]  ;;  %v1815_v61 = vld [vmem:[%s7160_s3 + $0x168] sm:$0xff] }
 0x1ff   :  { %2014 = vmatpush2.msra.mxu1 %v1756_v23  ;;  %v1766_v42 = vadd.f32 %v1717_v26, %v1514_v43  ;;  %v1776_v23 = vld [vmem:[%s7160_s3 + $0x30] sm:$0xff]  ;;  %v1819_v7 = vld [vmem:[%s7160_s3 + $0x188] sm:$0xff]  ;;  %v1818_v21 = vld [vmem:[%s7160_s3 + $0x180] sm:$0xff] }
 0x200   :  { %2015 = vmatprep.subr.mxu1 %v7258_v4  ;;  %v1822_v62 = vld [vmem:[%s7160_s3 + $0x1a0] sm:$0xff]  ;;  %v1821_v32 = vld [vmem:[%s7160_s3 + $0x198] sm:$0xff]  ;;  %v1824_v53 = vld [vmem:[%s7160_s3 + $0x1b0] sm:$0xff] }
 0x201   :  { %2016 = vmatpush2.msra.mxu1 %v1755_v38  ;;  %v1789_v38 = vld [vmem:[%s7160_s3 + $0x98] sm:$0xff]  ;;  %v1828_v25 = vld [vmem:[%s7160_s3 + $0x1d0] sm:$0xff]  ;;  %v1827_v20 = vld [vmem:[%s7160_s3 + $0x1c8] sm:$0xff] }
 0x202   :  { %2017 = vmatprep.subr.mxu1 %v7258_v4  ;;  %v1831_v14 = vld [vmem:[%s7160_s3 + $0x1e8] sm:$0xff]  ;;  %v1830_v18 = vld [vmem:[%s7160_s3 + $0x1e0] sm:$0xff]  ;;  %v1833_v19 = vld [vmem:[%s7160_s3 + $0x1f8] sm:$0xff] }
 0x203   :  { %2018 = vmatpush2.msra.mxu1 %v1754_v63  ;;  %v1800_v63 = vld [vmem:[%s7160_s3 + $0xf0] sm:$0xff]  ;;  %v1834_v6 = vld [vmem:[%s7160_s3 + $0x200] sm:$0xff]  ;;  %v1839_v9 = vld [vmem:[%s7160_s3 + $0x228] sm:$0xff] }
 0x204   :  { %2019 = vmatprep.subr.mxu1 %v7258_v4  ;;  %v1836_v36 = vld [vmem:[%s7160_s3 + $0x210] sm:$0xff]  ;;  %v1843_v27 = vld [vmem:[%s7160_s3 + $0x248] sm:$0xff]  ;;  %v1842_v51 = vld [vmem:[%s7160_s3 + $0x240] sm:$0xff] }
 0x205   :  { %2020 = vmatpush2.msra.mxu1 %v1753_v57  ;;  %v1812_v57 = vld [vmem:[%s7160_s3 + $0x150] sm:$0xff]  ;;  %v1846_v46 = vld [vmem:[%s7160_s3 + $0x260] sm:$0xff]  ;;  %v1845_v11 = vld [vmem:[%s7160_s3 + $0x258] sm:$0xff] }
 0x206   :  { %2021 = vmatprep.subr.mxu1 %v7258_v4  ;;  %v1840_v13 = vld [vmem:[%s7160_s3 + $0x230] sm:$0xff]  ;;  %v1851_v44 = vld [vmem:[%s7160_s3 + $0x288] sm:$0xff]  ;;  %v1854_v35 = vld [vmem:[%s7160_s3 + $0x2a0] sm:$0xff] }
 0x207   :  { %2022 = vmatpush2.msra.mxu1 %v1752_v55  ;;  %v1825_v55 = vld [vmem:[%s7160_s3 + $0x1b8] sm:$0xff]  ;;  %v1852_v34 = vld [vmem:[%s7160_s3 + $0x290] sm:$0xff]  ;;  %v1855_v16 = vld [vmem:[%s7160_s3 + $0x2a8] sm:$0xff] }
 0x208   :  { %2023 = vmatprep.subr.mxu1 %v7258_v4  ;;  %v1861_v43 = vld [vmem:[%s7160_s3 + $0x2d8] sm:$0xff]  ;;  %v1864_v39 = vld [vmem:[%s7160_s3 + $0x2f0] sm:$0xff]  ;;  %v1778_v26 = vld [vmem:[%s7160_s3 + $0x40] sm:$0xff] }
 0x209   :  { %2024 = vmatpush2.msra.mxu1 %v1751_v54  ;;  %v1837_v54 = vld [vmem:[%s7160_s3 + $0x218] sm:$0xff] }
 0x20a   :  { %2025 = vmatprep.subr.mxu1 %v7258_v4 }
 0x20b   :  { %2026 = vmatpush2.msra.mxu1 %v1750_v31  ;;  %v1849_v31 = vld [vmem:[%s7160_s3 + $0x278] sm:$0xff] }
 0x20c   :  { %2028 = vmatmul.mubr.f32.vlgmr.msra.gmra.mxu1 %v1770_v10  ;;  %4596 = vmatprep.subr.mxu1 %v1769_v48  ;;  %v1848_v10 = vld [vmem:[%s7160_s3 + $0x270] sm:$0xff] }
 0x20d   :  { %4597 = vmatpush3.msra.mxu1 %v1769_v48  ;;  %2032 = vmatprep.mubr.f32.mxu1 %v1774_v22  ;;  %v1858_v48 = vld [vmem:[%s7160_s3 + $0x2c0] sm:$0xff]  ;;  %v1857_v22 = vld [vmem:[%s7160_s3 + $0x2b8] sm:$0xff] }
 0x20e   :  { %4598 = vmatprep.subr.mxu1 %v1768_v56 }
 0x20f   :  { %4599 = vmatpush3.msra.mxu1 %v1768_v56  ;;  %v1860_v56 = vld [vmem:[%s7160_s3 + $0x2d0] sm:$0xff] }
 0x210   :  { %2033 = vmatmul.mubr.f32.gmra.mxu1 %v1773_v1  ;;  %4600 = vmatprep.subr.mxu1 %v1767_v33  ;;  %v1863_v1 = vld [vmem:[%s7160_s3 + $0x2e8] sm:$0xff] }
 0x211   :  { %4601 = vmatpush3.msra.mxu1 %v1767_v33  ;;  %2037 = vmatprep.mubr.f32.mxu1 %v1777_v8  ;;  %v1772_v33 = vld [vmem:[%s7160_s3 + $0x10] sm:$0xff]  ;;  %v1775_v8 = vld [vmem:[%s7160_s3 + $0x28] sm:$0xff] }
 0x212   :  { %4602 = vmatprep.subr.mxu1 %v1766_v42 }
 0x213   :  { %4603 = vmatpush3.msra.mxu1 %v1766_v42  ;;  %v1781_v42 = vld [vmem:[%s7160_s3 + $0x58] sm:$0xff] }
 0x214   :  { %2038 = vmatmul.mubr.f32.gmra.mxu1 %v1776_v23  ;;  %v1784_v23 = vld [vmem:[%s7160_s3 + $0x70] sm:$0xff] }
 0x215   :  { %2042 = vmatprep.mubr.f32.mxu1 %v1780_v30  ;;  %v1787_v30 = vld [vmem:[%s7160_s3 + $0x88] sm:$0xff] }
 0x218   :  { %2043 = vmatmul.mubr.f32.gmra.mxu1 %v1779_v47  ;;  %v1790_v47 = vld [vmem:[%s7160_s3 + $0xa0] sm:$0xff] }
 0x219   :  { %2047 = vmatprep.mubr.f32.mxu1 %v1783_v37  ;;  %v1793_v37 = vld [vmem:[%s7160_s3 + $0xb8] sm:$0xff] }
 0x21c   :  { %2048 = vmatmul.mubr.f32.gmra.mxu1 %v1782_v2  ;;  %v1796_v2 = vld [vmem:[%s7160_s3 + $0xd0] sm:$0xff] }
 0x21d   :  { %2052 = vmatprep.mubr.f32.mxu1 %v1786_v45  ;;  %v1799_v45 = vld [vmem:[%s7160_s3 + $0xe8] sm:$0xff] }
 0x220   :  { %2053 = vmatmul.mubr.f32.gmra.mxu1 %v1785_v52  ;;  %v1802_v52 = vld [vmem:[%s7160_s3 + $0x100] sm:$0xff] }
 0x221   :  { %2057 = vmatprep.mubr.f32.mxu1 %v1789_v38  ;;  %v1805_v38 = vld [vmem:[%s7160_s3 + $0x118] sm:$0xff] }
 0x224   :  { %2058 = vmatmul.mubr.f32.gmra.mxu1 %v1788_v28  ;;  %v1808_v28 = vld [vmem:[%s7160_s3 + $0x130] sm:$0xff] }
 0x225   :  { %2062 = vmatprep.mubr.f32.mxu1 %v1792_v41  ;;  %v1811_v41 = vld [vmem:[%s7160_s3 + $0x148] sm:$0xff] }
 0x228   :  { %2063 = vmatmul.mubr.f32.gmra.mxu1 %v1791_v50  ;;  %v1814_v50 = vld [vmem:[%s7160_s3 + $0x160] sm:$0xff] }
 0x229   :  { %2067 = vmatprep.mubr.f32.mxu1 %v1795_v40  ;;  %v1817_v40 = vld [vmem:[%s7160_s3 + $0x178] sm:$0xff] }
 0x22c   :  { %2068 = vmatmul.mubr.f32.gmra.mxu1 %v1794_v12  ;;  %v1820_v12 = vld [vmem:[%s7160_s3 + $0x190] sm:$0xff] }
 0x22d   :  { %2072 = vmatprep.mubr.f32.mxu1 %v1798_v29  ;;  %v1823_v29 = vld [vmem:[%s7160_s3 + $0x1a8] sm:$0xff] }
 0x230   :  { %2073 = vmatmul.mubr.f32.gmra.mxu1 %v1797_v5  ;;  %v1826_v5 = vld [vmem:[%s7160_s3 + $0x1c0] sm:$0xff] }
 0x231   :  { %2077 = vmatprep.mubr.f32.mxu1 %v1801_v15  ;;  %v1829_v15 = vld [vmem:[%s7160_s3 + $0x1d8] sm:$0xff] }
 0x234   :  { %2078 = vmatmul.mubr.f32.gmra.mxu1 %v1800_v63  ;;  %v1832_v63 = vld [vmem:[%s7160_s3 + $0x1f0] sm:$0xff] }
 0x235   :  { %2082 = vmatprep.mubr.f32.mxu1 %v1804_v3  ;;  %v1835_v3 = vld [vmem:[%s7160_s3 + $0x208] sm:$0xff] }
 0x238   :  { %2083 = vmatmul.mubr.f32.gmra.mxu1 %v1803_v17  ;;  %v1838_v17 = vld [vmem:[%s7160_s3 + $0x220] sm:$0xff] }
 0x239   :  { %2087 = vmatprep.mubr.f32.mxu1 %v1807_v49  ;;  %v1841_v49 = vld [vmem:[%s7160_s3 + $0x238] sm:$0xff] }
 0x23c   :  { %2088 = vmatmul.mubr.f32.gmra.mxu1 %v1806_v24  ;;  %v1844_v24 = vld [vmem:[%s7160_s3 + $0x250] sm:$0xff] }
 0x23d   :  { %2092 = vmatprep.mubr.f32.mxu1 %v1810_v0  ;;  %v1847_v0 = vld [vmem:[%s7160_s3 + $0x268] sm:$0xff] }
 0x240   :  { %2093 = vmatmul.mubr.f32.gmra.mxu1 %v1809_v58  ;;  %v1850_v58 = vld [vmem:[%s7160_s3 + $0x280] sm:$0xff] }
 0x241   :  { %2097 = vmatprep.mubr.f32.mxu1 %v1813_v59  ;;  %v1853_v59 = vld [vmem:[%s7160_s3 + $0x298] sm:$0xff] }
 0x244   :  { %2098 = vmatmul.mubr.f32.gmra.mxu1 %v1812_v57  ;;  %v1856_v57 = vld [vmem:[%s7160_s3 + $0x2b0] sm:$0xff] }
 0x245   :  { %2102 = vmatprep.mubr.f32.mxu1 %v1816_v60  ;;  %v1859_v60 = vld [vmem:[%s7160_s3 + $0x2c8] sm:$0xff] }
 0x248   :  { %2103 = vmatmul.mubr.f32.gmra.mxu1 %v1815_v61  ;;  %v1862_v61 = vld [vmem:[%s7160_s3 + $0x2e0] sm:$0xff] }
 0x249   :  { %2107 = vmatprep.mubr.f32.mxu1 %v1819_v7  ;;  %v1865_v7 = vld [vmem:[%s7160_s3 + $0x2f8] sm:$0xff] }
 0x24c   :  { %2108 = vmatmul.mubr.f32.gmra.mxu1 %v1818_v21 }
 0x24d   :  { %2112 = vmatprep.mubr.f32.mxu1 %v1822_v62 }
 0x250   :  { %2113 = vmatmul.mubr.f32.gmra.mxu1 %v1821_v32 }
 0x251   :  { %2117 = vmatprep.mubr.f32.mxu1 %v1825_v55 }
 0x254   :  { %2118 = vmatmul.mubr.f32.gmra.mxu1 %v1824_v53 }
 0x255   :  { %2122 = vmatprep.mubr.f32.mxu1 %v1828_v25 }
 0x258   :  { %2123 = vmatmul.mubr.f32.gmra.mxu1 %v1827_v20 }
 0x259   :  { %2127 = vmatprep.mubr.f32.mxu1 %v1831_v14 }
 0x25c   :  { %2128 = vmatmul.mubr.f32.gmra.mxu1 %v1830_v18 }
 0x25d   :  { %2132 = vmatprep.mubr.f32.mxu1 %v1834_v6 }
 0x260   :  { %2133 = vmatmul.mubr.f32.gmra.mxu1 %v1833_v19 }
 0x261   :  { %2137 = vmatprep.mubr.f32.mxu1 %v1837_v54 }
 0x264   :  { %2138 = vmatmul.mubr.f32.gmra.mxu1 %v1836_v36 }
 0x265   :  { %2142 = vmatprep.mubr.f32.mxu1 %v1840_v13 }
 0x268   :  { %2143 = vmatmul.mubr.f32.gmra.mxu1 %v1839_v9 }
 0x269   :  { %2147 = vmatprep.mubr.f32.mxu1 %v1843_v27 }
 0x26c   :  { %2148 = vmatmul.mubr.f32.gmra.mxu1 %v1842_v51 }
 0x26d   :  { %2152 = vmatprep.mubr.f32.mxu1 %v1846_v46 }
 0x270   :  { %2153 = vmatmul.mubr.f32.gmra.mxu1 %v1845_v11 }
 0x271   :  { %2157 = vmatprep.mubr.f32.mxu1 %v1849_v31 }
 0x274   :  { %2158 = vmatmul.mubr.f32.gmra.mxu1 %v1848_v10 }
 0x275   :  { %2162 = vmatprep.mubr.f32.mxu1 %v1852_v34 }
 0x278   :  { %2163 = vmatmul.mubr.f32.gmra.mxu1 %v1851_v44 }
 0x279   :  { %2167 = vmatprep.mubr.f32.mxu1 %v1855_v16 }
 0x27c   :  { %2168 = vmatmul.mubr.f32.gmra.mxu1 %v1854_v35 }
 0x27d   :  { %2172 = vmatprep.mubr.f32.mxu1 %v1858_v48 }
 0x280   :  { %2173 = vmatmul.mubr.f32.gmra.mxu1 %v1857_v22 }
 0x281   :  { %2177 = vmatprep.mubr.f32.mxu1 %v1861_v43 }
 0x284   :  { %2178 = vmatmul.mubr.f32.gmra.mxu1 %v1860_v56 }
 0x285   :  { %2182 = vmatprep.mubr.f32.mxu1 %v1864_v39 }
 0x288   :  { %2183 = vmatmul.mubr.f32.gmra.mxu1 %v1863_v1 }
 0x289   :  { %4604 = vmatprep.mubr.msk.f32.mxu1 %vm1866_vm1, %v1772_v33 }
 0x28c   :  { %4605 = vmatmul.mubr.msk.f32.vlgmr.msra.gmra.mxu1 %vm1866_vm1, %v1775_v8 }
 0x28d   :  { %4607 = vmatprep.mubr.msk.f32.mxu1 %vm1866_vm1, %v1778_v26 }
 0x290   :  { %4608 = vmatmul.mubr.msk.f32.gmra.mxu1 %vm1866_vm1, %v1781_v42 }
 0x291   :  { %4610 = vmatprep.mubr.msk.f32.mxu1 %vm1866_vm1, %v1784_v23 }
 0x294   :  { %4611 = vmatmul.mubr.msk.f32.gmra.mxu1 %vm1866_vm1, %v1787_v30 }
 0x295   :  { %4613 = vmatprep.mubr.msk.f32.mxu1 %vm1866_vm1, %v1790_v47 }
 0x298   :  { %4614 = vmatmul.mubr.msk.f32.gmra.mxu1 %vm1866_vm1, %v1793_v37 }
 0x299   :  { %4616 = vmatprep.mubr.msk.f32.mxu1 %vm1866_vm1, %v1796_v2 }
 0x29c   :  { %4617 = vmatmul.mubr.msk.f32.gmra.mxu1 %vm1866_vm1, %v1799_v45 }
 0x29d   :  { %4619 = vmatprep.mubr.msk.f32.mxu1 %vm1866_vm1, %v1802_v52 }
 0x2a0   :  { %4620 = vmatmul.mubr.msk.f32.gmra.mxu1 %vm1866_vm1, %v1805_v38 }
 0x2a1   :  { %4622 = vmatprep.mubr.msk.f32.mxu1 %vm1866_vm1, %v1808_v28 }
 0x2a4   :  { %4623 = vmatmul.mubr.msk.f32.gmra.mxu1 %vm1866_vm1, %v1811_v41  ;;  %v4766_v41 = vld [vmem:[%s7162_s5] sm:$0xff]  }
 0x2a5   :  { %4625 = vmatprep.mubr.msk.f32.mxu1 %vm1866_vm1, %v1814_v50 }
 0x2a8   :  { %4626 = vmatmul.mubr.msk.f32.gmra.mxu1 %vm1866_vm1, %v1817_v40 }
 0x2a9   :  { %4628 = vmatprep.mubr.msk.f32.mxu1 %vm1866_vm1, %v1820_v12 }
 0x2ac   :  { %4629 = vmatmul.mubr.msk.f32.gmra.mxu1 %vm1866_vm1, %v1823_v29 }
 0x2ad   :  { %4631 = vmatprep.mubr.msk.f32.mxu1 %vm1866_vm1, %v1826_v5 }
 0x2b0   :  { %4632 = vmatmul.mubr.msk.f32.gmra.mxu1 %vm1866_vm1, %v1829_v15 }
 0x2b1   :  { %4634 = vmatprep.mubr.msk.f32.mxu1 %vm1866_vm1, %v1832_v63 }
 0x2b4   :  { %4635 = vmatmul.mubr.msk.f32.gmra.mxu1 %vm1866_vm1, %v1835_v3 }
 0x2b5   :  { %4637 = vmatprep.mubr.msk.f32.mxu1 %vm1866_vm1, %v1838_v17 }
 0x2b8   :  { %4638 = vmatmul.mubr.msk.f32.gmra.mxu1 %vm1866_vm1, %v1841_v49 }
 0x2b9   :  { %4640 = vmatprep.mubr.msk.f32.mxu1 %vm1866_vm1, %v1844_v24 }
 0x2bc   :  { %4641 = vmatmul.mubr.msk.f32.gmra.mxu1 %vm1866_vm1, %v1847_v0 }
 0x2bd   :  { %4643 = vmatprep.mubr.msk.f32.mxu1 %vm1866_vm1, %v1850_v58 }
 0x2c0   :  { %4644 = vmatmul.mubr.msk.f32.gmra.mxu1 %vm1866_vm1, %v1853_v59 }
 0x2c1   :  { %4646 = vmatprep.mubr.msk.f32.mxu1 %vm1866_vm1, %v1856_v57 }
 0x2c4   :  { %4647 = vmatmul.mubr.msk.f32.gmra.mxu1 %vm1866_vm1, %v1859_v60 }
 0x2c5   :  { %4649 = vmatprep.mubr.msk.f32.mxu1 %vm1866_vm1, %v1862_v61 }
 0x2c8   :  { %4650 = vmatmul.mubr.msk.f32.gmra.mxu1 %vm1866_vm1, %v1865_v7 }
 0x2c9   :  { %4660 = vmatprep.mubr.msk.bf16.mxu1 %vm192_vm0, %v4766_v41 }
 0x2cc   :  { %v6629_v21 = vpop.f32.mrf.mxu1 }
 0x2ce   :  { %v2031_v62 = vpop.f32.mrf.mxu1 }
 0x2d0   :  { %v6631_v32 = vpop.f32.mrf.mxu1 }
 0x2d2   :  { %v2036_v55 = vpop.f32.mrf.mxu1 }
 0x2d4   :  { %v6633_v53 = vpop.f32.mrf.mxu1 }
 0x2d6   :  { %v2041_v25 = vpop.f32.mrf.mxu1 }
 0x2d8   :  { %v6635_v20 = vpop.f32.mrf.mxu1 }
 0x2d9   :  { %7342 = vst [vmem:[#allocation10_spill] sm:$0xff] %v6635_v20 }
 0x2da   :  { %v2046_v14 = vpop.f32.mrf.mxu1 }
 0x2dc   :  { %v6637_v18 = vpop.f32.mrf.mxu1 }
 0x2de   :  { %v2051_v6 = vpop.f32.mrf.mxu1 }
 0x2e0   :  { %v6639_v19 = vpop.f32.mrf.mxu1 }
 0x2e2   :  { %v2056_v54 = vpop.f32.mrf.mxu1 }
 0x2e4   :  { %v6641_v36 = vpop.f32.mrf.mxu1 }
 0x2e6   :  { %v2061_v13 = vpop.f32.mrf.mxu1 }
 0x2e8   :  { %v6643_v9 = vpop.f32.mrf.mxu1 }
 0x2ea   :  { %v2066_v27 = vpop.f32.mrf.mxu1 }
 0x2ec   :  { %v6645_v51 = vpop.f32.mrf.mxu1 }
 0x2ee   :  { %v2071_v46 = vpop.f32.mrf.mxu1 }
 0x2f0   :  { %v6647_v11 = vpop.f32.mrf.mxu1 }
 0x2f2   :  { %v2076_v31 = vpop.f32.mrf.mxu1 }
 0x2f4   :  { %v6649_v10 = vpop.f32.mrf.mxu1 }
 0x2f6   :  { %v2081_v34 = vpop.f32.mrf.mxu1 }
 0x2f8   :  { %v6651_v44 = vpop.f32.mrf.mxu1 }
 0x2f9   :  { %7343 = vst [vmem:[#allocation38_spill] sm:$0xff] %v6651_v44 }
 0x2fa   :  { %v2086_v16 = vpop.f32.mrf.mxu1 }
 0x2fc   :  { %v6653_v35 = vpop.f32.mrf.mxu1 }
 0x2fe   :  { %v2091_v48 = vpop.f32.mrf.mxu1 }
 0x300   :  { %v6655_v22 = vpop.f32.mrf.mxu1 }
 0x302   :  { %v2096_v43 = vpop.f32.mrf.mxu1 }
 0x304   :  { %v6657_v56 = vpop.f32.mrf.mxu1 }
 0x306   :  { %v2101_v39 = vpop.f32.mrf.mxu1 }
 0x308   :  { %v6659_v1 = vpop.f32.mrf.mxu1 }
 0x30a   :  { %v2106_v33 = vpop.f32.mrf.mxu1 }
 0x30c   :  { %v6661_v8 = vpop.f32.mrf.mxu1 }
 0x30e   :  { %v2111_v26 = vpop.f32.mrf.mxu1 }
 0x310   :  { %v6663_v42 = vpop.f32.mrf.mxu1 }
 0x312   :  { %v2116_v23 = vpop.f32.mrf.mxu1 }
 0x314   :  { %v6665_v30 = vpop.f32.mrf.mxu1 }
 0x316   :  { %v2121_v47 = vpop.f32.mrf.mxu1 }
 0x318   :  { %v6667_v37 = vpop.f32.mrf.mxu1 }
 0x319   :  { %7344 = vst [vmem:[#allocation9_spill] sm:$0xff] %v6667_v37 }
 0x31a   :  { %v2126_v2 = vpop.f32.mrf.mxu1 }
 0x31c   :  { %v6669_v45 = vpop.f32.mrf.mxu1 }
 0x31e   :  { %v2131_v52 = vpop.f32.mrf.mxu1 }
 0x320   :  { %v6671_v38 = vpop.f32.mrf.mxu1 }
 0x322   :  { %v2136_v28 = vpop.f32.mrf.mxu1 }
 0x323   :  { %v6699_v28 = vpop.permute.xlu0 %2477 }
 0x324   :  { %v6676_v50 = vpop.f32.mrf.mxu1  ;;  %7348 = vst [vmem:[#allocation36_spill] sm:$0xff] %v6699_v28 }
 0x326   :  { %v2141_v40 = vpop.f32.mrf.mxu1 }
 0x327   :  { %v6701_v40 = vpop.permute.xlu1 %2482 }
 0x328   :  { %v6679_v12 = vpop.f32.mrf.mxu1  ;;  %7349 = vst [vmem:[#allocation7_spill] sm:$0xff] %v6701_v40 }
 0x32a   :  { %v2146_v29 = vpop.f32.mrf.mxu1 }
 0x32c   :  { %v2149_v5 = vpop.f32.mrf.mxu1 }
 0x32e   :  { %v2151_v15 = vpop.f32.mrf.mxu1 }
 0x330   :  { %v2154_v63 = vpop.f32.mrf.mxu1 }
 0x332   :  { %v2156_v3 = vpop.f32.mrf.mxu1 }
 0x333   :  { %v6703_v3 = vpop.permute.xlu0 %2467 }
 0x334   :  { %v6681_v17 = vpop.f32.mrf.mxu1  ;;  %7350 = vst [vmem:[#allocation86_spill] sm:$0xff] %v6703_v3 }
 0x336   :  { %v2161_v49 = vpop.f32.mrf.mxu1 }
 0x337   :  { %v6710_v28 = vpop.permute.xlu0 %2457 }
 0x338   :  { %v6683_v24 = vpop.f32.mrf.mxu1 }
 0x33a   :  { %v2166_v0 = vpop.f32.mrf.mxu1 }
 0x33b   :  { %v6705_v0 = vpop.permute.xlu1 %2472 }
 0x33c   :  { %v6685_v58 = vpop.f32.mrf.mxu1  ;;  %7351 = vst [vmem:[#allocation62_spill] sm:$0xff] %v6705_v0 }
 0x33e   :  { %v2171_v59 = vpop.f32.mrf.mxu1 }
 0x340   :  { %v6687_v57 = vpop.f32.mrf.mxu1 }
 0x342   :  { %v2176_v60 = vpop.f32.mrf.mxu1 }
 0x344   :  { %v6689_v61 = vpop.f32.mrf.mxu1 }
 0x346   :  { %v2181_v7 = vpop.f32.mrf.mxu1 }
 0x348   :  { %v6691_v62 = vpop.f32.mrf.mxu1 }
 0x34a   :  { %v2186_v55 = vpop.f32.mrf.mxu1 }
 0x34c   :  { %v4606_v25 = vpop.f32.mrf.mxu1 }
 0x34d   :  { %v2260_v40 = vadd.f32 %v4606_v25, %v6631_v32 }
 0x34e   :  { %v2254_v14 = vpop.f32.mrf.mxu1 }
 0x34f   :  { %v2255_v3 = vadd.f32 %v2254_v14, %v6629_v21 }
 0x350   :  { %v6693_v6 = vpop.f32.mrf.mxu1 }
 0x351   :  { %7345 = vst [vmem:[#allocation85_spill] sm:$0xff] %v6693_v6 }
 0x352   :  { %v2264_v54 = vpop.f32.mrf.mxu1 }
 0x354   :  { %v4612_v13 = vpop.f32.mrf.mxu1 }
 0x356   :  { %v2274_v27 = vpop.f32.mrf.mxu1 }
 0x357   :  { %v2275_v21 = vadd.f32 %v2274_v27, %v6637_v18 }
 0x358   :  { %v4615_v46 = vpop.f32.mrf.mxu1 }
 0x35a   :  { %v2284_v31 = vpop.f32.mrf.mxu1 }
 0x35c   :  { %v4618_v34 = vpop.f32.mrf.mxu1 }
 0x35d   :  { %v2300_v60 = vadd.f32 %v4618_v34, %v6647_v11 }
 0x35e   :  { %v2294_v16 = vpop.f32.mrf.mxu1 }
 0x35f   :  { %v2295_v55 = vadd.f32 %v2294_v16, %v6645_v51  ;;  %v2414_v11 = vmax.f32 %v2260_v40, %v2300_v60 }
 0x360   :  { %v6695_v48 = vpop.f32.mrf.mxu1 }
 0x361   :  { %7346 = vst [vmem:[#allocation61_spill] sm:$0xff] %v6695_v48  ;;  %v2413_v44 = vmax.f32 %v2255_v3, %v2295_v55  ;;  %v7359_v55 = vld [vmem:[#allocation36_spill] sm:$0xff] }
 0x362   :  { %v2304_v43 = vpop.f32.mrf.mxu1 }
 0x364   :  { %v4624_v39 = vpop.f32.mrf.mxu1 }
 0x365   :  { %v2320_v18 = vadd.f32 %v4624_v39, %v6655_v22  ;;  %v7353_v39 = vld [vmem:[#allocation38_spill] sm:$0xff] }
 0x366   :  { %v2314_v33 = vpop.f32.mrf.mxu1 }
 0x368   :  { %v4627_v26 = vpop.f32.mrf.mxu1 }
 0x36a   :  { %v2324_v23 = vpop.f32.mrf.mxu1 }
 0x36c   :  { %v4630_v47 = vpop.f32.mrf.mxu1 }
 0x36d   :  { %v2340_v4 = vadd.f32 %v4630_v47, %v6663_v42  ;;  %v2448_v47 = vpop.permute.xlu0 %2447 }
 0x36e   :  { %v2334_v2 = vpop.f32.mrf.mxu1 }
 0x36f   :  { %v2335_v0 = vadd.f32 %v2334_v2, %v6661_v8  ;;  %v2290_v8 = vadd.f32 %v4615_v46, %v6643_v9  ;;  %v2325_v9 = vadd.f32 %v2324_v23, %v6657_v56  ;;  %v7355_v23 = vld [vmem:[#allocation9_spill] sm:$0xff] }
 0x370   :  { %v6697_v52 = vpop.f32.mrf.mxu1 }
 0x371   :  { %7347 = vst [vmem:[#allocation11_spill] sm:$0xff] %v6697_v52  ;;  %v6713_v52 = vpop.permute.xlu1 %2462 }
 0x372   :  { %v2344_v41 = vpop.f32.mrf.mxu1  ;;  %7352 = vst [vmem:[#allocation12_spill] sm:$0xff] %v6713_v52  ;;  %v2280_v52 = vadd.f32 %v4612_v13, %v6639_v19 }
 0x374   :  { %v4636_v29 = vpop.f32.mrf.mxu1 }
 0x375   :  { %v2453_v25 = vpop.permute.xlu1 %2452 }
 0x376   :  { %v2354_v15 = vpop.f32.mrf.mxu1 }
 0x378   :  { %v4639_v49 = vpop.f32.mrf.mxu1 }
 0x37a   :  { %v2364_v59 = vpop.f32.mrf.mxu1 }
 0x37c   :  { %v4642_v7 = vpop.f32.mrf.mxu1 }
 0x37d   :  { %v2380_v6 = vadd.f32 %v4642_v7, %v2154_v63  ;;  %v2265_v7 = vadd.f32 %v2264_v54, %v6633_v53  ;;  %v2355_v53 = vadd.f32 %v2354_v15, %v6669_v45  ;;  %v7358_v15 = vld [vmem:[#allocation85_spill] sm:$0xff] }
 0x37e   :  { %v2374_v20 = vpop.f32.mrf.mxu1 }
 0x37f   :  { %v2422_v37 = vmax.f32 %v2340_v4, %v2380_v6  ;;  %v2375_v48 = vadd.f32 %v2374_v20, %v2149_v5  ;;  %v2285_v20 = vadd.f32 %v2284_v31, %v6641_v36  ;;  %v2315_v5 = vadd.f32 %v2314_v33, %v6653_v35 }
 0x380   :  { %v4645_v34 = vpop.f32.mrf.mxu1  ;;  %v2305_v6 = vadd.f32 %v2304_v43, %v6649_v10  ;;  %v2360_v36 = vadd.f32 %v4636_v29, %v6671_v38 }
 0x381   :  { %v2421_v51 = vmax.f32 %v2335_v0, %v2375_v48  ;;  %v2430_v16 = vmax.f32 %v2414_v11, %v2422_v37  ;;  %v2330_v37 = vadd.f32 %v4627_v26, %v6659_v1  ;;  %v2370_v1 = vadd.f32 %v4639_v49, %v6679_v12  ;;  %v7354_v12 = vld [vmem:[#allocation61_spill] sm:$0xff] }
 0x382   :  { %v2384_v42 = vpop.f32.mrf.mxu1  ;;  %v2417_v45 = vmax.f32 %v2275_v21, %v2315_v5  ;;  %v2390_v56 = vadd.f32 %v4645_v34, %v6683_v24  ;;  %v2310_v33 = vadd.f32 %v7354_v12, %v7353_v39  ;;  %v2419_v26 = vmax.f32 %v2285_v20, %v2325_v9  ;;  %v4767_v20 = vld [vmem:[%s7162_s5 + $0x8] sm:$0xff]   ;;  %v4768_v5 = vld [vmem:[%s7162_s5 + $0x10] sm:$0xff]   ;;  %v4778_v9 = vld [vmem:[%s7162_s5 + $0x60] sm:$0xff]  }
 0x383   :  { %v2429_v63 = vmax.f32 %v2413_v44, %v2421_v51  ;;  %v2486_v44 = vadd.f32 %v2453_v25, %v2430_v16  ;;  %v2385_v27 = vadd.f32 %v2384_v42, %v6681_v17  ;;  %v2420_v31 = vmax.f32 %v2290_v8, %v2330_v37  ;;  %v7361_v51 = vld [vmem:[#allocation86_spill] sm:$0xff]  ;;  %v4770_v37 = vld [vmem:[%s7162_s5 + $0x20] sm:$0xff]  }
 0x384   :  { %v4648_v32 = vpop.f32.mrf.mxu1  ;;  %v2418_v17 = vmax.f32 %v2280_v52, %v2320_v18  ;;  %v2415_v24 = vmax.f32 %v2265_v7, %v2305_v6  ;;  %v7360_v52 = vld [vmem:[#allocation7_spill] sm:$0xff]  ;;  %v7363_v7 = vld [vmem:[#allocation12_spill] sm:$0xff] }
 0x385   :  { %v2485_v4 = vadd.f32 %v2448_v47, %v2429_v63  ;;  %v2400_v54 = vadd.f32 %v4648_v32, %v6687_v57  ;;  %v2345_v57 = vadd.f32 %v2344_v41, %v6665_v30  ;;  %v7362_v47 = vld [vmem:[#allocation62_spill] sm:$0xff]  ;;  %v4773_v6 = vld [vmem:[%s7162_s5 + $0x38] sm:$0xff]  }
 0x386   :  { %v2394_v14 = vpop.f32.mrf.mxu1  ;;  %v4777_v18 = vld [vmem:[%s7162_s5 + $0x58] sm:$0xff]  }
 0x387   :  { %v2395_v19 = vadd.f32 %v2394_v14, %v6685_v58  ;;  %v2541_v35 = vpack.c.bf16 %v2486_v44, %v2485_v4  ;;  %v2365_v58 = vadd.f32 %v2364_v59, %v6676_v50  ;;  %v2426_v48 = vmax.f32 %v2360_v36, %v2400_v54  ;;  %v7357_v50 = vld [vmem:[#allocation10_spill] sm:$0xff]  ;;  %v4771_v14 = vld [vmem:[%s7162_s5 + $0x28] sm:$0xff]  }
 0x388   :  { %v4651_v13 = vpop.f32.mrf.mxu1  ;;  %v2423_v40 = vmax.f32 %v2345_v57, %v2385_v27  ;;  %v2270_v3 = vadd.f32 %v7358_v15, %v7357_v50  ;;  %v4772_v44 = vld [vmem:[%s7162_s5 + $0x30] sm:$0xff]   ;;  %v4775_v54 = vld [vmem:[%s7162_s5 + $0x48] sm:$0xff]  }
 0x389   :  { %v2425_v46 = vmax.f32 %v2355_v53, %v2395_v19  ;;  %v2410_v10 = vadd.f32 %v4651_v13, %v6691_v62  ;;  %v7356_v62 = vld [vmem:[#allocation11_spill] sm:$0xff]  ;;  %v2434_v0 = vmax.f32 %v2418_v17, %v2426_v48  ;;  %v4774_v53 = vld [vmem:[%s7162_s5 + $0x40] sm:$0xff]   ;;  %v4776_v19 = vld [vmem:[%s7162_s5 + $0x50] sm:$0xff]  }
 0x38a   :  { %v2404_v22 = vpop.f32.mrf.mxu1  ;;  %v2350_v2 = vadd.f32 %v7356_v62, %v7355_v23  ;;  %v2431_v60 = vmax.f32 %v2415_v24, %v2423_v40  ;;  %v4779_v36 = vld [vmem:[%s7162_s5 + $0x68] sm:$0xff]   ;;  %v4780_v13 = vld [vmem:[%s7162_s5 + $0x70] sm:$0xff]  }
 0x38b   :  { %v2428_v38 = vmax.f32 %v2370_v1, %v2410_v10  ;;  %v2405_v43 = vadd.f32 %v2404_v22, %v6689_v61  ;;  %v2433_v29 = vmax.f32 %v2417_v45, %v2425_v46  ;;  %v2416_v61 = vmax.f32 %v2270_v3, %v2310_v33  ;;  %v4782_v1 = vld [vmem:[%s7162_s5 + $0x80] sm:$0xff]   ;;  %v4783_v27 = vld [vmem:[%s7162_s5 + $0x88] sm:$0xff]   ;;  %v4784_v46 = vld [vmem:[%s7162_s5 + $0x90] sm:$0xff]   ;;  %v6842_v22 = vpop.permute.xlu0 %2745 }
 0x38c   :  { %v2424_v49 = vmax.f32 %v2350_v2, %v2390_v56  ;;  %v2490_v32 = vadd.f32 %v7362_v47, %v2434_v0  ;;  %v2487_v21 = vadd.f32 %v6710_v28, %v2431_v60  ;;  %v4769_v28 = vld [vmem:[%s7162_s5 + $0x18] sm:$0xff]   ;;  %v4786_v45 = vld [vmem:[%s7162_s5 + $0xa0] sm:$0xff]   ;;  %v4788_v57 = vld [vmem:[%s7162_s5 + $0xb0] sm:$0xff]   ;;  %v6844_v56 = vpop.permute.xlu1 %2750 }
 0x38d   :  { %v2436_v30 = vmax.f32 %v2420_v31, %v2428_v38  ;;  %v2427_v41 = vmax.f32 %v2365_v58, %v2405_v43  ;;  %v2489_v16 = vadd.f32 %v7361_v51, %v2433_v29  ;;  %v4785_v10 = vld [vmem:[%s7162_s5 + $0x98] sm:$0xff]   ;;  %v4787_v31 = vld [vmem:[%s7162_s5 + $0xa8] sm:$0xff]   ;;  %v4792_v15 = vld [vmem:[%s7164_s7 + $0x4] ss:$12 sps:$4 sm:$0xff]  }
 0x38e   :  { %v2432_v42 = vmax.f32 %v2416_v61, %v2424_v49  ;;  %v4789_v58 = vld [vmem:[%s7162_s5 + $0xb8] sm:$0xff]   ;;  %3562 = vmatprep.mubr.bf16.mxu0 %v4792_v15 }
 0x38f   :  { %v2435_v59 = vmax.f32 %v2419_v26, %v2427_v41  ;;  %v2492_v34 = vadd.f32 %v7360_v52, %v2436_v30  ;;  %v2543_v25 = vpack.c.bf16 %v2490_v32, %v2489_v16  ;;  %v6846_v48 = vpop.permute.xlu0 %2665 }
 0x390   :  { %v2488_v8 = vadd.f32 %v7363_v7, %v2432_v42  ;;  %v6848_v38 = vpop.permute.xlu1 %2670 }
 0x391   :  { %v2491_v11 = vadd.f32 %v7359_v55, %v2435_v59 }
 0x392   :  { %v2542_v4 = vpack.c.bf16 %v2488_v8, %v2487_v21 }
 0x393   :  { %v2544_v63 = vpack.c.bf16 %v2492_v34, %v2491_v11  ;;  %v6850_v43 = vpop.permute.xlu0 %2735  ;;  %v4805_v34 = vld [vmem:[%s7164_s7 + $0x8] ss:$12 sps:$4 sm:$0xff]  }
 0x394   :  { %v6852_v39 = vpop.permute.xlu1 %2740 }
 0x395   :  { %4652 = vmatprep.subr.bf16.mxu1 %v2544_v63 }
 0x396   :  { %4653 = vmatpush3.bf16.msra.mxu1 %v2544_v63 }
 0x397   :  { %4654 = vmatprep.subr.bf16.mxu1 %v2543_v25  ;;  %v6854_v12 = vpop.permute.xlu0 %2655 }
 0x398   :  { %v6856_v33 = vpop.permute.xlu1 %2660 }
 0x39a   :  { %4655 = vmatpush3.bf16.msra.mxu1 %v2543_v25 }
 0x39b   :  { %4656 = vmatprep.subr.bf16.mxu1 %v2542_v4  ;;  %v6858_v17 = vpop.permute.xlu0 %2725 }
 0x39c   :  { %v6860_v26 = vpop.permute.xlu1 %2730 }
 0x39e   :  { %4657 = vmatpush3.bf16.msra.mxu1 %v2542_v4 }
 0x39f   :  { %4658 = vmatprep.subr.bf16.mxu1 %v2541_v35  ;;  %v6862_v23 = vpop.permute.xlu0 %2645 }
 0x3a0   :  { %v6864_v62 = vpop.permute.xlu1 %2650 }
 0x3a2   :  { %4659 = vmatpush3.bf16.msra.mxu1 %v2541_v35  ;;  %v4781_v35 = vld [vmem:[%s7162_s5 + $0x78] sm:$0xff]  }
 0x3a3   :  { %v6866_v2 = vpop.permute.xlu0 %2715 }
 0x3a4   :  { %v6868_v40 = vpop.permute.xlu1 %2720 }
 0x3a5   :  { %4661 = vmatmul.mubr.msk.bf16.vlgmr.msra.gmra.mxu1 %vm192_vm0, %v4767_v20 }
 0x3a6   :  { %4664 = vmatprep.mubr.msk.bf16.mxu1 %vm192_vm0, %v4768_v5 }
 0x3a7   :  { %v6870_v29 = vpop.permute.xlu0 %2635 }
 0x3a8   :  { %v6872_v30 = vpop.permute.xlu1 %2640 }
 0x3ab   :  { %v6874_v41 = vpop.permute.xlu0 %2705 }
 0x3ac   :  { %v6876_v50 = vpop.permute.xlu1 %2710 }
 0x3ad   :  { %4665 = vmatmul.mubr.msk.bf16.gmra.mxu1 %vm192_vm0, %v4769_v28 }
 0x3ae   :  { %4668 = vmatprep.mubr.msk.bf16.mxu1 %vm192_vm0, %v4770_v37 }
 0x3af   :  { %v2626_v3 = vpop.permute.xlu0 %2625 }
 0x3b0   :  { %v2631_v24 = vpop.permute.xlu1 %2630 }
 0x3b3   :  { %v6881_v49 = vpop.permute.xlu0 %2695 }
 0x3b4   :  { %v6883_v0 = vpop.permute.xlu1 %2700 }
 0x3b5   :  { %4669 = vmatmul.mubr.msk.bf16.gmra.mxu1 %vm192_vm0, %v4771_v14 }
 0x3b6   :  { %4672 = vmatprep.mubr.msk.bf16.mxu1 %vm192_vm0, %v4772_v44 }
 0x3b7   :  { %v2616_v59 = vpop.permute.xlu0 %2615 }
 0x3b8   :  { %v2621_v61 = vpop.permute.xlu1 %2620 }
 0x3bb   :  { %v6885_v60 = vpop.permute.xlu0 %2685 }
 0x3bc   :  { %v6887_v55 = vpop.permute.xlu1 %2690 }
 0x3bd   :  { %4673 = vmatmul.mubr.msk.bf16.gmra.mxu1 %vm192_vm0, %v4773_v6 }
 0x3be   :  { %4676 = vmatprep.mubr.msk.bf16.mxu1 %vm192_vm0, %v4774_v53 }
 0x3bf   :  { %v2606_v11 = vpop.permute.xlu0 %2605 }
 0x3c0   :  { %v2611_v52 = vpop.permute.xlu1 %2610 }
 0x3c3   :  { %v6892_v51 = vpop.permute.xlu0 %2675 }
 0x3c4   :  { %v6894_v16 = vpop.permute.xlu1 %2680 }
 0x3c5   :  { %4677 = vmatmul.mubr.msk.bf16.gmra.mxu1 %vm192_vm0, %v4775_v54 }
 0x3c6   :  { %4680 = vmatprep.mubr.msk.bf16.mxu1 %vm192_vm0, %v4776_v19 }
 0x3c7   :  { %v2596_v32 = vpop.permute.xlu0 %2595 }
 0x3c8   :  { %v2601_v7 = vpop.permute.xlu1 %2600 }
 0x3cd   :  { %4681 = vmatmul.mubr.msk.bf16.gmra.mxu1 %vm192_vm0, %v4777_v18 }
 0x3ce   :  { %4684 = vmatprep.mubr.msk.bf16.mxu1 %vm192_vm0, %v4778_v9 }
 0x3d5   :  { %4685 = vmatmul.mubr.msk.bf16.gmra.mxu1 %vm192_vm0, %v4779_v36 }
 0x3d6   :  { %4688 = vmatprep.mubr.msk.bf16.mxu1 %vm192_vm0, %v4780_v13 }
 0x3dd   :  { %4689 = vmatmul.mubr.msk.bf16.gmra.mxu1 %vm192_vm0, %v4781_v35 }
 0x3de   :  { %4692 = vmatprep.mubr.msk.bf16.mxu1 %vm192_vm0, %v4782_v1 }
 0x3e5   :  { %4693 = vmatmul.mubr.msk.bf16.gmra.mxu1 %vm192_vm0, %v4783_v27 }
 0x3e6   :  { %4696 = vmatprep.mubr.msk.bf16.mxu1 %vm192_vm0, %v4784_v46 }
 0x3ed   :  { %4697 = vmatmul.mubr.msk.bf16.gmra.mxu1 %vm192_vm0, %v4785_v10 }
 0x3ee   :  { %4700 = vmatprep.mubr.msk.bf16.mxu1 %vm192_vm0, %v4786_v45 }
 0x3f5   :  { %4701 = vmatmul.mubr.msk.bf16.gmra.mxu1 %vm192_vm0, %v4787_v31 }
 0x3f6   :  { %4704 = vmatprep.mubr.msk.bf16.mxu1 %vm192_vm0, %v4788_v57 }
 0x3fd   :  { %4705 = vmatmul.mubr.msk.bf16.gmra.mxu1 %vm192_vm0, %v4789_v58 }
 0x3fe   :  { %4724 = vmatprep.mubr.bf16.mxu1 %v4805_v34 }
 0x465   :  { %v4662_v42 = vpop.f32.mrf.mxu1 }
 0x466   :  { %v6896_v25 = vadd.f32 %v4662_v42, %v2606_v11 }
 0x467   :  { %v3059_v63 = vpop.f32.mrf.mxu1 }
 0x468   :  { %v6900_v4 = vadd.f32 %v3059_v63, %v2596_v32 }
 0x469   :  { %v4663_v47 = vpop.f32.mrf.mxu1 }
 0x46a   :  { %v6898_v21 = vadd.f32 %v4663_v47, %v2611_v52  ;;  %7364 = vst [vmem:[#allocation37_spill] sm:$0xff] %v6900_v4 }
 0x46b   :  { %v3062_v8 = vpop.f32.mrf.mxu1 }
 0x46c   :  { %v6904_v5 = vadd.f32 %v3062_v8, %v2601_v7 }
 0x46d   :  { %v4666_v28 = vpop.f32.mrf.mxu1 }
 0x46e   :  { %7365 = vst [vmem:[#allocation8_spill] sm:$0xff] %v6904_v5  ;;  %v6908_v6 = vadd.f32 %v4666_v28, %v2626_v3 }
 0x46f   :  { %v3075_v14 = vpop.f32.mrf.mxu1 }
 0x470   :  { %v6912_v19 = vadd.f32 %v3075_v14, %v2616_v59 }
 0x471   :  { %v4667_v44 = vpop.f32.mrf.mxu1 }
 0x472   :  { %v6910_v53 = vadd.f32 %v4667_v44, %v2631_v24 }
 0x473   :  { %v3078_v54 = vpop.f32.mrf.mxu1 }
 0x474   :  { %v6916_v9 = vadd.f32 %v3078_v54, %v2621_v61 }
 0x475   :  { %v4670_v36 = vpop.f32.mrf.mxu1 }
 0x477   :  { %v3091_v35 = vpop.f32.mrf.mxu1 }
 0x479   :  { %v4671_v1 = vpop.f32.mrf.mxu1 }
 0x47b   :  { %v3094_v27 = vpop.f32.mrf.mxu1 }
 0x47d   :  { %v4674_v46 = vpop.f32.mrf.mxu1 }
 0x47e   :  { %v3116_v44 = vadd.f32 %v4674_v46, %v6846_v48 }
 0x47f   :  { %v3107_v10 = vpop.f32.mrf.mxu1 }
 0x481   :  { %v4675_v45 = vpop.f32.mrf.mxu1 }
 0x482   :  { %v3119_v7 = vadd.f32 %v4675_v45, %v6848_v38 }
 0x483   :  { %v3110_v31 = vpop.f32.mrf.mxu1 }
 0x484   :  { %v3289_v18 = vpack.c.bf16 %v3119_v7, %v3116_v44  ;;  %v3111_v4 = vadd.f32 %v3110_v31, %v6856_v33 }
 0x485   :  { %v6920_v57 = vpop.f32.mrf.mxu1 }
 0x487   :  { %v6922_v58 = vpop.f32.mrf.mxu1 }
 0x489   :  { %v6924_v15 = vpop.f32.mrf.mxu1 }
 0x48b   :  { %v6926_v3 = vpop.f32.mrf.mxu1 }
 0x48d   :  { %v4682_v24 = vpop.f32.mrf.mxu1 }
 0x48f   :  { %v3139_v59 = vpop.f32.mrf.mxu1 }
 0x491   :  { %v4683_v61 = vpop.f32.mrf.mxu1 }
 0x493   :  { %v3142_v11 = vpop.f32.mrf.mxu1 }
 0x495   :  { %v4686_v52 = vpop.f32.mrf.mxu1 }
 0x496   :  { %v3164_v48 = vadd.f32 %v4686_v52, %v6858_v17  ;;  %v3095_v17 = vadd.f32 %v3094_v27, %v6872_v30  ;;  %v3143_v30 = vadd.f32 %v3142_v11, %v6883_v0  ;;  %v3132_v0 = vadd.f32 %v6920_v57, %v6885_v60 }
 0x497   :  { %v3155_v34 = vpop.f32.mrf.mxu1  ;;  %v7368_v57 = vpack.c.bf16 %v6898_v21, %v6896_v25  ;;  %v4795_v25 = vld [vmem:[%s7164_s7 + $0x1c] ss:$12 sps:$4 sm:$0xff]  }
 0x499   :  { %v4687_v42 = vpop.f32.mrf.mxu1 }
 0x49a   :  { %v3167_v38 = vadd.f32 %v4687_v42, %v6860_v26  ;;  %v3100_v26 = vadd.f32 %v4670_v36, %v6862_v23  ;;  %v3148_v23 = vadd.f32 %v4682_v24, %v6874_v41  ;;  %v2826_v36 = vpop.permute.xlu0 %2825  ;;  %v7366_v42 = vpack.c.bf16 %v6910_v53, %v6908_v6 }
 0x49b   :  { %v3158_v63 = vpop.f32.mrf.mxu1 }
 0x49c   :  { %v3295_v33 = vpack.c.bf16 %v3167_v38, %v3164_v48  ;;  %v3159_v31 = vadd.f32 %v3158_v63, %v6868_v40  ;;  %v7372_v38 = vmov 0.0  }
 0x49d   :  { %v4690_v47 = vpop.f32.mrf.mxu1 }
 0x49e   :  { %v3180_v28 = vadd.f32 %v4690_v47, %v6842_v22  ;;  %v3108_v22 = vadd.f32 %v3107_v10, %v6854_v12  ;;  %v3156_v12 = vadd.f32 %v3155_v34, %v6866_v2  ;;  %v2816_v41 = vpop.permute.xlu0 %2815 }
 0x49f   :  { %v3171_v32 = vpop.f32.mrf.mxu1 }
 0x4a0   :  { %v3172_v37 = vadd.f32 %v3171_v32, %v6850_v43  ;;  %v3103_v43 = vadd.f32 %v4671_v1, %v6864_v62  ;;  %v3151_v62 = vadd.f32 %v4683_v61, %v6876_v50  ;;  %v3092_v1 = vadd.f32 %v3091_v35, %v6870_v29 }
 0x4a1   :  { %v4691_v8 = vpop.f32.mrf.mxu1  ;;  %v3140_v50 = vadd.f32 %v3139_v59, %v6881_v49  ;;  %v3135_v35 = vadd.f32 %v6924_v15, %v6887_v55  ;;  %v3127_v49 = vadd.f32 %v6926_v3, %v6894_v16  ;;  %v7367_v55 = vpack.c.bf16 %v6916_v9, %v6912_v19  ;;  %v4790_v19 = vld [vmem:[%s7164_s7] ss:$12 sps:$4 sm:$0xff]  }
 0x4a2   :  { %v3183_v14 = vadd.f32 %v4691_v8, %v6844_v56  ;;  %v3286_v2 = vpack.c.bf16 %v3095_v17, %v3092_v1  ;;  %v3293_v52 = vpack.c.bf16 %v3151_v62, %v3148_v23  ;;  %v3124_v15 = vadd.f32 %v6922_v58, %v6892_v51  ;;  %v2806_v6 = vpop.permute.xlu0 %2805  ;;  %v7369_v58 = vld [vmem:[#allocation8_spill] sm:$0xff] }
 0x4a3   :  { %v3174_v54 = vpop.f32.mrf.mxu1  ;;  %v3292_v34 = vpack.c.bf16 %v3143_v30, %v3140_v50  ;;  %v3291_v63 = vpack.c.bf16 %v3135_v35, %v3132_v0  ;;  %v4809_v0 = vld [vmem:[%s7164_s7 + $0x7c] ss:$12 sps:$4 sm:$0xff]  }
 0x4a4   :  { %v3297_v20 = vpack.c.bf16 %v3183_v14, %v3180_v28  ;;  %v3175_v13 = vadd.f32 %v3174_v54, %v6852_v39  ;;  %v3288_v39 = vpack.c.bf16 %v3111_v4, %v3108_v22  ;;  %v3294_v4 = vpack.c.bf16 %v3159_v31, %v3156_v12  ;;  %v7370_v28 = vld [vmem:[#allocation37_spill] sm:$0xff]  ;;  %v4798_v12 = vld [vmem:[%s7164_s7 + $0x34] ss:$12 sps:$4 sm:$0xff]  }
 0x4a5   :  { %v6935_v5 = vpop.f32.mrf.mxu1  ;;  %v3290_v32 = vpack.c.bf16 %v3127_v49, %v3124_v15  ;;  %v7371_v14 = vpack.c.bf16 %v7369_v58, %v7370_v28  ;;  %v4814_v49 = vld [vmem:[%s7164_s7 + $0x94] ss:$12 sps:$4 sm:$0xff]   ;;  %v4819_v15 = vld [vmem:[%s7164_s7 + $0xac] ss:$12 sps:$4 sm:$0xff]  }
 0x4a6   :  { %v3296_v45 = vpack.c.bf16 %v3175_v13, %v3172_v37  ;;  %4275 = vmatprep.subr.bf16.mxu0 %v3297_v20  ;;  %v3287_v20 = vpack.c.bf16 %v3103_v43, %v3100_v26  ;;  %v2831_v13 = vpop.permute.xlu1 %2830  ;;  %v2796_v9 = vpop.permute.xlu0 %2795  ;;  %v4793_v26 = vld [vmem:[%s7164_s7 + $0x18] ss:$12 sps:$4 sm:$0xff]  }
 0x4a7   :  { %v6939_v56 = vpop.f32.mrf.mxu1  ;;  %4276 = vmatpush3.bf16.msra.mxu0 %v3289_v18 }
 0x4a8   :  { %4277 = vmatprep.subr.bf16.mxu0 %v3296_v45 }
 0x4a9   :  { %v6943_v46 = vpop.f32.mrf.mxu1 }
 0x4aa   :  { %v2821_v61 = vpop.permute.xlu1 %2820 }
 0x4ab   :  { %v6947_v37 = vpop.f32.mrf.mxu1  ;;  %4278 = vmatpush3.bf16.msra.mxu0 %v3288_v39  ;;  %v2786_v39 = vpop.permute.xlu0 %2785 }
 0x4ac   :  { %4279 = vmatprep.subr.bf16.mxu0 %v3295_v33 }
 0x4ad   :  { %v6951_v18 = vpop.f32.mrf.mxu1 }
 0x4ae   :  { %v2811_v59 = vpop.permute.xlu1 %2810  ;;  %v3212_v1 = vadd.f32 %v6951_v18, %v2786_v39 }
 0x4af   :  { %v6955_v40 = vpop.f32.mrf.mxu1  ;;  %4280 = vmatpush3.bf16.msra.mxu0 %v3287_v20 }
 0x4b0   :  { %4281 = vmatprep.subr.bf16.mxu0 %v3294_v4 }
 0x4b1   :  { %v4699_v10 = vpop.f32.mrf.mxu1 }
 0x4b2   :  { %v2801_v16 = vpop.permute.xlu1 %2800 }
 0x4b3   :  { %v6959_v27 = vpop.f32.mrf.mxu1  ;;  %4282 = vmatpush3.bf16.msra.mxu0 %v3286_v2  ;;  %v4796_v2 = vld [vmem:[%s7164_s7 + $0x30] ss:$12 sps:$4 sm:$0xff]  }
 0x4b4   :  { %4283 = vmatprep.subr.bf16.mxu0 %v3293_v52 }
 0x4b5   :  { %v4702_v29 = vpop.f32.mrf.mxu1 }
 0x4b6   :  { %v2791_v48 = vpop.permute.xlu1 %2790  ;;  %v3228_v43 = vadd.f32 %v4702_v29, %v2806_v6  ;;  %v4820_v6 = vld [vmem:[%s7164_s7 + $0x98] ss:$12 sps:$4 sm:$0xff]  }
 0x4b7   :  { %v3219_v24 = vpop.f32.mrf.mxu1  ;;  %4284 = vmatpush3.bf16.msra.mxu0 %v7366_v42  ;;  %v3215_v62 = vadd.f32 %v4699_v10, %v2791_v48  ;;  %v4801_v10 = vld [vmem:[%s7164_s7 + $0x4c] ss:$12 sps:$4 sm:$0xff]  }
 0x4b8   :  { %4285 = vmatprep.subr.bf16.mxu0 %v3292_v34  ;;  %v3220_v20 = vadd.f32 %v3219_v24, %v2796_v9 }
 0x4b9   :  { %v4703_v11 = vpop.f32.mrf.mxu1  ;;  %v3301_v23 = vpack.c.bf16 %v3215_v62, %v3212_v1 }
 0x4ba   :  { %v3231_v45 = vadd.f32 %v4703_v11, %v2811_v59  ;;  %v2781_v17 = vpop.permute.xlu1 %2780  ;;  %v4807_v11 = vld [vmem:[%s7164_s7 + $0x78] ss:$12 sps:$4 sm:$0xff]   ;;  %v4815_v59 = vld [vmem:[%s7164_s7 + $0x68] ss:$12 sps:$4 sm:$0xff]  }
 0x4bb   :  { %v3222_v47 = vpop.f32.mrf.mxu1  ;;  %4286 = vmatpush3.bf16.msra.mxu0 %v7367_v55  ;;  %v4816_v55 = vld [vmem:[%s7164_s7 + $0x80] ss:$12 sps:$4 sm:$0xff]  }
 0x4bc   :  { %4287 = vmatprep.subr.bf16.mxu0 %v3291_v63  ;;  %v3303_v33 = vpack.c.bf16 %v3231_v45, %v3228_v43  ;;  %v3223_v31 = vadd.f32 %v3222_v47, %v2801_v16  ;;  %v4811_v63 = vld [vmem:[%s7164_s7 + $0x50] ss:$12 sps:$4 sm:$0xff]  }
 0x4bd   :  { %v4706_v53 = vpop.f32.mrf.mxu1  ;;  %v4812_v47 = vld [vmem:[%s7164_s7 + $0x90] ss:$12 sps:$4 sm:$0xff]  }
 0x4be   :  { %v3244_v7 = vadd.f32 %v4706_v53, %v2826_v36  ;;  %v3302_v4 = vpack.c.bf16 %v3223_v31, %v3220_v20  ;;  %v3207_v36 = vadd.f32 %v6959_v27, %v2781_v17  ;;  %v2771_v52 = vpop.permute.xlu1 %2770  ;;  %v4817_v53 = vld [vmem:[%s7164_s7 + $0xa8] ss:$12 sps:$4 sm:$0xff]  }
 0x4bf   :  { %v3235_v60 = vpop.f32.mrf.mxu1  ;;  %4288 = vmatpush3.bf16.msra.mxu0 %v7368_v57  ;;  %v3199_v18 = vadd.f32 %v6943_v46, %v2771_v52  ;;  %v4804_v46 = vld [vmem:[%s7164_s7 + $0x64] ss:$12 sps:$4 sm:$0xff]  }
 0x4c0   :  { %4289 = vmatprep.subr.bf16.mxu0 %v3290_v32  ;;  %v3236_v21 = vadd.f32 %v3235_v60, %v2816_v41  ;;  %v4799_v41 = vld [vmem:[%s7164_s7 + $0x48] ss:$12 sps:$4 sm:$0xff]   ;;  %v4821_v32 = vld [vmem:[%s7164_s7 + $0xb0] ss:$12 sps:$4 sm:$0xff]  }
 0x4c1   :  { %v4707_v3 = vpop.f32.mrf.mxu1 }
 0x4c2   :  { %v3247_v8 = vadd.f32 %v4707_v3, %v2831_v13  ;;  %v2776_v13 = vpop.permute.xlu0 %2775  ;;  %v2761_v29 = vpop.permute.xlu1 %2760 }
 0x4c3   :  { %v3238_v51 = vpop.f32.mrf.mxu1  ;;  %4290 = vmatpush3.bf16.msra.mxu0 %v7371_v14  ;;  %v3204_v30 = vadd.f32 %v6955_v40, %v2776_v13  ;;  %v3191_v34 = vadd.f32 %v6947_v37, %v2761_v29  ;;  %v4806_v37 = vld [vmem:[%s7164_s7 + $0x20] ss:$12 sps:$4 sm:$0xff]  }
 0x4c4   :  { %v3305_v44 = vpack.c.bf16 %v3247_v8, %v3244_v7  ;;  %v3239_v54 = vadd.f32 %v3238_v51, %v2821_v61  ;;  %4740 = vmatprep.subr.bf16.mxu0 %v7372_v38 }
 0x4c5   :  { %v3300_v61 = vpack.c.bf16 %v3207_v36, %v3204_v30 }
 0x4c6   :  { %v3304_v22 = vpack.c.bf16 %v3239_v54, %v3236_v21  ;;  %3563 = vmatmul.mubr.bf16.vlgmr.msra.gmra.mxu0 %v4790_v19  ;;  %4708 = vmatprep.subr.bf16.mxu1 %v3305_v44  ;;  %v2766_v50 = vpop.permute.xlu0 %2765  ;;  %v7059_v57 = vpop.permute.xlu1 %3399 }
 0x4c7   :  { %4709 = vmatpush3.bf16.msra.mxu1 %v3305_v44  ;;  %3570 = vmatprep.mubr.bf16.mxu0 %v4795_v25  ;;  %v3196_v27 = vadd.f32 %v6935_v5, %v2766_v50  ;;  %v4802_v5 = vld [vmem:[%s7164_s7 + $0x60] ss:$12 sps:$4 sm:$0xff]  }
 0x4c8   :  { %4710 = vmatprep.subr.bf16.mxu1 %v3304_v22 }
 0x4c9   :  { %v3299_v35 = vpack.c.bf16 %v3199_v18, %v3196_v27 }
 0x4ca   :  { %v2756_v40 = vpop.permute.xlu0 %2755  ;;  %v7063_v3 = vpop.permute.xlu1 %3389 }
 0x4cb   :  { %4711 = vmatpush3.bf16.msra.mxu1 %v3304_v22  ;;  %v3188_v24 = vadd.f32 %v6939_v56, %v2756_v40  ;;  %v4810_v56 = vld [vmem:[%s7164_s7 + $0x38] ss:$12 sps:$4 sm:$0xff]  }
 0x4cc   :  { %4712 = vmatprep.subr.bf16.mxu1 %v3303_v33 }
 0x4cd   :  { %v3298_v42 = vpack.c.bf16 %v3191_v34, %v3188_v24 }
 0x4ce   :  { %3571 = vmatmul.mubr.bf16.gmra.mxu0 %v4793_v26  ;;  %v7057_v60 = vpop.permute.xlu0 %3394  ;;  %v7067_v58 = vpop.permute.xlu1 %3379 }
 0x4cf   :  { %4713 = vmatpush3.bf16.msra.mxu1 %v3303_v33  ;;  %3578 = vmatprep.mubr.bf16.mxu0 %v4798_v12 }
 0x4d0   :  { %4714 = vmatprep.subr.bf16.mxu1 %v3302_v4 }
 0x4d2   :  { %v7061_v16 = vpop.permute.xlu0 %3384  ;;  %v7071_v54 = vpop.permute.xlu1 %3369 }
 0x4d3   :  { %4715 = vmatpush3.bf16.msra.mxu1 %v3302_v4 }
 0x4d4   :  { %4716 = vmatprep.subr.bf16.mxu1 %v3301_v23 }
 0x4d6   :  { %3579 = vmatmul.mubr.bf16.gmra.mxu0 %v4796_v2  ;;  %v7065_v51 = vpop.permute.xlu0 %3374  ;;  %v7075_v31 = vpop.permute.xlu1 %3359 }
 0x4d7   :  { %4717 = vmatpush3.bf16.msra.mxu1 %v3301_v23  ;;  %3586 = vmatprep.mubr.bf16.mxu0 %v4801_v10 }
 0x4d8   :  { %4718 = vmatprep.subr.bf16.mxu1 %v3300_v61 }
 0x4da   :  { %v7069_v44 = vpop.permute.xlu0 %3364  ;;  %v7085_v4 = vpop.permute.xlu1 %3349 }
 0x4db   :  { %4719 = vmatpush3.bf16.msra.mxu1 %v3300_v61 }
 0x4dc   :  { %4720 = vmatprep.subr.bf16.mxu1 %v3299_v35 }
 0x4de   :  { %3587 = vmatmul.mubr.bf16.gmra.mxu0 %v4799_v41  ;;  %v7073_v33 = vpop.permute.xlu0 %3354  ;;  %v3340_v2 = vpop.permute.xlu1 %3339 }
 0x4df   :  { %4721 = vmatpush3.bf16.msra.mxu1 %v3299_v35  ;;  %3594 = vmatprep.mubr.bf16.mxu0 %v4804_v46 }
 0x4e0   :  { %4722 = vmatprep.subr.bf16.mxu1 %v3298_v42 }
 0x4e2   :  { %v7083_v62 = vpop.permute.xlu0 %3344  ;;  %v3330_v27 = vpop.permute.xlu1 %3329 }
 0x4e3   :  { %4723 = vmatpush3.bf16.msra.mxu1 %v3298_v42 }
 0x4e6   :  { %3595 = vmatmul.mubr.bf16.gmra.mxu0 %v4802_v5  ;;  %4725 = vmatmul.mubr.bf16.vlgmr.msra.gmra.mxu1 %v4806_v37  ;;  %v3335_v36 = vpop.permute.xlu0 %3334 }
 0x4e7   :  { %3602 = vmatprep.mubr.bf16.mxu0 %v4809_v0  ;;  %4728 = vmatprep.mubr.bf16.mxu1 %v4810_v56 }
 0x4ea   :  { %v3325_v61 = vpop.permute.xlu0 %3324 }
 0x4ee   :  { %3603 = vmatmul.mubr.bf16.gmra.mxu0 %v4807_v11  ;;  %4729 = vmatmul.mubr.bf16.gmra.mxu1 %v4811_v63 }
 0x4ef   :  { %3610 = vmatprep.mubr.bf16.mxu0 %v4814_v49  ;;  %4732 = vmatprep.mubr.bf16.mxu1 %v4815_v59 }
 0x4f6   :  { %3611 = vmatmul.mubr.bf16.gmra.mxu0 %v4812_v47  ;;  %4733 = vmatmul.mubr.bf16.gmra.mxu1 %v4816_v55 }
 0x4f7   :  { %3618 = vmatprep.mubr.bf16.mxu0 %v4819_v15  ;;  %4736 = vmatprep.mubr.bf16.mxu1 %v4820_v6 }
 0x4fe   :  { %3619 = vmatmul.mubr.bf16.gmra.mxu0 %v4817_v53  ;;  %4737 = vmatmul.mubr.bf16.gmra.mxu1 %v4821_v32 }
 0x4ff   :  { %4756 = vmatprep.mubr.msk.bf16.mxu0 %vm4850_vm2, %v7372_v38 }
 0x586   :  { %v4291_v7 = vpop.f32.mrf.mxu0 }
 0x588   :  { %v4292_v8 = vpop.f32.mrf.mxu0 }
 0x589   :  { %v4293_v19 = vadd.f32 %v4292_v8, %v4291_v7 }
 0x58a   :  { %v4294_v9 = vpop.f32.mrf.mxu0 }
 0x58b   :  { %v3565_v46 = vadd.f32 %v4293_v19, %v3325_v61 }
 0x58c   :  { %v4295_v28 = vpop.f32.mrf.mxu0 }
 0x58d   :  { %v4296_v14 = vadd.f32 %v4295_v28, %v4294_v9 }
 0x58e   :  { %v4297_v25 = vpop.f32.mrf.mxu0 }
 0x58f   :  { %v3568_v42 = vadd.f32 %v4296_v14, %v3330_v27 }
 0x590   :  { %v4298_v21 = vpop.f32.mrf.mxu0 }
 0x591   :  { %v4299_v45 = vadd.f32 %v4298_v21, %v4297_v25 }
 0x592   :  { %v4300_v22 = vpop.f32.mrf.mxu0 }
 0x593   :  { %v3573_v29 = vadd.f32 %v4299_v45, %v3335_v36 }
 0x594   :  { %v4301_v48 = vpop.f32.mrf.mxu0 }
 0x595   :  { %v4302_v43 = vadd.f32 %v4301_v48, %v4300_v22 }
 0x596   :  { %v4303_v39 = vpop.f32.mrf.mxu0 }
 0x597   :  { %v3576_v35 = vadd.f32 %v4302_v43, %v3340_v2 }
 0x598   :  { %v4304_v26 = vpop.f32.mrf.mxu0 }
 0x599   :  { %v7077_v12 = vadd.f32 %v4304_v26, %v4303_v39 }
 0x59a   :  { %v7079_v20 = vpop.f32.mrf.mxu0 }
 0x59c   :  { %v7081_v17 = vpop.f32.mrf.mxu0 }
 0x59e   :  { %v7087_v13 = vpop.f32.mrf.mxu0 }
 0x5a0   :  { %v7089_v1 = vpop.f32.mrf.mxu0 }
 0x5a2   :  { %v7091_v23 = vpop.f32.mrf.mxu0 }
 0x5a4   :  { %v7093_v52 = vpop.f32.mrf.mxu0 }
 0x5a6   :  { %v7095_v10 = vpop.f32.mrf.mxu0  ;;  %v4726_v30 = vpop.f32.mrf.mxu1 }
 0x5a7   :  { %v7097_v40 = vadd.f32 %v4726_v30, %v3573_v29 }
 0x5a8   :  { %v4316_v50 = vpop.f32.mrf.mxu0  ;;  %v3661_v18 = vpop.f32.mrf.mxu1 }
 0x5a9   :  { %v7101_v0 = vadd.f32 %v3661_v18, %v3565_v46 }
 0x5aa   :  { %v4318_v34 = vpop.f32.mrf.mxu0  ;;  %v4727_v41 = vpop.f32.mrf.mxu1 }
 0x5ab   :  { %v7099_v24 = vadd.f32 %v4727_v41, %v3576_v35  ;;  %7373 = vst [vmem:[#allocation83_spill] sm:$0xff] %v7101_v0 }
 0x5ac   :  { %v4319_v5 = vpop.f32.mrf.mxu0  ;;  %v3664_v37 = vpop.f32.mrf.mxu1 }
 0x5ad   :  { %v7105_v11 = vadd.f32 %v3664_v37, %v3568_v42  ;;  %v4320_v0 = vadd.f32 %v4319_v5, %v4318_v34 }
 0x5ae   :  { %v4321_v63 = vpop.f32.mrf.mxu0  ;;  %v7107_v49 = vpop.f32.mrf.mxu1 }
 0x5b0   :  { %v4322_v47 = vpop.f32.mrf.mxu0  ;;  %v7111_v55 = vpop.f32.mrf.mxu1 }
 0x5b1   :  { %v4323_v59 = vadd.f32 %v4322_v47, %v4321_v63 }
 0x5b2   :  { %v4324_v15 = vpop.f32.mrf.mxu0  ;;  %v4731_v6 = vpop.f32.mrf.mxu1 }
 0x5b4   :  { %v4325_v53 = vpop.f32.mrf.mxu0  ;;  %v7113_v32 = vpop.f32.mrf.mxu1 }
 0x5b5   :  { %v4326_v41 = vadd.f32 %v4325_v53, %v4324_v15 }
 0x5b6   :  { %v4327_v7 = vpop.f32.mrf.mxu0  ;;  %v4734_v8 = vpop.f32.mrf.mxu1 }
 0x5b8   :  { %v4328_v19 = vpop.f32.mrf.mxu0  ;;  %v3693_v9 = vpop.f32.mrf.mxu1 }
 0x5b9   :  { %v4329_v27 = vadd.f32 %v4328_v19, %v4327_v7 }
 0x5ba   :  { %v4330_v28 = vpop.f32.mrf.mxu0  ;;  %v4735_v14 = vpop.f32.mrf.mxu1 }
 0x5bb   :  { %v3613_v56 = vadd.f32 %v4329_v27, %v7061_v16  ;;  %v3600_v16 = vadd.f32 %v4320_v0, %v7071_v54 }
 0x5bc   :  { %v4331_v25 = vpop.f32.mrf.mxu0  ;;  %v3696_v21 = vpop.f32.mrf.mxu1 }
 0x5bd   :  { %v4332_v30 = vadd.f32 %v4331_v25, %v4330_v28  ;;  %v3608_v28 = vadd.f32 %v4326_v41, %v7067_v58  ;;  %v4311_v58 = vadd.f32 %v7089_v1, %v7087_v13  ;;  %v3724_v1 = vld [vmem:[%s7166_s9] sm:$0xf]  ;;  %s4851_s9 = smov [#allocation2]  }
 0x5be   :  { %v4333_v45 = vpop.f32.mrf.mxu0  ;;  %v4738_v22 = vpop.f32.mrf.mxu1  ;;  %s3803_s15 = sshll.u32 %s4851_s9, 4  ;;  %s3804_s15 = int_to_ptr.vmem [resolvable:$true] %s3803_s15 }
 0x5bf   :  { %v3616_v37 = vadd.f32 %v4332_v30, %v7063_v3  ;;  %v3705_v15 = vadd.f32 %v4735_v14, %v3608_v28  ;;  %v4314_v3 = vadd.f32 %v7093_v52, %v7091_v23  ;;  %v3589_v54 = vadd.f32 %v4311_v58, %v7073_v33  ;;  %s4826_s16 = scalar_lea.vmem %s3804_s15, 128  ;;  %p4831_p1 = scmp.lt.s32.totalorder %s3804_s15, %s3804_s15 }
 0x5c0   :  { %v4334_v48 = vpop.f32.mrf.mxu0  ;;  %v3709_v43 = vpop.f32.mrf.mxu1  ;;  %p4827_p0 = scmp.ne.s32.totalorder %s3804_s15, %s4826_s16  ;;  %p4832_p2 = scmp.lt.s32.totalorder %s4826_s16, %s4826_s16 }
 0x5c1   :  { %v4335_v39 = vadd.f32 %v4334_v48, %v4333_v45  ;;  %v3710_v25 = vadd.f32 %v3709_v43, %v3613_v56  ;;  %v3686_v0 = vadd.f32 %v7107_v49, %v3589_v54  ;;  %v3737_v49 = vpop.permute.xlu0 %3736 }
 0x5c2   :  { %v4336_v26 = vpop.f32.mrf.mxu0  ;;  %v4739_v36 = vpop.f32.mrf.mxu1  ;;  %p4833_p3 = por %p4832_p2, %p4831_p1 }
 0x5c3   :  { %v3621_v18 = vadd.f32 %v4335_v39, %v7057_v60  ;;  %v4317_v60 = vadd.f32 %v4316_v50, %v7095_v10  ;;  %v3697_v10 = vadd.f32 %v3696_v21, %v3600_v16  ;;  %v3592_v50 = vadd.f32 %v4314_v3, %v7075_v31 }
 0x5c4   :  { %v4337_v2 = vpop.f32.mrf.mxu0  ;;  %v3712_v35 = vpop.f32.mrf.mxu1  ;;  %p4834_p4 = pnand %p4833_p3, %p4827_p0 }
 0x5c5   :  { %v4338_v61 = vadd.f32 %v4337_v2, %v4336_v26  ;;  %v3718_v46 = vadd.f32 %v4738_v22, %v3621_v18  ;;  %v3713_v48 = vadd.f32 %v3712_v35, %v3616_v37  ;;  %v3597_v34 = vadd.f32 %v4317_v60, %v7069_v44 }
 0x5c6   :  { %v3689_v23 = vadd.f32 %v4731_v6, %v3592_v50  ;;  %v3581_v44 = vadd.f32 %v7077_v12, %v7083_v62  ;;  %v7375_v12 = vld [vmem:[#allocation83_spill] sm:$0xff] }
 0x5c7   :  { %v3624_v29 = vadd.f32 %v4338_v61, %v7059_v57  ;;  %v3605_v57 = vadd.f32 %v4323_v59, %v7065_v51  ;;  %v3731_v53 = vpack.c.bf16 %v3713_v48, %v3710_v25  ;;  %v4308_v51 = vadd.f32 %v7081_v17, %v7079_v20 }
 0x5c8   :  { %v3694_v56 = vadd.f32 %v3693_v9, %v3597_v34  ;;  %v3728_v20 = vpack.c.bf16 %v3689_v23, %v3686_v0  ;;  %v3678_v17 = vadd.f32 %v7111_v55, %v3581_v44  ;;  %v7376_v62 = vpack.c.bf16 %v7105_v11, %v7375_v12 }
 0x5c9   :  { %v3721_v42 = vadd.f32 %v4739_v36, %v3624_v29  ;;  %v3702_v63 = vadd.f32 %v4734_v8, %v3605_v57  ;;  %v3584_v13 = vadd.f32 %v4308_v51, %v7085_v4  ;;  %v7374_v4 = vpack.c.bf16 %v7099_v24, %v7097_v40 }
 0x5ca   :  { %v3729_v52 = vpack.c.bf16 %v3697_v10, %v3694_v56 }
 0x5cb   :  { %v3732_v45 = vpack.c.bf16 %v3721_v42, %v3718_v46  ;;  %v3730_v5 = vpack.c.bf16 %v3705_v15, %v3702_v63  ;;  %v3681_v31 = vadd.f32 %v7113_v32, %v3584_v13 }
 0x5cd   :  { %4741 = vmatpush3.bf16.msra.mxu0 %v3732_v45  ;;  %v3727_v33 = vpack.c.bf16 %v3681_v31, %v3678_v17 }
 0x5ce   :  { %4742 = vmatprep.subr.bf16.mxu0 %v7372_v38 }
 0x5d1   :  { %4743 = vmatpush3.bf16.msra.mxu0 %v3731_v53 }
 0x5d2   :  { %4744 = vmatprep.subr.bf16.mxu0 %v7372_v38 }
 0x5d5   :  { %4745 = vmatpush3.bf16.msra.mxu0 %v3730_v5 }
 0x5d6   :  { %4746 = vmatprep.subr.bf16.mxu0 %v7372_v38 }
 0x5d9   :  { %4747 = vmatpush3.bf16.msra.mxu0 %v3729_v52 }
 0x5da   :  { %4748 = vmatprep.subr.bf16.mxu0 %v7372_v38 }
 0x5dd   :  { %4749 = vmatpush3.bf16.msra.mxu0 %v3728_v20 }
 0x5de   :  { %4750 = vmatprep.subr.bf16.mxu0 %v7372_v38 }
 0x5e1   :  { %4751 = vmatpush3.bf16.msra.mxu0 %v3727_v33 }
 0x5e2   :  { %4752 = vmatprep.subr.bf16.mxu0 %v7372_v38 }
 0x5e5   :  { %4753 = vmatpush3.bf16.msra.mxu0 %v7374_v4 }
 0x5e6   :  { %4754 = vmatprep.subr.bf16.mxu0 %v7372_v38 }
 0x5e9   :  { %4755 = vmatpush3.bf16.msra.mxu0 %v7376_v62 }
 0x5ec   :  { %4757 = vmatmul.mubr.bf16.vlgmr.msra.gmra.mxu0 %v3724_v1 }
 0x6ac   :  { %v3773_v59 = vpop.f32.mrf.mxu0 }
 0x6ad   :  { %v3774_v47 = vadd.f32 %v3773_v59, %v3737_v49 }
 0x6ae   :  { %v4758_v55 = vpop.f32.mrf.mxu0 }
 0x6af   :  { %v3779_v6 = vrot.slane %v3774_v47, 4 }
 0x6b0   :  { %v3776_v32 = vpop.f32.mrf.mxu0 }
 0x6b1   :  { %v3780_v7 = vmax.f32 %v3774_v47, %v3779_v6 }
 0x6b2   :  { %v4759_v40 = vpop.f32.mrf.mxu0 }
 0x6b3   :  { %v3781_v24 = vrot.slane %v3780_v7, 2 }
 0x6b5   :  { %v3782_v8 = vmax.f32 %v3780_v7, %v3781_v24 }
 0x6b7   :  { %v3783_v38 = vrot.slane %v3782_v8, 1 }
 0x6b9   :  { %v3784_v19 = vmax.f32 %v3782_v8, %v3783_v38 }
 0x6bb   :  { %v3785_v9 = vsub.f32 %v3774_v47, %v3784_v19 }
 0x6bd   :  { %v3786_v11 = vmul.f32 1.442695, %v3785_v9 }
 0x6bf   :  { %4822 = vpow2.f32 %v3786_v11 }
 0x6cc   :  { %v4823_v14 = vpop.eup %4822 }
 0x6cd   :  { %v3788_v21 = vrot.slane %v4823_v14, 4 }
 0x6cf   :  { %v3789_v22 = vadd.f32 %v4823_v14, %v3788_v21 }
 0x6d1   :  { %v3790_v43 = vrot.slane %v3789_v22, 2 }
 0x6d3   :  { %v3791_v39 = vadd.f32 %v3790_v43, %v3789_v22 }
 0x6d5   :  { %v3792_v26 = vrot.slane %v3791_v39, 1 }
 0x6d7   :  { %v3793_v36 = vadd.f32 %v3792_v26, %v3791_v39 }
 0x6d9   :  { %4824 = vrcp.f32 %v3793_v36 }
 0x6e6   :  { %v4825_v2 = vpop.eup %4824 }
 0x6e7   :  { %v3795_v30 = vmul.f32 %v4825_v2, %v4823_v14 }
 0x6e9   :  { %3796 = vst [vmem:[#allocation2] sm:$0xff] %v3795_v30 }
 0x6ea   :  { %4837 = shalt.err (!%p4834_p4)
}
 0x6eb   :  { %3806 = dma.vmem_to_hbm [thread:$0]  %s3804_s15, 128, %s7168_s11, [#allocation3]  }
 0x6ec   :  { %4846 = dma.done.wait [#allocation3], 128  }
 0x6ed   :  { %4847 = vsyncadd [#allocation3], 4294967168 }
 0x6ee   :  { %3810 = vsyncpa [#allocation3], 1 }

</bundles_post_ra>
